<compile_context>
chip_gen: v6e
topology: v6e:2x2x1
jax: 0.10.0
libtpu: 0.0.40
codegen_flags: <defaults>
</compile_context>

<pallas_src>
import functools
import numpy as np

import jax
import jax.numpy as jnp
from jax.experimental import pallas as pl
from jax.experimental.pallas import tpu as pltpu


# ----------------------------------------------------------------------------
# small helpers
# ----------------------------------------------------------------------------
def _round_up(x, n):
    return (x + n - 1) // n * n


def _pad2(a, rows, cols):
    out = jnp.zeros((rows, cols), a.dtype)
    return out.at[:a.shape[0], :a.shape[1]].set(a)


def _nbytes(*arrs):
    return int(sum(int(np.prod(a.shape)) * a.dtype.itemsize for a in arrs))


@functools.lru_cache(maxsize=1)
def _vmem_limit_bytes():
    # Generation-aware scoped-VMEM budget: ~80% of capacity (~102 MiB on
    # v5e/v6e, ~51 MiB on v7x). Conservative fallback if the query fails.
    try:
        cap = int(pltpu.get_tpu_info().vmem_capacity_bytes)
        return max(32 * 1024 * 1024, int(cap * 0.8))
    except Exception:
        return 32 * 1024 * 1024


def compute_dims(*, C, K, Q, m):
    P = _round_up(max(2 * C, C), 128)       # per-branch GNN feature lanes
    P4 = _round_up(4 * C, 128)              # fc2 output lanes
    KP = _round_up(Q * K ** 3 + 6, 128)     # cube samples + coords + normal, padded
    Mp = _round_up(max(m, 128), 128)        # lane-dense adjacency (>= 128 lanes)
    tm = Mp if Mp <= 512 else 512           # kernel-1 row tile (~HBM roofline at 512)
    Mp = _round_up(Mp, tm)
    return dict(P=P, P4=P4, KP=KP, Mp=Mp, tm=tm)


# ----------------------------------------------------------------------------
# Pallas kernel 1: fused NodeFeatureNet MLP chain (row-tiled, "parallel")
#   input stream lanes: [cube samples (Q*K^3) | coords(3) | normal(3) | 0...]
#   w01 lanes [0,P)  = Conv3d(full cube kernel == matmul) on the cube lanes,
#   w01 lanes [P,2P) = fc1 on the coord+normal lanes.
# ----------------------------------------------------------------------------
def _node_feature_kernel(z_ref, w01_ref, b01_ref, wlf_ref, blf_ref,
                         w2_ref, b2_ref, w3_ref, b3_ref, o_ref, *, P):
    def lrelu(x):
        return jnp.where(x >= 0.0, x, 0.2 * x)

    def dense(x, w_ref, b_ref):
        return jnp.dot(x.astype(jnp.bfloat16), w_ref[...],
                       preferred_element_type=jnp.float32) + b_ref[...]

    h01 = lrelu(dense(z_ref[...], w01_ref, b01_ref))          # (tm, 2P)
    z_point = h01[:, P:]                                       # lrelu(fc1(x))
    z_local = lrelu(dense(h01[:, :P], wlf_ref, blf_ref))       # lrelu(localfc(lrelu(conv)))
    z = jnp.concatenate([z_point, z_local], axis=-1)           # fc2 input, K = 2P = 256
    h2 = lrelu(dense(z, w2_ref, b2_ref))                       # fc2 + lrelu
    o_ref[...] = lrelu(dense(h2, w3_ref, b3_ref)).astype(o_ref.dtype)   # fc3 + lrelu


def node_feature_net(z_comb, nfn, *, tm, P, P4, KP):
    Mp = z_comb.shape[0]
    grid = (Mp // tm,)
    row = lambda shape: pl.BlockSpec(shape, lambda i: (i, 0))
    cst = lambda shape: pl.BlockSpec(shape, lambda i: (0, 0))

    in_specs = [
        row((tm, KP)),
        cst((KP, 2 * P)), cst((1, 2 * P)),
        cst((P, P)), cst((1, P)),
        cst((2 * P, P4)), cst((1, P4)),
        cst((P4, P)), cst((1, P)),
    ]
    operands = (z_comb, nfn['w01'], nfn['b01'], nfn['wlf'], nfn['blf'],
                nfn['w2'], nfn['b2'], nfn['w3'], nfn['b3'])
    flops = 2 * Mp * (KP * 2 * P + P * P + 2 * P * P4 + P4 * P)
    cost = pl.CostEstimate(flops=flops, transcendentals=0,
                           bytes_accessed=_nbytes(*operands) + Mp * P * 2)

    return pl.pallas_call(
        functools.partial(_node_feature_kernel, P=P),
        out_shape=jax.ShapeDtypeStruct((Mp, P), jnp.bfloat16),   # bf16 inter-kernel act
        grid_spec=pltpu.PrefetchScalarGridSpec(
            num_scalar_prefetch=0, grid=grid,
            in_specs=in_specs,
            out_specs=row((tm, P))),
        compiler_params=pltpu.CompilerParams(
            dimension_semantics=("parallel",),
            vmem_limit_bytes=_vmem_limit_bytes()),
        cost_estimate=cost,
    )(*operands)


# ----------------------------------------------------------------------------
# Pallas kernel 2: fully fused GNN (shared stack + deform/cls stacks + heads)
#   grid=(n_shared + n_task + 1,)
#   scratch x_scr (Mp, 2P):
#     shared layers use lanes [0,P); at the branch point the shared features
#     are copied into lanes [P,2P); task layers then run the deform branch in
#     [0,P) and the cls branch in [P,2P) (one N=2P A@XW per layer);
#     the last step applies both output heads (+ masked log_softmax).
#   A_hat stays in HBM (memory_space=ANY) and is DMA'd ONCE into a single
#   VMEM scratch at l == 0 (no double-buffering of the grid-constant operand).
# ----------------------------------------------------------------------------
def _fused_gnn_kernel(x0_ref, a_hbm_ref, w_ref, b_ref, s_ref, t_ref, o_ref,
                      a_vmem, x_scr, dma_sem,
                      *, P, n_shared, n_task, num_classes):
    l = pl.program_id(0)

    def lrelu(x):
        return jnp.where(x >= 0.0, x, 0.2 * x)

    def bf(x):
        return x.astype(jnp.bfloat16)

    @pl.when(l == 0)
    def _init():
        cp = pltpu.make_async_copy(a_hbm_ref, a_vmem, dma_sem.at[0])
        cp.start()
        cp.wait()
        x_scr[:, :P] = x0_ref[...].astype(jnp.float32)

    # ---- shared layers: x = BN(LeakyReLU(A @ (x @ W) + b)) on lanes [0,P) ----
    @pl.when(l < n_shared)
    def _shared():
        a = a_vmem[...]
        x = x_scr[:, :P]
        xw = jnp.dot(bf(x), w_ref[0, 0], preferred_element_type=jnp.float32)
        h = jnp.dot(a, bf(xw), preferred_element_type=jnp.float32) + b_ref[0][:, :P]
        xn = lrelu(h) * s_ref[0][:, :P] + t_ref[0][:, :P]
        x_scr[:, :P] = xn

        @pl.when(l == n_shared - 1)
        def _branch():
            # branch point: both task branches (deform | cls) start from `shared`
            x_scr[:, P:] = xn

    # ---- task layers: x = Dropout(BN(LeakyReLU(GCN(x)))) + residual ----------
    @pl.when(jnp.logical_and(l >= n_shared, l < n_shared + n_task))
    def _task():
        a = a_vmem[...]
        x = x_scr[...]
        xw = jnp.concatenate(
            [jnp.dot(bf(x[:, :P]), w_ref[0, 0], preferred_element_type=jnp.float32),
             jnp.dot(bf(x[:, P:]), w_ref[0, 1], preferred_element_type=jnp.float32)],
            axis=-1)                                                   # (Mp, 2P)
        h = jnp.dot(a, bf(xw), preferred_element_type=jnp.float32) + b_ref[0]
        x_scr[...] = lrelu(h) * s_ref[0] + t_ref[0] + x                # Dropout = id (eval)

    # ---- heads: deform output (sf folded) | class logits + log_softmax -------
    @pl.when(l == n_shared + n_task)
    def _head():
        a = a_vmem[...]
        x = x_scr[...]
        xw = jnp.concatenate(
            [jnp.dot(bf(x[:, :P]), w_ref[0, 0], preferred_element_type=jnp.float32),
             jnp.dot(bf(x[:, P:]), w_ref[0, 1], preferred_element_type=jnp.float32)],
            axis=-1)
        h = jnp.dot(a, bf(xw), preferred_element_type=jnp.float32) + b_ref[0]
        cls = h[:, P:]
        col = jax.lax.broadcasted_iota(jnp.int32, cls.shape, 1)
        cls = jnp.where(col < num_classes, cls, -1e30)                 # mask padded lanes
        cls = cls - jnp.max(cls, axis=-1, keepdims=True)
        cls = cls - jnp.log(jnp.sum(jnp.exp(cls), axis=-1, keepdims=True))
        o_ref[...] = jnp.concatenate([h[:, :P], cls], axis=-1)


def fused_gnn(x0, a_bf, W, B, S, T, *, P, n_shared, n_task, num_classes):
    L = W.shape[0]
    assert L == n_shared + n_task + 1
    Mp = x0.shape[0]
    kernel = functools.partial(_fused_gnn_kernel, P=P, n_shared=n_shared,
                               n_task=n_task, num_classes=num_classes)

    flops = (n_shared * (2 * Mp * P * P + 2 * Mp * Mp * P)
             + (n_task + 1) * (4 * Mp * P * P + 4 * Mp * Mp * P))
    cost = pl.CostEstimate(
        flops=flops, transcendentals=Mp * P,
        bytes_accessed=_nbytes(x0, a_bf, W, B, S, T) + Mp * 2 * P * 4)

    return pl.pallas_call(
        kernel,
        out_shape=jax.ShapeDtypeStruct((Mp, 2 * P), jnp.float32),
        grid_spec=pltpu.PrefetchScalarGridSpec(
            num_scalar_prefetch=0,
            grid=(L,),
            in_specs=[
                pl.BlockSpec((Mp, P), lambda l: (0, 0)),          # x0 (small, loaded once)
                pl.BlockSpec(memory_space=pl.ANY),                # A_hat stays in HBM
                pl.BlockSpec((1, 2, P, P), lambda l: (l, 0, 0, 0)),  # W  (deform | cls)
                pl.BlockSpec((1, 1, 2 * P), lambda l: (l, 0, 0)),    # bias
                pl.BlockSpec((1, 1, 2 * P), lambda l: (l, 0, 0)),    # bn scale
                pl.BlockSpec((1, 1, 2 * P), lambda l: (l, 0, 0)),    # bn shift
            ],
            out_specs=pl.BlockSpec((Mp, 2 * P), lambda l: (0, 0)),
            scratch_shapes=[
                pltpu.VMEM((Mp, Mp), jnp.bfloat16),      # A_hat, single VMEM copy
                pltpu.VMEM((Mp, 2 * P), jnp.float32),    # layer-resident activations
                pltpu.SemaphoreType.DMA((1,)),
            ],
        ),
        compiler_params=pltpu.CompilerParams(
            dimension_semantics=("arbitrary",),          # layers carry state sequentially
            vmem_limit_bytes=_vmem_limit_bytes()),
        cost_estimate=cost,
    )(x0, a_bf, W, B, S, T)


# ----------------------------------------------------------------------------
# Plain-JAX glue (gather / scatter ops with no clean Pallas equivalent)
# ----------------------------------------------------------------------------
def make_x_shift(K):
    # exact reproduction of NodeFeatureNet.__init__ grid construction
    grid = np.linspace(-K // 2, K // 2, K)
    grid_3d = np.stack(np.meshgrid(grid, grid, grid), axis=0).transpose(2, 1, 3, 0)
    return jnp.asarray(grid_3d.copy().reshape(-1, 3), jnp.float32)


def trilinear_sample_border(vol, coords):
    # F.grid_sample(mode='bilinear', padding_mode='border', align_corners=True)
    D1, D2, D3 = vol.shape
    cx = jnp.clip((coords[:, 0] + 1.0) * 0.5 * (D3 - 1), 0.0, D3 - 1)
    cy = jnp.clip((coords[:, 1] + 1.0) * 0.5 * (D2 - 1), 0.0, D2 - 1)
    cz = jnp.clip((coords[:, 2] + 1.0) * 0.5 * (D1 - 1), 0.0, D1 - 1)
    x0f, y0f, z0f = jnp.floor(cx), jnp.floor(cy), jnp.floor(cz)
    wx, wy, wz = cx - x0f, cy - y0f, cz - z0f
    x0 = jnp.clip(x0f.astype(jnp.int32), 0, D3 - 1)
    y0 = jnp.clip(y0f.astype(jnp.int32), 0, D2 - 1)
    z0 = jnp.clip(z0f.astype(jnp.int32), 0, D1 - 1)
    x1 = jnp.clip(x0 + 1, 0, D3 - 1)
    y1 = jnp.clip(y0 + 1, 0, D2 - 1)
    z1 = jnp.clip(z0 + 1, 0, D1 - 1)

    def g(zi, yi, xi):
        return vol[zi, yi, xi]

    c00 = g(z0, y0, x0) * (1 - wx) + g(z0, y0, x1) * wx
    c01 = g(z0, y1, x0) * (1 - wx) + g(z0, y1, x1) * wx
    c10 = g(z1, y0, x0) * (1 - wx) + g(z1, y0, x1) * wx
    c11 = g(z1, y1, x0) * (1 - wx) + g(z1, y1, x1) * wx
    c0 = c00 * (1 - wy) + c01 * wy
    c1 = c10 * (1 - wy) + c11 * wy
    return c0 * (1 - wz) + c1 * wz


def cube_sampling(v, vol, x_shift, D, rescale, K, m):
    # NodeFeatureNet.cube_sampling, Q == 1 (n_scale=1)
    # TODO(synk): Q > 1 would require the avg_pool3d volume pyramid.
    xq = v[0][:, None, :] + x_shift[None, :, :] / D * 2.0        # (m, K^3, 3)
    xq = xq.reshape(-1, 3) / rescale[None, :]
    samples = trilinear_sample_border(vol, xq)                   # (m*K^3,)
    return samples.reshape(m, K * K * K)


def vertex_normals(verts, faces):
    # pytorch3d Meshes.verts_normals_packed() semantics
    m = verts.shape[0]
    v0 = verts[faces[:, 0]]
    v1 = verts[faces[:, 1]]
    v2 = verts[faces[:, 2]]
    n = jnp.zeros((m, 3), jnp.float32)
    n = n.at[faces[:, 1]].add(jnp.cross(v2 - v1, v0 - v1))
    n = n.at[faces[:, 2]].add(jnp.cross(v0 - v2, v1 - v2))
    n = n.at[faces[:, 0]].add(jnp.cross(v1 - v0, v2 - v0))
    norm = jnp.maximum(jnp.linalg.norm(n, axis=1, keepdims=True), 1e-6)
    return n / norm


def gcn_norm_adj(edge_index, m):
    # PyG GCNConv gcn_norm: sum duplicate edges, add self loops only where
    # missing, symmetric normalization (dense A_hat).
    row, col = edge_index[0], edge_index[1]          # source -> target
    A = jnp.zeros((m, m), jnp.float32).at[col, row].add(1.0)
    diag = jnp.diagonal(A)
    A = A + jnp.diag(jnp.where(diag == 0, 1.0, 0.0))
    deg = jnp.sum(A, axis=1)
    dinv = jnp.where(deg > 0, 1.0 / jnp.sqrt(deg), 0.0)
    return A * dinv[:, None] * dinv[None, :]


# ----------------------------------------------------------------------------
# Parameters (deterministic synthetic init) + packing into padded bf16 stacks
# ----------------------------------------------------------------------------
def init_params(key, C, K, Q, num_classes, shared_layers, task_layers):
    keys = iter(jax.random.split(key, 64))

    def lin(cin, cout):
        kw, kb = next(keys), next(keys)
        return (jax.random.normal(kw, (cin, cout), jnp.float32) * 0.1,
                jax.random.normal(kb, (cout,), jnp.float32) * 0.1)

    def gcn_bn_layer(cin, cout):
        w, b = lin(cin, cout)
        kg, kbt = next(keys), next(keys)
        gamma = 1.0 + 0.1 * jax.random.normal(kg, (cout,), jnp.float32)
        beta = 0.1 * jax.random.normal(kbt, (cout,), jnp.float32)
        eps = 1e-5                      # eval BN: running_mean=0, running_var=1
        return {'w': w, 'b': b,
                'bn_scale': gamma / jnp.sqrt(1.0 + eps),
                'bn_shift': beta}

    p = {}
    p['localconv_w'], p['localconv_b'] = lin(Q * K * K * K, C)   # Conv3d as matmul
    p['localfc_w'], p['localfc_b'] = lin(C, C)
    p['fc1_w'], p['fc1_b'] = lin(6, C)
    p['fc2_w'], p['fc2_b'] = lin(2 * C, 4 * C)
    p['fc3_w'], p['fc3_b'] = lin(4 * C, 2 * C)
    p['shared'] = [gcn_bn_layer(2 * C if i == 0 else C, C)
                   for i in range(shared_layers)]
    p['deform'] = [gcn_bn_layer(C, C) for _ in range(task_layers)]
    p['deform_out_w'], p['deform_out_b'] = lin(C, 3)
    p['cls'] = [gcn_bn_layer(C, C) for _ in range(task_layers)]
    p['cls_out_w'], p['cls_out_b'] = lin(C, num_classes)
    return p


def pack_params(p, *, C, sf, dims):
    P, P4, KP = dims['P'], dims['P4'], dims['KP']
    QK3 = p['localconv_w'].shape[0]

    def wpad(w, r, c):
        return _pad2(w, r, c).astype(jnp.bfloat16)

    def bpad(b, c):
        return _pad2(b.reshape(1, -1).astype(jnp.float32), 1, c)

    # --- NodeFeatureNet: localconv + fc1 folded into one combined weight ---
    w01 = jnp.zeros((KP, 2 * P), jnp.float32)
    w01 = w01.at[:QK3, :C].set(p['localconv_w'])           # cube lanes -> conv out
    w01 = w01.at[QK3:QK3 + 6, P:P + C].set(p['fc1_w'])     # coord+normal lanes -> fc1 out
    b01 = jnp.zeros((1, 2 * P), jnp.float32)
    b01 = b01.at[0, :C].set(p['localconv_b'])
    b01 = b01.at[0, P:P + C].set(p['fc1_b'])

    # fc2 consumes concat([z_point (P lanes), z_local (P lanes)]) -> K = 2P
    w2 = jnp.zeros((2 * P, P4), jnp.float32)
    w2 = w2.at[:C, :4 * C].set(p['fc2_w'][:C])             # z_point rows
    w2 = w2.at[P:P + C, :4 * C].set(p['fc2_w'][C:])        # z_local rows

    nfn = dict(
        w01=w01.astype(jnp.bfloat16), b01=b01,
        wlf=wpad(p['localfc_w'], P, P), blf=bpad(p['localfc_b'], P),
        w2=w2.astype(jnp.bfloat16), b2=bpad(p['fc2_b'], P4),
        w3=wpad(p['fc3_w'], P4, P), b3=bpad(p['fc3_b'], P),
    )

    # --- fused GNN stack: shared layers, then task layers (deform | cls), head ---
    zeros_w = jnp.zeros((P, P), jnp.bfloat16)
    zeros_b = jnp.zeros((1, P), jnp.float32)

    Ws, Bs, Ss, Ts = [], [], [], []
    for l in p['shared']:
        Ws.append(jnp.stack([wpad(l['w'], P, P), zeros_w]))
        Bs.append(jnp.concatenate([bpad(l['b'], P), zeros_b], axis=-1))
        Ss.append(jnp.concatenate([bpad(l['bn_scale'], P), zeros_b], axis=-1))
        Ts.append(jnp.concatenate([bpad(l['bn_shift'], P), zeros_b], axis=-1))
    for ld, lc in zip(p['deform'], p['cls']):
        Ws.append(jnp.stack([wpad(ld['w'], P, P), wpad(lc['w'], P, P)]))
        Bs.append(jnp.concatenate([bpad(ld['b'], P), bpad(lc['b'], P)], axis=-1))
        Ss.append(jnp.concatenate([bpad(ld['bn_scale'], P),
                                   bpad(lc['bn_scale'], P)], axis=-1))
        Ts.append(jnp.concatenate([bpad(ld['bn_shift'], P),
                                   bpad(lc['bn_shift'], P)], axis=-1))
    # head step: deform head (sf folded into W/b) | classification head
    Ws.append(jnp.stack([wpad(p['deform_out_w'] * sf, P, P),
                         wpad(p['cls_out_w'], P, P)]))
    Bs.append(jnp.concatenate([bpad(p['deform_out_b'] * sf, P),
                               bpad(p['cls_out_b'], P)], axis=-1))
    Ss.append(jnp.zeros((1, 2 * P), jnp.float32))   # unused on head step
    Ts.append(jnp.zeros((1, 2 * P), jnp.float32))

    gnn = (jnp.stack(Ws), jnp.stack(Bs), jnp.stack(Ss), jnp.stack(Ts))
    return dict(nfn=nfn, gnn=gnn)


# ----------------------------------------------------------------------------
# Full DeformBlockGNN.forward
# ----------------------------------------------------------------------------
def deform_block_gnn_forward(packed, v, vol, faces, A_bf, x_shift, rescale, *,
                             C, K, Q, m, D, num_classes,
                             shared_layers, task_layers, dims):
    P, P4, KP = dims['P'], dims['P4'], dims['KP']
    Mp, tm = dims['Mp'], dims['tm']
    QK3 = Q * K * K * K

    # ---- NodeFeatureNet glue (gather-heavy, plain JAX) ----
    cubes = cube_sampling(v, vol, x_shift, D, rescale, K, m)     # (m, Q*K^3)
    normal = vertex_normals(v[0], faces)                         # (m, 3)
    feat = jnp.concatenate([cubes, v[0], normal], axis=1)        # (m, Q*K^3 + 6)
    z_comb = jnp.zeros((Mp, KP), jnp.bfloat16).at[:m, :QK3 + 6].set(
        feat.astype(jnp.bfloat16))                               # single bf16 stream

    # ---- fused NodeFeatureNet MLP chain (pallas_call #1) ----
    x0 = node_feature_net(z_comb, packed['nfn'], tm=tm, P=P, P4=P4, KP=KP)

    # ---- fused Shared + Deformation + Classification GNN (pallas_call #2) ----
    out = fused_gnn(x0, A_bf, *packed['gnn'],
                    P=P, n_shared=shared_layers, n_task=task_layers,
                    num_classes=num_classes)                     # (Mp, 2P)

    dx = out[:m, :3]                                             # sf already folded
    class_logits = out[:m, P:P + num_classes]
    return dx, class_logits


# ----------------------------------------------------------------------------
if __name__ == "__main__":
    C, K, Q = 32, 3, 1
    sf = 0.1
    total_layers = 4
    num_classes = 10
    m = 64                      # number of mesh vertices
    D1, D2, D3 = 12, 16, 16     # volume V[0,0].shape
    shared_layers = total_layers // 2
    task_layers = shared_layers

    key = jax.random.PRNGKey(0)
    kv, kvol, kp = jax.random.split(key, 3)
    v = jax.random.uniform(kv, (1, m, 3), jnp.float32) - 0.5          # verts in [-0.5,0.5)
    V = jax.random.normal(kvol, (1, 1, D1, D2, D3), jnp.float32)      # intensity volume
    idx = jnp.arange(m)
    faces = jnp.stack([idx, (idx + 1) % m, (idx + 2) % m], axis=1).astype(jnp.int32)
    src = jnp.concatenate([idx, (idx + 1) % m]).astype(jnp.int32)
    dst = jnp.concatenate([(idx + 1) % m, idx]).astype(jnp.int32)
    edge_index = jnp.stack([src, dst], axis=0)                        # (2, 2m)

    params = init_params(kp, C, K, Q, num_classes, shared_layers, task_layers)
    dims = compute_dims(C=C, K=K, Q=Q, m=m)

    # set_data() equivalents
    D = max(D1, D2, D3)
    rescale = jnp.asarray([D3 / D, D2 / D, D1 / D], jnp.float32)
    x_shift = make_x_shift(K)
    A_hat = gcn_norm_adj(edge_index, m)
    # bf16 adjacency (f32-accumulated in the MXU); small drift vs f32 reference.
    A_bf = _pad2(A_hat, dims['Mp'], dims['Mp']).astype(jnp.bfloat16)

    packed = pack_params(params, C=C, sf=sf, dims=dims)

    fwd = jax.jit(functools.partial(
        deform_block_gnn_forward,
        C=C, K=K, Q=Q, m=m, D=D, num_classes=num_classes,
        shared_layers=shared_layers, task_layers=task_layers, dims=dims))

    dx, class_logits = fwd(packed, v, V[0, 0], faces, A_bf, x_shift, rescale)
    jax.block_until_ready((dx, class_logits))
    assert dx.shape == (m, 3) and class_logits.shape == (m, num_classes)
    assert bool(jnp.all(jnp.isfinite(dx))) and bool(jnp.all(jnp.isfinite(class_logits)))
    print("KERNEL_OK")
</pallas_src>

<mosaic_0001>
module attributes {stable_mosaic.version = 11 : i64} {
  func.func @_node_feature_kernel(%arg0: i32, %arg1: memref<128x128xbf16, #tpu.memory_space<vmem>>, %arg2: memref<128x256xbf16, #tpu.memory_space<vmem>>, %arg3: memref<1x256xf32, #tpu.memory_space<vmem>>, %arg4: memref<128x128xbf16, #tpu.memory_space<vmem>>, %arg5: memref<1x128xf32, #tpu.memory_space<vmem>>, %arg6: memref<256x128xbf16, #tpu.memory_space<vmem>>, %arg7: memref<1x128xf32, #tpu.memory_space<vmem>>, %arg8: memref<128x128xbf16, #tpu.memory_space<vmem>>, %arg9: memref<1x128xf32, #tpu.memory_space<vmem>>, %arg10: memref<128x128xbf16, #tpu.memory_space<vmem>>) attributes {dimension_semantics = [#tpu.dimension_semantics<parallel>], iteration_bounds = array<i64: 1>, scalar_prefetch = 0 : i64, scratch_operands = 0 : i64, tpu.core_type = #tpu.core_type<tc>, window_params = [{transform_indices = @transform_0, window_bounds = array<i64: 128, 128>}, {pipeline_mode = #tpu.pipeline_mode<synchronous>, transform_indices = @transform_1, window_bounds = array<i64: 128, 256>}, {pipeline_mode = #tpu.pipeline_mode<synchronous>, transform_indices = @transform_2, window_bounds = array<i64: 1, 256>}, {pipeline_mode = #tpu.pipeline_mode<synchronous>, transform_indices = @transform_3, window_bounds = array<i64: 128, 128>}, {pipeline_mode = #tpu.pipeline_mode<synchronous>, transform_indices = @transform_4, window_bounds = array<i64: 1, 128>}, {pipeline_mode = #tpu.pipeline_mode<synchronous>, transform_indices = @transform_5, window_bounds = array<i64: 256, 128>}, {pipeline_mode = #tpu.pipeline_mode<synchronous>, transform_indices = @transform_6, window_bounds = array<i64: 1, 128>}, {pipeline_mode = #tpu.pipeline_mode<synchronous>, transform_indices = @transform_7, window_bounds = array<i64: 128, 128>}, {pipeline_mode = #tpu.pipeline_mode<synchronous>, transform_indices = @transform_8, window_bounds = array<i64: 1, 128>}, {transform_indices = @transform_9, window_bounds = array<i64: 128, 128>}]} {
    %c0 = arith.constant 0 : index
    %c0_0 = arith.constant 0 : index
    %0 = vector.load %arg1[%c0, %c0_0] : memref<128x128xbf16, #tpu.memory_space<vmem>>, vector<128x128xbf16>
    %c0_1 = arith.constant 0 : index
    %c0_2 = arith.constant 0 : index
    %1 = vector.load %arg2[%c0_1, %c0_2] : memref<128x256xbf16, #tpu.memory_space<vmem>>, vector<128x256xbf16>
    %cst = arith.constant dense<0.000000e+00> : vector<128x256xf32>
    %2 = tpu.matmul %0, %1, %cst {dimension_numbers = #tpu.dot_dimension_numbers<[1], [0], [0], [1], [0, 0, 1, 1], [], []>} : vector<128x128xbf16>, vector<128x256xbf16>, vector<128x256xf32> -> vector<128x256xf32>
    %c0_3 = arith.constant 0 : index
    %c0_4 = arith.constant 0 : index
    %3 = vector.load %arg3[%c0_3, %c0_4] : memref<1x256xf32, #tpu.memory_space<vmem>>, vector<1x256xf32>
    %4 = vector.broadcast %3 : vector<1x256xf32> to vector<128x256xf32>
    %5 = arith.addf %2, %4 : vector<128x256xf32>
    %cst_5 = arith.constant 0.000000e+00 : f32
    %6 = vector.broadcast %cst_5 : f32 to vector<128x256xf32>
    %7 = arith.cmpf oge, %5, %6 : vector<128x256xf32>
    %cst_6 = arith.constant 2.000000e-01 : f32
    %8 = vector.broadcast %cst_6 : f32 to vector<128x256xf32>
    %9 = arith.mulf %8, %5 : vector<128x256xf32>
    %10 = arith.select %7, %5, %9 : vector<128x256xi1>, vector<128x256xf32>
    %11 = vector.extract_strided_slice %10 {offsets = [0, 128], sizes = [128, 128], strides = [1, 1]} : vector<128x256xf32> to vector<128x128xf32>
    %12 = vector.extract_strided_slice %10 {offsets = [0, 0], sizes = [128, 128], strides = [1, 1]} : vector<128x256xf32> to vector<128x128xf32>
    %13 = arith.truncf %12 : vector<128x128xf32> to vector<128x128xbf16>
    %c0_7 = arith.constant 0 : index
    %c0_8 = arith.constant 0 : index
    %14 = vector.load %arg4[%c0_7, %c0_8] : memref<128x128xbf16, #tpu.memory_space<vmem>>, vector<128x128xbf16>
    %cst_9 = arith.constant dense<0.000000e+00> : vector<128x128xf32>
    %15 = tpu.matmul %13, %14, %cst_9 {dimension_numbers = #tpu.dot_dimension_numbers<[1], [0], [0], [1], [0, 0, 1, 1], [], []>} : vector<128x128xbf16>, vector<128x128xbf16>, vector<128x128xf32> -> vector<128x128xf32>
    %c0_10 = arith.constant 0 : index
    %c0_11 = arith.constant 0 : index
    %16 = vector.load %arg5[%c0_10, %c0_11] : memref<1x128xf32, #tpu.memory_space<vmem>>, vector<1x128xf32>
    %17 = vector.broadcast %16 : vector<1x128xf32> to vector<128x128xf32>
    %18 = arith.addf %15, %17 : vector<128x128xf32>
    %cst_12 = arith.constant 0.000000e+00 : f32
    %19 = vector.broadcast %cst_12 : f32 to vector<128x128xf32>
    %20 = arith.cmpf oge, %18, %19 : vector<128x128xf32>
    %cst_13 = arith.constant 2.000000e-01 : f32
    %21 = vector.broadcast %cst_13 : f32 to vector<128x128xf32>
    %22 = arith.mulf %21, %18 : vector<128x128xf32>
    %23 = arith.select %20, %18, %22 : vector<128x128xi1>, vector<128x128xf32>
    %24 = tpu.concatenate %11, %23 in 1 : vector<128x128xf32>, vector<128x128xf32> -> vector<128x256xf32>
    %25 = arith.truncf %24 : vector<128x256xf32> to vector<128x256xbf16>
    %c0_14 = arith.constant 0 : index
    %c0_15 = arith.constant 0 : index
    %26 = vector.load %arg6[%c0_14, %c0_15] : memref<256x128xbf16, #tpu.memory_space<vmem>>, vector<256x128xbf16>
    %cst_16 = arith.constant dense<0.000000e+00> : vector<128x128xf32>
    %27 = tpu.matmul %25, %26, %cst_16 {dimension_numbers = #tpu.dot_dimension_numbers<[1], [0], [0], [1], [0, 0, 1, 1], [], []>} : vector<128x256xbf16>, vector<256x128xbf16>, vector<128x128xf32> -> vector<128x128xf32>
    %c0_17 = arith.constant 0 : index
    %c0_18 = arith.constant 0 : index
    %28 = vector.load %arg7[%c0_17, %c0_18] : memref<1x128xf32, #tpu.memory_space<vmem>>, vector<1x128xf32>
    %29 = vector.broadcast %28 : vector<1x128xf32> to vector<128x128xf32>
    %30 = arith.addf %27, %29 : vector<128x128xf32>
    %cst_19 = arith.constant 0.000000e+00 : f32
    %31 = vector.broadcast %cst_19 : f32 to vector<128x128xf32>
    %32 = arith.cmpf oge, %30, %31 : vector<128x128xf32>
    %cst_20 = arith.constant 2.000000e-01 : f32
    %33 = vector.broadcast %cst_20 : f32 to vector<128x128xf32>
    %34 = arith.mulf %33, %30 : vector<128x128xf32>
    %35 = arith.select %32, %30, %34 : vector<128x128xi1>, vector<128x128xf32>
    %36 = arith.truncf %35 : vector<128x128xf32> to vector<128x128xbf16>
    %c0_21 = arith.constant 0 : index
    %c0_22 = arith.constant 0 : index
    %37 = vector.load %arg8[%c0_21, %c0_22] : memref<128x128xbf16, #tpu.memory_space<vmem>>, vector<128x128xbf16>
    %cst_23 = arith.constant dense<0.000000e+00> : vector<128x128xf32>
    %38 = tpu.matmul %36, %37, %cst_23 {dimension_numbers = #tpu.dot_dimension_numbers<[1], [0], [0], [1], [0, 0, 1, 1], [], []>} : vector<128x128xbf16>, vector<128x128xbf16>, vector<128x128xf32> -> vector<128x128xf32>
    %c0_24 = arith.constant 0 : index
    %c0_25 = arith.constant 0 : index
    %39 = vector.load %arg9[%c0_24, %c0_25] : memref<1x128xf32, #tpu.memory_space<vmem>>, vector<1x128xf32>
    %40 = vector.broadcast %39 : vector<1x128xf32> to vector<128x128xf32>
    %41 = arith.addf %38, %40 : vector<128x128xf32>
    %cst_26 = arith.constant 0.000000e+00 : f32
    %42 = vector.broadcast %cst_26 : f32 to vector<128x128xf32>
    %43 = arith.cmpf oge, %41, %42 : vector<128x128xf32>
    %cst_27 = arith.constant 2.000000e-01 : f32
    %44 = vector.broadcast %cst_27 : f32 to vector<128x128xf32>
    %45 = arith.mulf %44, %41 : vector<128x128xf32>
    %46 = arith.select %43, %41, %45 : vector<128x128xi1>, vector<128x128xf32>
    %47 = arith.truncf %46 : vector<128x128xf32> to vector<128x128xbf16>
    %c0_28 = arith.constant 0 : index
    %c0_29 = arith.constant 0 : index
    %48 = vector.load %arg10[%c0_28, %c0_29] : memref<128x128xbf16, #tpu.memory_space<vmem>>, vector<128x128xbf16>
    tpu.vector_store %arg10[%c0_28, %c0_29], %47 {strides = array<i32>} : memref<128x128xbf16, #tpu.memory_space<vmem>>, vector<128x128xbf16>,
    return
  }
  func.func @transform_0(%arg0: i32) -> (i32, i32) {
    %c0_i32 = arith.constant 0 : i32
    %c0_i32_0 = arith.constant 0 : i32
    return %arg0, %c0_i32 : i32, i32
  }
  func.func @transform_1(%arg0: i32) -> (i32, i32) {
    %c0_i32 = arith.constant 0 : i32
    %c0_i32_0 = arith.constant 0 : i32
    %c0_i32_1 = arith.constant 0 : i32
    return %c0_i32, %c0_i32_0 : i32, i32
  }
  func.func @transform_2(%arg0: i32) -> (i32, i32) {
    %c0_i32 = arith.constant 0 : i32
    %c0_i32_0 = arith.constant 0 : i32
    %c0_i32_1 = arith.constant 0 : i32
    return %c0_i32, %c0_i32_0 : i32, i32
  }
  func.func @transform_3(%arg0: i32) -> (i32, i32) {
    %c0_i32 = arith.constant 0 : i32
    %c0_i32_0 = arith.constant 0 : i32
    %c0_i32_1 = arith.constant 0 : i32
    return %c0_i32, %c0_i32_0 : i32, i32
  }
  func.func @transform_4(%arg0: i32) -> (i32, i32) {
    %c0_i32 = arith.constant 0 : i32
    %c0_i32_0 = arith.constant 0 : i32
    %c0_i32_1 = arith.constant 0 : i32
    return %c0_i32, %c0_i32_0 : i32, i32
  }
  func.func @transform_5(%arg0: i32) -> (i32, i32) {
    %c0_i32 = arith.constant 0 : i32
    %c0_i32_0 = arith.constant 0 : i32
    %c0_i32_1 = arith.constant 0 : i32
    return %c0_i32, %c0_i32_0 : i32, i32
  }
  func.func @transform_6(%arg0: i32) -> (i32, i32) {
    %c0_i32 = arith.constant 0 : i32
    %c0_i32_0 = arith.constant 0 : i32
    %c0_i32_1 = arith.constant 0 : i32
    return %c0_i32, %c0_i32_0 : i32, i32
  }
  func.func @transform_7(%arg0: i32) -> (i32, i32) {
    %c0_i32 = arith.constant 0 : i32
    %c0_i32_0 = arith.constant 0 : i32
    %c0_i32_1 = arith.constant 0 : i32
    return %c0_i32, %c0_i32_0 : i32, i32
  }
  func.func @transform_8(%arg0: i32) -> (i32, i32) {
    %c0_i32 = arith.constant 0 : i32
    %c0_i32_0 = arith.constant 0 : i32
    %c0_i32_1 = arith.constant 0 : i32
    return %c0_i32, %c0_i32_0 : i32, i32
  }
  func.func @transform_9(%arg0: i32) -> (i32, i32) {
    %c0_i32 = arith.constant 0 : i32
    %c0_i32_0 = arith.constant 0 : i32
    return %arg0, %c0_i32 : i32, i32
  }
}

module attributes {stable_mosaic.version = 11 : i64} {
  func.func @_fused_gnn_kernel(%arg0: i32, %arg1: memref<128x128xbf16, #tpu.memory_space<vmem>>, %arg2: memref<128x128xbf16, #tpu.memory_space<any>>, %arg3: memref<1x2x128x128xbf16, #tpu.memory_space<vmem>>, %arg4: memref<1x1x256xf32, #tpu.memory_space<vmem>>, %arg5: memref<1x1x256xf32, #tpu.memory_space<vmem>>, %arg6: memref<1x1x256xf32, #tpu.memory_space<vmem>>, %arg7: memref<128x256xf32, #tpu.memory_space<vmem>>, %arg8: memref<128x128xbf16, #tpu.memory_space<vmem>>, %arg9: memref<128x256xf32, #tpu.memory_space<vmem>>, %arg10: memref<1x!tpu.dma_semaphore, #tpu.memory_space<semaphore_mem>>) attributes {dimension_semantics = [#tpu.dimension_semantics<arbitrary>], iteration_bounds = array<i64: 5>, scalar_prefetch = 0 : i64, scratch_operands = 3 : i64, tpu.core_type = #tpu.core_type<tc>, window_params = [{pipeline_mode = #tpu.pipeline_mode<synchronous>, transform_indices = @transform_0, window_bounds = array<i64: 128, 128>}, {}, {transform_indices = @transform_2, window_bounds = array<i64: 1, 2, 128, 128>}, {transform_indices = @transform_3, window_bounds = array<i64: 1, 1, 256>}, {transform_indices = @transform_4, window_bounds = array<i64: 1, 1, 256>}, {transform_indices = @transform_5, window_bounds = array<i64: 1, 1, 256>}, {pipeline_mode = #tpu.pipeline_mode<synchronous>, transform_indices = @transform_6, window_bounds = array<i64: 128, 256>}]} {
    %c0_i32 = arith.constant 0 : i32
    %0 = arith.cmpi eq, %arg0, %c0_i32 : i32
    %1 = arith.extui %0 : i1 to i32
    %c0_i32_0 = arith.constant 0 : i32
    %2 = arith.cmpi ne, %1, %c0_i32_0 : i32
    scf.if %2 {
      %c0_i32_6 = arith.constant 0 : i32
      %14 = tpu.memref_slice %arg10[%c0_i32_6] : memref<1x!tpu.dma_semaphore, #tpu.memory_space<semaphore_mem>> -> memref<1x!tpu.dma_semaphore, #tpu.memory_space<semaphore_mem>>
      %15 = tpu.memref_squeeze %14 : memref<1x!tpu.dma_semaphore, #tpu.memory_space<semaphore_mem>> -> memref<!tpu.dma_semaphore, #tpu.memory_space<semaphore_mem>>
      tpu.enqueue_dma source(%arg2 : memref<128x128xbf16, #tpu.memory_space<any>>) target(%arg8 : memref<128x128xbf16, #tpu.memory_space<vmem>>) target_semaphore(%15 : memref<!tpu.dma_semaphore, #tpu.memory_space<semaphore_mem>>)
      %c0_i32_7 = arith.constant 0 : i32
      %16 = tpu.memref_slice %arg10[%c0_i32_7] : memref<1x!tpu.dma_semaphore, #tpu.memory_space<semaphore_mem>> -> memref<1x!tpu.dma_semaphore, #tpu.memory_space<semaphore_mem>>
      %17 = tpu.memref_squeeze %16 : memref<1x!tpu.dma_semaphore, #tpu.memory_space<semaphore_mem>> -> memref<!tpu.dma_semaphore, #tpu.memory_space<semaphore_mem>>
      tpu.wait_dma2 semaphore(%17 : memref<!tpu.dma_semaphore, #tpu.memory_space<semaphore_mem>>) src(%arg2 : memref<128x128xbf16, #tpu.memory_space<any>>) dst(%arg8 : memref<128x128xbf16, #tpu.memory_space<vmem>>)
      %c0 = arith.constant 0 : index
      %c0_8 = arith.constant 0 : index
      %18 = vector.load %arg1[%c0, %c0_8] : memref<128x128xbf16, #tpu.memory_space<vmem>>, vector<128x128xbf16>
      %19 = arith.extf %18 : vector<128x128xbf16> to vector<128x128xf32>
      %c0_9 = arith.constant 0 : index
      %c0_10 = arith.constant 0 : index
      %20 = vector.load %arg9[%c0_9, %c0_10] : memref<128x256xf32, #tpu.memory_space<vmem>>, vector<128x128xf32>
      tpu.vector_store %arg9[%c0_9, %c0_10], %19 {strides = array<i32>} : memref<128x256xf32, #tpu.memory_space<vmem>>, vector<128x128xf32>,
    } else {
    }
    %c2_i32 = arith.constant 2 : i32
    %3 = arith.cmpi slt, %arg0, %c2_i32 : i32
    %4 = arith.extui %3 : i1 to i32
    %c0_i32_1 = arith.constant 0 : i32
    %5 = arith.cmpi ne, %4, %c0_i32_1 : i32
    scf.if %5 {
      %c0 = arith.constant 0 : index
      %c0_6 = arith.constant 0 : index
      %14 = vector.load %arg8[%c0, %c0_6] : memref<128x128xbf16, #tpu.memory_space<vmem>>, vector<128x128xbf16>
      %c0_7 = arith.constant 0 : index
      %c0_8 = arith.constant 0 : index
      %15 = vector.load %arg9[%c0_7, %c0_8] : memref<128x256xf32, #tpu.memory_space<vmem>>, vector<128x128xf32>
      %16 = arith.truncf %15 : vector<128x128xf32> to vector<128x128xbf16>
      %c0_9 = arith.constant 0 : index
      %c0_10 = arith.constant 0 : index
      %c0_11 = arith.constant 0 : index
      %c0_12 = arith.constant 0 : index
      %17 = vector.load %arg3[%c0_9, %c0_10, %c0_11, %c0_12] : memref<1x2x128x128xbf16, #tpu.memory_space<vmem>>, vector<1x1x128x128xbf16>
      %18 = vector.shape_cast %17 : vector<1x1x128x128xbf16> to vector<128x128xbf16>
      %cst = arith.constant dense<0.000000e+00> : vector<128x128xf32>
      %19 = tpu.matmul %16, %18, %cst {dimension_numbers = #tpu.dot_dimension_numbers<[1], [0], [0], [1], [0, 0, 1, 1], [], []>} : vector<128x128xbf16>, vector<128x128xbf16>, vector<128x128xf32> -> vector<128x128xf32>
      %20 = arith.truncf %19 : vector<128x128xf32> to vector<128x128xbf16>
      %cst_13 = arith.constant dense<0.000000e+00> : vector<128x128xf32>
      %21 = tpu.matmul %14, %20, %cst_13 {dimension_numbers = #tpu.dot_dimension_numbers<[1], [0], [0], [1], [0, 0, 1, 1], [], []>} : vector<128x128xbf16>, vector<128x128xbf16>, vector<128x128xf32> -> vector<128x128xf32>
      %c0_14 = arith.constant 0 : index
      %c0_15 = arith.constant 0 : index
      %c0_16 = arith.constant 0 : index
      %22 = vector.load %arg4[%c0_14, %c0_15, %c0_16] : memref<1x1x256xf32, #tpu.memory_space<vmem>>, vector<1x1x256xf32>
      %23 = vector.shape_cast %22 : vector<1x1x256xf32> to vector<1x256xf32>
      %24 = vector.extract_strided_slice %23 {offsets = [0, 0], sizes = [1, 128], strides = [1, 1]} : vector<1x256xf32> to vector<1x128xf32>
      %25 = vector.broadcast %24 : vector<1x128xf32> to vector<128x128xf32>
      %26 = arith.addf %21, %25 : vector<128x128xf32>
      %cst_17 = arith.constant 0.000000e+00 : f32
      %27 = vector.broadcast %cst_17 : f32 to vector<128x128xf32>
      %28 = arith.cmpf oge, %26, %27 : vector<128x128xf32>
      %cst_18 = arith.constant 2.000000e-01 : f32
      %29 = vector.broadcast %cst_18 : f32 to vector<128x128xf32>
      %30 = arith.mulf %29, %26 : vector<128x128xf32>
      %31 = arith.select %28, %26, %30 : vector<128x128xi1>, vector<128x128xf32>
      %c0_19 = arith.constant 0 : index
      %c0_20 = arith.constant 0 : index
      %c0_21 = arith.constant 0 : index
      %32 = vector.load %arg5[%c0_19, %c0_20, %c0_21] : memref<1x1x256xf32, #tpu.memory_space<vmem>>, vector<1x1x256xf32>
      %33 = vector.shape_cast %32 : vector<1x1x256xf32> to vector<1x256xf32>
      %34 = vector.extract_strided_slice %33 {offsets = [0, 0], sizes = [1, 128], strides = [1, 1]} : vector<1x256xf32> to vector<1x128xf32>
      %35 = vector.broadcast %34 : vector<1x128xf32> to vector<128x128xf32>
      %36 = arith.mulf %31, %35 : vector<128x128xf32>
      %c0_22 = arith.constant 0 : index
      %c0_23 = arith.constant 0 : index
      %c0_24 = arith.constant 0 : index
      %37 = vector.load %arg6[%c0_22, %c0_23, %c0_24] : memref<1x1x256xf32, #tpu.memory_space<vmem>>, vector<1x1x256xf32>
      %38 = vector.shape_cast %37 : vector<1x1x256xf32> to vector<1x256xf32>
      %39 = vector.extract_strided_slice %38 {offsets = [0, 0], sizes = [1, 128], strides = [1, 1]} : vector<1x256xf32> to vector<1x128xf32>
      %40 = vector.broadcast %39 : vector<1x128xf32> to vector<128x128xf32>
      %41 = arith.addf %36, %40 : vector<128x128xf32>
      %c0_25 = arith.constant 0 : index
      %c0_26 = arith.constant 0 : index
      %42 = vector.load %arg9[%c0_25, %c0_26] : memref<128x256xf32, #tpu.memory_space<vmem>>, vector<128x128xf32>
      tpu.vector_store %arg9[%c0_25, %c0_26], %41 {strides = array<i32>} : memref<128x256xf32, #tpu.memory_space<vmem>>, vector<128x128xf32>,
      %c1_i32 = arith.constant 1 : i32
      %43 = arith.cmpi eq, %arg0, %c1_i32 : i32
      %44 = arith.extui %43 : i1 to i32
      %c0_i32_27 = arith.constant 0 : i32
      %45 = arith.cmpi ne, %44, %c0_i32_27 : i32
      scf.if %45 {
        %c0_28 = arith.constant 0 : index
        %c128 = arith.constant 128 : index
        %46 = vector.load %arg9[%c0_28, %c128] : memref<128x256xf32, #tpu.memory_space<vmem>>, vector<128x128xf32>
        tpu.vector_store %arg9[%c0_28, %c128], %41 {strides = array<i32>} : memref<128x256xf32, #tpu.memory_space<vmem>>, vector<128x128xf32>,
      } else {
      }
    } else {
    }
    %c2_i32_2 = arith.constant 2 : i32
    %6 = arith.cmpi sge, %arg0, %c2_i32_2 : i32
    %c4_i32 = arith.constant 4 : i32
    %7 = arith.cmpi slt, %arg0, %c4_i32 : i32
    %8 = arith.andi %6, %7 : i1
    %9 = arith.extui %8 : i1 to i32
    %c0_i32_3 = arith.constant 0 : i32
    %10 = arith.cmpi ne, %9, %c0_i32_3 : i32
    scf.if %10 {
      %c0 = arith.constant 0 : index
      %c0_6 = arith.constant 0 : index
      %14 = vector.load %arg8[%c0, %c0_6] : memref<128x128xbf16, #tpu.memory_space<vmem>>, vector<128x128xbf16>
      %c0_7 = arith.constant 0 : index
      %c0_8 = arith.constant 0 : index
      %15 = vector.load %arg9[%c0_7, %c0_8] : memref<128x256xf32, #tpu.memory_space<vmem>>, vector<128x256xf32>
      %16 = vector.extract_strided_slice %15 {offsets = [0, 0], sizes = [128, 128], strides = [1, 1]} : vector<128x256xf32> to vector<128x128xf32>
      %17 = arith.truncf %16 : vector<128x128xf32> to vector<128x128xbf16>
      %c0_9 = arith.constant 0 : index
      %c0_10 = arith.constant 0 : index
      %c0_11 = arith.constant 0 : index
      %c0_12 = arith.constant 0 : index
      %18 = vector.load %arg3[%c0_9, %c0_10, %c0_11, %c0_12] : memref<1x2x128x128xbf16, #tpu.memory_space<vmem>>, vector<1x1x128x128xbf16>
      %19 = vector.shape_cast %18 : vector<1x1x128x128xbf16> to vector<128x128xbf16>
      %cst = arith.constant dense<0.000000e+00> : vector<128x128xf32>
      %20 = tpu.matmul %17, %19, %cst {dimension_numbers = #tpu.dot_dimension_numbers<[1], [0], [0], [1], [0, 0, 1, 1], [], []>} : vector<128x128xbf16>, vector<128x128xbf16>, vector<128x128xf32> -> vector<128x128xf32>
      %21 = vector.extract_strided_slice %15 {offsets = [0, 128], sizes = [128, 128], strides = [1, 1]} : vector<128x256xf32> to vector<128x128xf32>
      %22 = arith.truncf %21 : vector<128x128xf32> to vector<128x128xbf16>
      %c0_13 = arith.constant 0 : index
      %c1 = arith.constant 1 : index
      %c0_14 = arith.constant 0 : index
      %c0_15 = arith.constant 0 : index
      %23 = vector.load %arg3[%c0_13, %c1, %c0_14, %c0_15] : memref<1x2x128x128xbf16, #tpu.memory_space<vmem>>, vector<1x1x128x128xbf16>
      %24 = vector.shape_cast %23 : vector<1x1x128x128xbf16> to vector<128x128xbf16>
      %cst_16 = arith.constant dense<0.000000e+00> : vector<128x128xf32>
      %25 = tpu.matmul %22, %24, %cst_16 {dimension_numbers = #tpu.dot_dimension_numbers<[1], [0], [0], [1], [0, 0, 1, 1], [], []>} : vector<128x128xbf16>, vector<128x128xbf16>, vector<128x128xf32> -> vector<128x128xf32>
      %26 = tpu.concatenate %20, %25 in 1 : vector<128x128xf32>, vector<128x128xf32> -> vector<128x256xf32>
      %27 = arith.truncf %26 : vector<128x256xf32> to vector<128x256xbf16>
      %cst_17 = arith.constant dense<0.000000e+00> : vector<128x256xf32>
      %28 = tpu.matmul %14, %27, %cst_17 {dimension_numbers = #tpu.dot_dimension_numbers<[1], [0], [0], [1], [0, 0, 1, 1], [], []>} : vector<128x128xbf16>, vector<128x256xbf16>, vector<128x256xf32> -> vector<128x256xf32>
      %c0_18 = arith.constant 0 : index
      %c0_19 = arith.constant 0 : index
      %c0_20 = arith.constant 0 : index
      %29 = vector.load %arg4[%c0_18, %c0_19, %c0_20] : memref<1x1x256xf32, #tpu.memory_space<vmem>>, vector<1x1x256xf32>
      %30 = vector.shape_cast %29 : vector<1x1x256xf32> to vector<1x256xf32>
      %31 = vector.broadcast %30 : vector<1x256xf32> to vector<128x256xf32>
      %32 = arith.addf %28, %31 : vector<128x256xf32>
      %cst_21 = arith.constant 0.000000e+00 : f32
      %33 = vector.broadcast %cst_21 : f32 to vector<128x256xf32>
      %34 = arith.cmpf oge, %32, %33 : vector<128x256xf32>
      %cst_22 = arith.constant 2.000000e-01 : f32
      %35 = vector.broadcast %cst_22 : f32 to vector<128x256xf32>
      %36 = arith.mulf %35, %32 : vector<128x256xf32>
      %37 = arith.select %34, %32, %36 : vector<128x256xi1>, vector<128x256xf32>
      %c0_23 = arith.constant 0 : index
      %c0_24 = arith.constant 0 : index
      %c0_25 = arith.constant 0 : index
      %38 = vector.load %arg5[%c0_23, %c0_24, %c0_25] : memref<1x1x256xf32, #tpu.memory_space<vmem>>, vector<1x1x256xf32>
      %39 = vector.shape_cast %38 : vector<1x1x256xf32> to vector<1x256xf32>
      %40 = vector.broadcast %39 : vector<1x256xf32> to vector<128x256xf32>
      %41 = arith.mulf %37, %40 : vector<128x256xf32>
      %c0_26 = arith.constant 0 : index
      %c0_27 = arith.constant 0 : index
      %c0_28 = arith.constant 0 : index
      %42 = vector.load %arg6[%c0_26, %c0_27, %c0_28] : memref<1x1x256xf32, #tpu.memory_space<vmem>>, vector<1x1x256xf32>
      %43 = vector.shape_cast %42 : vector<1x1x256xf32> to vector<1x256xf32>
      %44 = vector.broadcast %43 : vector<1x256xf32> to vector<128x256xf32>
      %45 = arith.addf %41, %44 : vector<128x256xf32>
      %46 = arith.addf %45, %15 : vector<128x256xf32>
      %c0_29 = arith.constant 0 : index
      %c0_30 = arith.constant 0 : index
      %47 = vector.load %arg9[%c0_29, %c0_30] : memref<128x256xf32, #tpu.memory_space<vmem>>, vector<128x256xf32>
      tpu.vector_store %arg9[%c0_29, %c0_30], %46 {strides = array<i32>} : memref<128x256xf32, #tpu.memory_space<vmem>>, vector<128x256xf32>,
    } else {
    }
    %c4_i32_4 = arith.constant 4 : i32
    %11 = arith.cmpi eq, %arg0, %c4_i32_4 : i32
    %12 = arith.extui %11 : i1 to i32
    %c0_i32_5 = arith.constant 0 : i32
    %13 = arith.cmpi ne, %12, %c0_i32_5 : i32
    scf.if %13 {
      %c0 = arith.constant 0 : index
      %c0_6 = arith.constant 0 : index
      %14 = vector.load %arg8[%c0, %c0_6] : memref<128x128xbf16, #tpu.memory_space<vmem>>, vector<128x128xbf16>
      %c0_7 = arith.constant 0 : index
      %c0_8 = arith.constant 0 : index
      %15 = vector.load %arg9[%c0_7, %c0_8] : memref<128x256xf32, #tpu.memory_space<vmem>>, vector<128x256xf32>
      %16 = vector.extract_strided_slice %15 {offsets = [0, 0], sizes = [128, 128], strides = [1, 1]} : vector<128x256xf32> to vector<128x128xf32>
      %17 = arith.truncf %16 : vector<128x128xf32> to vector<128x128xbf16>
      %c0_9 = arith.constant 0 : index
      %c0_10 = arith.constant 0 : index
      %c0_11 = arith.constant 0 : index
      %c0_12 = arith.constant 0 : index
      %18 = vector.load %arg3[%c0_9, %c0_10, %c0_11, %c0_12] : memref<1x2x128x128xbf16, #tpu.memory_space<vmem>>, vector<1x1x128x128xbf16>
      %19 = vector.shape_cast %18 : vector<1x1x128x128xbf16> to vector<128x128xbf16>
      %cst = arith.constant dense<0.000000e+00> : vector<128x128xf32>
      %20 = tpu.matmul %17, %19, %cst {dimension_numbers = #tpu.dot_dimension_numbers<[1], [0], [0], [1], [0, 0, 1, 1], [], []>} : vector<128x128xbf16>, vector<128x128xbf16>, vector<128x128xf32> -> vector<128x128xf32>
      %21 = vector.extract_strided_slice %15 {offsets = [0, 128], sizes = [128, 128], strides = [1, 1]} : vector<128x256xf32> to vector<128x128xf32>
      %22 = arith.truncf %21 : vector<128x128xf32> to vector<128x128xbf16>
      %c0_13 = arith.constant 0 : index
      %c1 = arith.constant 1 : index
      %c0_14 = arith.constant 0 : index
      %c0_15 = arith.constant 0 : index
      %23 = vector.load %arg3[%c0_13, %c1, %c0_14, %c0_15] : memref<1x2x128x128xbf16, #tpu.memory_space<vmem>>, vector<1x1x128x128xbf16>
      %24 = vector.shape_cast %23 : vector<1x1x128x128xbf16> to vector<128x128xbf16>
      %cst_16 = arith.constant dense<0.000000e+00> : vector<128x128xf32>
      %25 = tpu.matmul %22, %24, %cst_16 {dimension_numbers = #tpu.dot_dimension_numbers<[1], [0], [0], [1], [0, 0, 1, 1], [], []>} : vector<128x128xbf16>, vector<128x128xbf16>, vector<128x128xf32> -> vector<128x128xf32>
      %26 = tpu.concatenate %20, %25 in 1 : vector<128x128xf32>, vector<128x128xf32> -> vector<128x256xf32>
      %27 = arith.truncf %26 : vector<128x256xf32> to vector<128x256xbf16>
      %cst_17 = arith.constant dense<0.000000e+00> : vector<128x256xf32>
      %28 = tpu.matmul %14, %27, %cst_17 {dimension_numbers = #tpu.dot_dimension_numbers<[1], [0], [0], [1], [0, 0, 1, 1], [], []>} : vector<128x128xbf16>, vector<128x256xbf16>, vector<128x256xf32> -> vector<128x256xf32>
      %c0_18 = arith.constant 0 : index
      %c0_19 = arith.constant 0 : index
      %c0_20 = arith.constant 0 : index
      %29 = vector.load %arg4[%c0_18, %c0_19, %c0_20] : memref<1x1x256xf32, #tpu.memory_space<vmem>>, vector<1x1x256xf32>
      %30 = vector.shape_cast %29 : vector<1x1x256xf32> to vector<1x256xf32>
      %31 = vector.broadcast %30 : vector<1x256xf32> to vector<128x256xf32>
      %32 = arith.addf %28, %31 : vector<128x256xf32>
      %33 = vector.extract_strided_slice %32 {offsets = [0, 128], sizes = [128, 128], strides = [1, 1]} : vector<128x256xf32> to vector<128x128xf32>
      %34 = tpu.iota {dimensions = array<i32: 1>} : vector<128x128xi32>
      %c10_i32 = arith.constant 10 : i32
      %35 = vector.broadcast %c10_i32 : i32 to vector<128x128xi32>
      %36 = arith.cmpi slt, %34, %35 : vector<128x128xi32>
      %cst_21 = arith.constant -1.000000e+30 : f32
      %37 = vector.broadcast %cst_21 : f32 to vector<128x128xf32>
      %38 = arith.select %36, %33, %37 : vector<128x128xi1>, vector<128x128xf32>
      %cst_22 = arith.constant dense<0xFF800000> : vector<128xf32>
      %39 = vector.multi_reduction <maximumf>, %38, %cst_22 [1] : vector<128x128xf32> to vector<128xf32>
      %40 = vector.shape_cast %39 : vector<128xf32> to vector<128x1xf32>
      %41 = vector.broadcast %40 : vector<128x1xf32> to vector<128x128xf32>
      %42 = arith.subf %38, %41 : vector<128x128xf32>
      %43 = math.exp %42 : vector<128x128xf32>
      %cst_23 = arith.constant dense<0.000000e+00> : vector<128xf32>
      %44 = vector.multi_reduction <add>, %43, %cst_23 [1] : vector<128x128xf32> to vector<128xf32>
      %45 = vector.shape_cast %44 : vector<128xf32> to vector<128x1xf32>
      %46 = math.log %45 : vector<128x1xf32>
      %47 = vector.broadcast %46 : vector<128x1xf32> to vector<128x128xf32>
      %48 = arith.subf %42, %47 : vector<128x128xf32>
      %49 = vector.extract_strided_slice %32 {offsets = [0, 0], sizes = [128, 128], strides = [1, 1]} : vector<128x256xf32> to vector<128x128xf32>
      %50 = tpu.concatenate %49, %48 in 1 : vector<128x128xf32>, vector<128x128xf32> -> vector<128x256xf32>
      %c0_24 = arith.constant 0 : index
      %c0_25 = arith.constant 0 : index
      %51 = vector.load %arg7[%c0_24, %c0_25] : memref<128x256xf32, #tpu.memory_space<vmem>>, vector<128x256xf32>
      tpu.vector_store %arg7[%c0_24, %c0_25], %50 {strides = array<i32>} : memref<128x256xf32, #tpu.memory_space<vmem>>, vector<128x256xf32>,
    } else {
    }
    return
  }
  func.func @transform_0(%arg0: i32) -> (i32, i32) {
    %c0_i32 = arith.constant 0 : i32
    %c0_i32_0 = arith.constant 0 : i32
    %c0_i32_1 = arith.constant 0 : i32
    return %c0_i32, %c0_i32_0 : i32, i32
  }
  func.func @transform_2(%arg0: i32) -> (i32, i32, i32, i32) {
    %c0_i32 = arith.constant 0 : i32
    %c0_i32_0 = arith.constant 0 : i32
    %c0_i32_1 = arith.constant 0 : i32
    %c0_i32_2 = arith.constant 0 : i32
    return %arg0, %c0_i32, %c0_i32_0, %c0_i32_1 : i32, i32, i32, i32
  }
  func.func @transform_3(%arg0: i32) -> (i32, i32, i32) {
    %c0_i32 = arith.constant 0 : i32
    %c0_i32_0 = arith.constant 0 : i32
    %c0_i32_1 = arith.constant 0 : i32
    return %arg0, %c0_i32, %c0_i32_0 : i32, i32, i32
  }
  func.func @transform_4(%arg0: i32) -> (i32, i32, i32) {
    %c0_i32 = arith.constant 0 : i32
    %c0_i32_0 = arith.constant 0 : i32
    %c0_i32_1 = arith.constant 0 : i32
    return %arg0, %c0_i32, %c0_i32_0 : i32, i32, i32
  }
  func.func @transform_5(%arg0: i32) -> (i32, i32, i32) {
    %c0_i32 = arith.constant 0 : i32
    %c0_i32_0 = arith.constant 0 : i32
    %c0_i32_1 = arith.constant 0 : i32
    return %arg0, %c0_i32, %c0_i32_0 : i32, i32, i32
  }
  func.func @transform_6(%arg0: i32) -> (i32, i32) {
    %c0_i32 = arith.constant 0 : i32
    %c0_i32_0 = arith.constant 0 : i32
    %c0_i32_1 = arith.constant 0 : i32
    return %c0_i32, %c0_i32_0 : i32, i32
  }
}

</mosaic_0001>

<bundles_post_ra>
// kernel: deform_block_gnn_forward.2
= control target key start
LH: loop header
LB: loop body
LE: loop exit
PB: predicated region body
PF: predicated region fallthrough
CT: control target
= control target key end

     0   :  { %v1605_v1 = vmov 0   ;;  %v67_v34 = vlaneseq  ;;  %s2024_s1 = inlined_call_operand.vmem [shape: bf16[128,256], index: 1, kind: input, shape index: {}]   ;;  %s2025_s0 = inlined_call_operand.vmem [shape: bf16[128,128], index: 0, kind: input, shape index: {}]   ;;  %s2026_s3 = inlined_call_operand.vmem [shape: bf16[128,128], index: 3, kind: input, shape index: {}]   ;;  %s2027_s5 = inlined_call_operand.vmem [shape: bf16[256,128], index: 5, kind: input, shape index: {}]   ;;  %s2028_s2 = inlined_call_operand.vmem [shape: f32[1,256], index: 2, kind: input, shape index: {}]   ;;  %s2029_s7 = inlined_call_operand.vmem [shape: bf16[128,128], index: 7, kind: input, shape index: {}]   ;;  %s2030_s4 = inlined_call_operand.vmem [shape: f32[1,128], index: 4, kind: input, shape index: {}]   ;;  %s2031_s6 = inlined_call_operand.vmem [shape: f32[1,128], index: 6, kind: input, shape index: {}]   ;;  %s2032_s8 = inlined_call_operand.vmem [shape: f32[1,128], index: 8, kind: input, shape index: {}]   ;;  %s2033_s9 = inlined_call_operand.vmem [shape: bf16[128,128], index: 9, kind: output, shape index: {}]  }
   0x1   :  { %v1541_v0 = vld [vmem:[%s2024_s1 + $0x74] ss:$8 sps:$4 sm:$0xff]   ;;  %237 = vmatprep.mubr.bf16.mxu0 %v1605_v1  ;;  %v1543_v2 = vld [vmem:[%s2024_s1 + $0x70] ss:$8 sps:$4 sm:$0xff]   ;;  %v1544_v3 = vld [vmem:[%s2024_s1 + $0x64] ss:$8 sps:$4 sm:$0xff]  }
   0x2   :  { %205 = vmatprep.subr.bf16.mxu0 %v1541_v0  ;;  %v1546_v4 = vld [vmem:[%s2024_s1 + $0x60] ss:$8 sps:$4 sm:$0xff]   ;;  %v1547_v5 = vld [vmem:[%s2024_s1 + $0x54] ss:$8 sps:$4 sm:$0xff]   ;;  %v1549_v6 = vld [vmem:[%s2024_s1 + $0x50] ss:$8 sps:$4 sm:$0xff]  }
   0x3   :  { %206 = vmatpush1.bf16.msra.mxu0 %v1543_v2  ;;  %v1550_v7 = vld [vmem:[%s2024_s1 + $0x44] ss:$8 sps:$4 sm:$0xff]   ;;  %v1552_v8 = vld [vmem:[%s2024_s1 + $0x40] ss:$8 sps:$4 sm:$0xff]   ;;  %v1553_v9 = vld [vmem:[%s2024_s1 + $0x34] ss:$8 sps:$4 sm:$0xff]  }
   0x4   :  { %207 = vmatprep.subr.bf16.mxu0 %v1544_v3  ;;  %v1555_v10 = vld [vmem:[%s2024_s1 + $0x30] ss:$8 sps:$4 sm:$0xff]   ;;  %v1556_v11 = vld [vmem:[%s2024_s1 + $0x24] ss:$8 sps:$4 sm:$0xff]   ;;  %v1558_v12 = vld [vmem:[%s2024_s1 + $0x20] ss:$8 sps:$4 sm:$0xff]  }
   0x5   :  { %v1559_v13 = vld [vmem:[%s2024_s1 + $0x14] ss:$8 sps:$4 sm:$0xff]   ;;  %v1561_v16 = vld [vmem:[%s2024_s1 + $0x10] ss:$8 sps:$4 sm:$0xff]   ;;  %v1575_v17 = vld [vmem:[%s2026_s3 + $0x28] sm:$0xff]   ;;  %v68_v35 = vshrl.u32 %v67_v34, 7 }
   0x6   :  { %v1573_v14 = vld [vmem:[%s2026_s3 + $0x38] sm:$0xff]   ;;  %v1574_v15 = vld [vmem:[%s2026_s3 + $0x30] sm:$0xff]   ;;  %v1562_v18 = vld [vmem:[%s2024_s1 + $0x4] ss:$8 sps:$4 sm:$0xff]  }
   0x7   :  { %208 = vmatpush1.bf16.msra.mxu0 %v1546_v4  ;;  %1476 = vmatprep.subr.bf16.mxu1 %v1573_v14  ;;  %v1564_v19 = vld [vmem:[%s2024_s1] ss:$8 sps:$4 sm:$0xff]   ;;  %v1567_v22 = vld [vmem:[%s2025_s0 + $0x10] sm:$0xff]   ;;  %v1568_v23 = vld [vmem:[%s2025_s0 + $0x18] sm:$0xff]   ;;  %v69_v36 = vsub.s32 0, %v68_v35  ;;  %v73_v38 = vsub.s32 1, %v68_v35 }
   0x8   :  { %209 = vmatprep.subr.bf16.mxu0 %v1547_v5  ;;  %1477 = vmatpush3.bf16.msra.mxu1 %v1573_v14  ;;  %v1565_v20 = vld [vmem:[%s2025_s0] sm:$0xff]   ;;  %v1566_v21 = vld [vmem:[%s2025_s0 + $0x8] sm:$0xff]   ;;  %v1571_v26 = vld [vmem:[%s2025_s0 + $0x30] sm:$0xff]  }
   0x9   :  { %1478 = vmatprep.subr.bf16.mxu1 %v1574_v15  ;;  %v1569_v24 = vld [vmem:[%s2025_s0 + $0x20] sm:$0xff]   ;;  %v1570_v25 = vld [vmem:[%s2025_s0 + $0x28] sm:$0xff]   ;;  %v1572_v27 = vld [vmem:[%s2025_s0 + $0x38] sm:$0xff]  }
   0xa   :  { %v1576_v28 = vld [vmem:[%s2026_s3 + $0x20] sm:$0xff]   ;;  %v1577_v29 = vld [vmem:[%s2026_s3 + $0x18] sm:$0xff]   ;;  %v1578_v30 = vld [vmem:[%s2026_s3 + $0x10] sm:$0xff]  }
   0xb   :  { %210 = vmatpush1.bf16.msra.mxu0 %v1549_v6  ;;  %v1579_v31 = vld [vmem:[%s2026_s3 + $0x8] sm:$0xff]   ;;  %v1580_v32 = vld [vmem:[%s2026_s3] sm:$0xff]   ;;  %v1581_v33 = vld [vmem:[%s2027_s5 + $0x78] sm:$0xff]  }
   0xc   :  { %211 = vmatprep.subr.bf16.mxu0 %v1550_v7  ;;  %1479 = vmatpush3.bf16.msra.mxu1 %v1574_v15  ;;  %v65_v37 = vld [vmem:[%s2028_s2] sm:$0x3]  ;;  %v1583_v14 = vld [vmem:[%s2027_s5 + $0x70] sm:$0xff]  }
   0xd   :  { %1480 = vmatprep.subr.bf16.mxu1 %v1575_v17  ;;  %v1766_v39 = vrot.slane %v65_v37, %v69_v36  ;;  %v1768_v40 = vrot.slane %v65_v37, %v73_v38  ;;  %v1587_v36 = vld [vmem:[%s2027_s5 + $0x60] sm:$0xff]  }
   0xf   :  { %212 = vmatpush1.bf16.msra.mxu0 %v1552_v8 }
  0x10   :  { %213 = vmatprep.subr.bf16.mxu0 %v1553_v9  ;;  %1481 = vmatpush3.bf16.msra.mxu1 %v1575_v17 }
  0x11   :  { %1482 = vmatprep.subr.bf16.mxu1 %v1576_v28 }
  0x13   :  { %214 = vmatpush1.bf16.msra.mxu0 %v1555_v10 }
  0x14   :  { %215 = vmatprep.subr.bf16.mxu0 %v1556_v11  ;;  %1483 = vmatpush3.bf16.msra.mxu1 %v1576_v28  ;;  %v1582_v11 = vld [vmem:[%s2027_s5 + $0x38] sm:$0xff]  }
  0x15   :  { %1484 = vmatprep.subr.bf16.mxu1 %v1577_v29 }
  0x17   :  { %216 = vmatpush1.bf16.msra.mxu0 %v1558_v12 }
  0x18   :  { %217 = vmatprep.subr.bf16.mxu0 %v1559_v13  ;;  %1485 = vmatpush3.bf16.msra.mxu1 %v1577_v29 }
  0x19   :  { %1486 = vmatprep.subr.bf16.mxu1 %v1578_v30 }
  0x1b   :  { %218 = vmatpush1.bf16.msra.mxu0 %v1561_v16 }
  0x1c   :  { %219 = vmatprep.subr.bf16.mxu0 %v1562_v18  ;;  %1487 = vmatpush3.bf16.msra.mxu1 %v1578_v30 }
  0x1d   :  { %1488 = vmatprep.subr.bf16.mxu1 %v1579_v31 }
  0x1f   :  { %220 = vmatpush1.bf16.msra.mxu0 %v1564_v19 }
  0x20   :  { %1489 = vmatpush3.bf16.msra.mxu1 %v1579_v31 }
  0x21   :  { %1490 = vmatprep.subr.bf16.mxu1 %v1580_v32 }
  0x22   :  { %238 = vmatmul.mubr.bf16.vlgmr.msra.gmra.mxu0 %v1565_v20 }
  0x23   :  { %247 = vmatprep.mubr.bf16.mxu0 %v1605_v1 }
  0x24   :  { %1491 = vmatpush3.bf16.msra.mxu1 %v1580_v32 }
  0x25   :  { %1396 = vmatprep.subr.bf16.mxu1 %v1581_v33  ;;  %v1586_v33 = vld [vmem:[%s2027_s5 + $0x28] sm:$0xff]  }
  0x2a   :  { %248 = vmatmul.mubr.bf16.gmra.mxu0 %v1566_v21 }
  0x2b   :  { %257 = vmatprep.mubr.bf16.mxu0 %v1605_v1 }
  0x32   :  { %258 = vmatmul.mubr.bf16.gmra.mxu0 %v1567_v22  ;;  %v1584_v22 = vld [vmem:[%s2027_s5 + $0x30] sm:$0xff]  }
  0x33   :  { %267 = vmatprep.mubr.bf16.mxu0 %v1605_v1 }
  0x3a   :  { %268 = vmatmul.mubr.bf16.gmra.mxu0 %v1568_v23 }
  0x3b   :  { %277 = vmatprep.mubr.bf16.mxu0 %v1605_v1 }
  0x42   :  { %278 = vmatmul.mubr.bf16.gmra.mxu0 %v1569_v24  ;;  %v1585_v24 = vld [vmem:[%s2027_s5 + $0x68] sm:$0xff]  }
  0x43   :  { %287 = vmatprep.mubr.bf16.mxu0 %v1605_v1 }
  0x4a   :  { %288 = vmatmul.mubr.bf16.gmra.mxu0 %v1570_v25 }
  0x4b   :  { %297 = vmatprep.mubr.bf16.mxu0 %v1605_v1 }
  0x52   :  { %298 = vmatmul.mubr.bf16.gmra.mxu0 %v1571_v26 }
  0x53   :  { %307 = vmatprep.mubr.bf16.mxu0 %v1605_v1 }
  0x5a   :  { %308 = vmatmul.mubr.bf16.gmra.mxu0 %v1572_v27 }
  0xe2   :  { %v239_v41 = vpop.f32.mrf.mxu0 }
  0xe3   :  { %v240_v42 = vadd.f32 %v239_v41, %v1766_v39 }
  0xe4   :  { %v241_v43 = vpop.f32.mrf.mxu0 }
  0xe5   :  { %v242_v44 = vadd.f32 %v241_v43, %v1768_v40  ;;  %v350_v45 = vmul.f32 0.2, %v240_v42  ;;  %vm318_vm0 = vcmp.ge.f32.partialorder %v240_v42, 0.0 }
  0xe6   :  { %v243_v46 = vpop.f32.mrf.mxu0 }
  0xe7   :  { %v244_v47 = vadd.f32 %v243_v46, %v1766_v39  ;;  %v351_v49 = vmul.f32 0.2, %v242_v44  ;;  %vm319_vm2 = vcmp.ge.f32.partialorder %v242_v44, 0.0  ;;  %v382_v53 = vsel %vm318_vm0, %v240_v42, %v350_v45  ;;  %v1588_v46 = vld [vmem:[%s2027_s5 + $0x20] sm:$0xff]  }
  0xe8   :  { %v245_v48 = vpop.f32.mrf.mxu0 }
  0xe9   :  { %v352_v50 = vmul.f32 0.2, %v244_v47  ;;  %v246_v51 = vadd.f32 %v245_v48, %v1768_v40  ;;  %vm320_vm1 = vcmp.ge.f32.partialorder %v244_v47, 0.0  ;;  %v1775_v59 = vsel %vm319_vm2, %v242_v44, %v351_v49  ;;  %v1589_v48 = vld [vmem:[%s2027_s5 + $0x58] sm:$0xff]  }
  0xea   :  { %v249_v52 = vpop.f32.mrf.mxu0 }
  0xeb   :  { %vm321_vm3 = vcmp.ge.f32.partialorder %v246_v51, 0.0  ;;  %v353_v54 = vmul.f32 0.2, %v246_v51  ;;  %v250_v55 = vadd.f32 %v249_v52, %v1766_v39  ;;  %v384_v56 = vsel %vm320_vm1, %v244_v47, %v352_v50 }
  0xec   :  { %v251_v57 = vpop.f32.mrf.mxu0  ;;  %v414_v58 = vpack.c.bf16 %v384_v56, %v382_v53 }
  0xed   :  { %v1777_v60 = vsel %vm321_vm3, %v246_v51, %v353_v54  ;;  %v252_v61 = vadd.f32 %v251_v57, %v1768_v40  ;;  %v354_v63 = vmul.f32 0.2, %v250_v55  ;;  %vm322_vm4 = vcmp.ge.f32.partialorder %v250_v55, 0.0  ;;  %v1590_v57 = vld [vmem:[%s2027_s5 + $0x18] sm:$0xff]  }
  0xee   :  { %v638_v62 = vpack.c.bf16 %v1777_v60, %v1775_v59  ;;  %v253_v0 = vpop.f32.mrf.mxu0  ;;  %1492 = vmatprep.mubr.bf16.mxu1 %v414_v58 }
  0xef   :  { %v254_v1 = vadd.f32 %v253_v0, %v1766_v39  ;;  %v355_v3 = vmul.f32 0.2, %v252_v61  ;;  %vm323_vm6 = vcmp.ge.f32.partialorder %v252_v61, 0.0  ;;  %v386_v7 = vsel %vm322_vm4, %v250_v55, %v354_v63 }
  0xf0   :  { %v255_v2 = vpop.f32.mrf.mxu0 }
  0xf1   :  { %vm324_vm5 = vcmp.ge.f32.partialorder %v254_v1, 0.0  ;;  %v356_v4 = vmul.f32 0.2, %v254_v1  ;;  %v256_v5 = vadd.f32 %v255_v2, %v1768_v40  ;;  %v1792_v16 = vsel %vm323_vm6, %v252_v61, %v355_v3 }
  0xf2   :  { %v259_v6 = vpop.f32.mrf.mxu0 }
  0xf3   :  { %vm325_vm7 = vcmp.ge.f32.partialorder %v256_v5, 0.0  ;;  %v357_v8 = vmul.f32 0.2, %v256_v5  ;;  %v260_v9 = vadd.f32 %v259_v6, %v1766_v39  ;;  %v388_v10 = vsel %vm324_vm5, %v254_v1, %v356_v4 }
  0xf4   :  { %v261_v12 = vpop.f32.mrf.mxu0  ;;  %v415_v13 = vpack.c.bf16 %v388_v10, %v386_v7 }
  0xf5   :  { %v262_v15 = vadd.f32 %v261_v12, %v1768_v40  ;;  %v1794_v17 = vsel %vm325_vm7, %v256_v5, %v357_v8  ;;  %v358_v18 = vmul.f32 0.2, %v260_v9  ;;  %vm326_vm8 = vcmp.ge.f32.partialorder %v260_v9, 0.0 }
  0xf6   :  { %v263_v19 = vpop.f32.mrf.mxu0  ;;  %1493 = vmatmul.mubr.bf16.vlgmr.msra.gmra.mxu1 %v415_v13  ;;  %v640_v20 = vpack.c.bf16 %v1794_v17, %v1792_v16 }
  0xf7   :  { %v264_v21 = vadd.f32 %v263_v19, %v1766_v39  ;;  %1397 = vmatpush3.bf16.msra.mxu1 %v1582_v11  ;;  %v359_v25 = vmul.f32 0.2, %v262_v15  ;;  %vm327_vm10 = vcmp.ge.f32.partialorder %v262_v15, 0.0  ;;  %v390_v29 = vsel %vm326_vm8, %v260_v9, %v358_v18 }
  0xf8   :  { %v265_v23 = vpop.f32.mrf.mxu0  ;;  %1398 = vmatprep.subr.bf16.mxu1 %v1583_v14 }
  0xf9   :  { %vm328_vm9 = vcmp.ge.f32.partialorder %v264_v21, 0.0  ;;  %v360_v26 = vmul.f32 0.2, %v264_v21  ;;  %v266_v27 = vadd.f32 %v265_v23, %v1768_v40  ;;  %v1814_v38 = vsel %vm327_vm10, %v262_v15, %v359_v25 }
  0xfa   :  { %v269_v28 = vpop.f32.mrf.mxu0 }
  0xfb   :  { %vm329_vm11 = vcmp.ge.f32.partialorder %v266_v27, 0.0  ;;  %v361_v30 = vmul.f32 0.2, %v266_v27  ;;  %v270_v31 = vadd.f32 %v269_v28, %v1766_v39  ;;  %v392_v32 = vsel %vm328_vm9, %v264_v21, %v360_v26  ;;  %1399 = vmatpush3.bf16.msra.mxu1 %v1584_v22 }
  0xfc   :  { %v271_v34 = vpop.f32.mrf.mxu0  ;;  %v416_v35 = vpack.c.bf16 %v392_v32, %v390_v29  ;;  %1400 = vmatprep.subr.bf16.mxu1 %v1585_v24 }
  0xfd   :  { %v272_v37 = vadd.f32 %v271_v34, %v1768_v40  ;;  %v1816_v41 = vsel %vm329_vm11, %v266_v27, %v361_v30  ;;  %v362_v42 = vmul.f32 0.2, %v270_v31  ;;  %vm330_vm12 = vcmp.ge.f32.partialorder %v270_v31, 0.0 }
  0xfe   :  { %v273_v43 = vpop.f32.mrf.mxu0  ;;  %1496 = vmatprep.mubr.bf16.mxu1 %v416_v35  ;;  %v642_v44 = vpack.c.bf16 %v1816_v41, %v1814_v38 }
  0xff   :  { %v274_v45 = vadd.f32 %v273_v43, %v1766_v39  ;;  %1401 = vmatpush3.bf16.msra.mxu1 %v1586_v33  ;;  %v363_v49 = vmul.f32 0.2, %v272_v37  ;;  %vm331_vm14 = vcmp.ge.f32.partialorder %v272_v37, 0.0  ;;  %v394_v53 = vsel %vm330_vm12, %v270_v31, %v362_v42 }
 0x100   :  { %v275_v47 = vpop.f32.mrf.mxu0  ;;  %1402 = vmatprep.subr.bf16.mxu1 %v1587_v36 }
 0x101   :  { %vm332_vm13 = vcmp.ge.f32.partialorder %v274_v45, 0.0  ;;  %v364_v50 = vmul.f32 0.2, %v274_v45  ;;  %v276_v51 = vadd.f32 %v275_v47, %v1768_v40  ;;  %v1833_v0 = vsel %vm331_vm14, %v272_v37, %v363_v49 }
 0x102   :  { %v279_v52 = vpop.f32.mrf.mxu0 }
 0x103   :  { %vm333_vm15 = vcmp.ge.f32.partialorder %v276_v51, 0.0  ;;  %v365_v54 = vmul.f32 0.2, %v276_v51  ;;  %v280_v55 = vadd.f32 %v279_v52, %v1766_v39  ;;  %v396_v56 = vsel %vm332_vm13, %v274_v45, %v364_v50  ;;  %1403 = vmatpush3.bf16.msra.mxu1 %v1588_v46 }
 0x104   :  { %v281_v58 = vpop.f32.mrf.mxu0  ;;  %v417_v61 = vpack.c.bf16 %v396_v56, %v394_v53  ;;  %1404 = vmatprep.subr.bf16.mxu1 %v1589_v48 }
 0x105   :  { %v282_v63 = vadd.f32 %v281_v58, %v1768_v40  ;;  %v1835_v1 = vsel %vm333_vm15, %v276_v51, %v365_v54  ;;  %v366_v2 = vmul.f32 0.2, %v280_v55  ;;  %vm334_vm0 = vcmp.ge.f32.partialorder %v280_v55, 0.0 }
 0x106   :  { %v283_v3 = vpop.f32.mrf.mxu0  ;;  %1497 = vmatmul.mubr.bf16.gmra.mxu1 %v417_v61  ;;  %v644_v4 = vpack.c.bf16 %v1835_v1, %v1833_v0 }
 0x107   :  { %v284_v5 = vadd.f32 %v283_v3, %v1766_v39  ;;  %1405 = vmatpush3.bf16.msra.mxu1 %v1590_v57  ;;  %v367_v7 = vmul.f32 0.2, %v282_v63  ;;  %vm335_vm2 = vcmp.ge.f32.partialorder %v282_v63, 0.0  ;;  %v398_v11 = vsel %vm334_vm0, %v280_v55, %v366_v2 }
 0x108   :  { %v285_v6 = vpop.f32.mrf.mxu0 }
 0x109   :  { %vm336_vm1 = vcmp.ge.f32.partialorder %v284_v5, 0.0  ;;  %v368_v8 = vmul.f32 0.2, %v284_v5  ;;  %v286_v9 = vadd.f32 %v285_v6, %v1768_v40  ;;  %v1843_v21 = vsel %vm335_vm2, %v282_v63, %v367_v7 }
 0x10a   :  { %v289_v10 = vpop.f32.mrf.mxu0 }
 0x10b   :  { %vm337_vm3 = vcmp.ge.f32.partialorder %v286_v9, 0.0  ;;  %v369_v12 = vmul.f32 0.2, %v286_v9  ;;  %v290_v13 = vadd.f32 %v289_v10, %v1766_v39  ;;  %v400_v14 = vsel %vm336_vm1, %v284_v5, %v368_v8 }
 0x10c   :  { %v291_v15 = vpop.f32.mrf.mxu0  ;;  %v418_v18 = vpack.c.bf16 %v400_v14, %v398_v11  ;;  %v1592_v14 = vld [vmem:[%s2027_s5 + $0x10] sm:$0xff]  }
 0x10d   :  { %v292_v19 = vadd.f32 %v291_v15, %v1768_v40  ;;  %v1845_v22 = vsel %vm337_vm3, %v286_v9, %v369_v12  ;;  %v370_v23 = vmul.f32 0.2, %v290_v13  ;;  %vm338_vm4 = vcmp.ge.f32.partialorder %v290_v13, 0.0  ;;  %v1594_v15 = vld [vmem:[%s2027_s5 + $0x8] sm:$0xff]  }
 0x10e   :  { %v293_v24 = vpop.f32.mrf.mxu0  ;;  %1500 = vmatprep.mubr.bf16.mxu1 %v418_v18  ;;  %v646_v25 = vpack.c.bf16 %v1845_v22, %v1843_v21  ;;  %v1595_v18 = vld [vmem:[%s2027_s5 + $0x40] sm:$0xff]  }
 0x10f   :  { %v294_v26 = vadd.f32 %v293_v24, %v1766_v39  ;;  %v371_v28 = vmul.f32 0.2, %v292_v19  ;;  %vm339_vm6 = vcmp.ge.f32.partialorder %v292_v19, 0.0  ;;  %v402_v32 = vsel %vm338_vm4, %v290_v13, %v370_v23  ;;  %v1591_v13 = vld [vmem:[%s2027_s5 + $0x50] sm:$0xff]   ;;  %v1597_v23 = vld [vmem:[%s2029_s7 + $0x38] sm:$0xff]  }
 0x110   :  { %v295_v27 = vpop.f32.mrf.mxu0  ;;  %1406 = vmatprep.subr.bf16.mxu1 %v1591_v13  ;;  %v1598_v24 = vld [vmem:[%s2029_s7 + $0x30] sm:$0xff]   ;;  %1508 = vmatprep.subr.bf16.mxu0 %v1597_v23 }
 0x111   :  { %vm340_vm5 = vcmp.ge.f32.partialorder %v294_v26, 0.0  ;;  %v372_v29 = vmul.f32 0.2, %v294_v26  ;;  %v296_v30 = vadd.f32 %v295_v27, %v1768_v40  ;;  %v1853_v43 = vsel %vm339_vm6, %v292_v19, %v371_v28  ;;  %1407 = vmatpush3.bf16.msra.mxu1 %v1592_v14  ;;  %v1596_v19 = vld [vmem:[%s2027_s5] sm:$0xff]   ;;  %1509 = vmatpush3.bf16.msra.mxu0 %v1597_v23 }
 0x112   :  { %v299_v31 = vpop.f32.mrf.mxu0  ;;  %1510 = vmatprep.subr.bf16.mxu0 %v1598_v24  ;;  %v1901_v28 = vld [vmem:[%s2030_s4] ss:$0 sm:$0xff] }
 0x113   :  { %vm341_vm7 = vcmp.ge.f32.partialorder %v296_v30, 0.0  ;;  %v373_v33 = vmul.f32 0.2, %v296_v30  ;;  %v300_v34 = vadd.f32 %v299_v31, %v1766_v39  ;;  %v404_v35 = vsel %vm340_vm5, %v294_v26, %v372_v29  ;;  %v1599_v26 = vld [vmem:[%s2029_s7 + $0x28] sm:$0xff]  }
 0x114   :  { %v301_v36 = vpop.f32.mrf.mxu0  ;;  %v419_v37 = vpack.c.bf16 %v404_v35, %v402_v32 }
 0x115   :  { %v302_v42 = vadd.f32 %v301_v36, %v1768_v40  ;;  %v1855_v45 = vsel %vm341_vm7, %v296_v30, %v373_v33  ;;  %v374_v46 = vmul.f32 0.2, %v300_v34  ;;  %vm342_vm8 = vcmp.ge.f32.partialorder %v300_v34, 0.0  ;;  %1511 = vmatpush3.bf16.msra.mxu0 %v1598_v24 }
 0x116   :  { %v303_v47 = vpop.f32.mrf.mxu0  ;;  %1501 = vmatmul.mubr.bf16.gmra.mxu1 %v419_v37  ;;  %v648_v48 = vpack.c.bf16 %v1855_v45, %v1853_v43  ;;  %1512 = vmatprep.subr.bf16.mxu0 %v1599_v26 }
 0x117   :  { %v304_v49 = vadd.f32 %v303_v47, %v1766_v39  ;;  %v375_v51 = vmul.f32 0.2, %v302_v42  ;;  %vm343_vm10 = vcmp.ge.f32.partialorder %v302_v42, 0.0  ;;  %v406_v55 = vsel %vm342_vm8, %v300_v34, %v374_v46 }
 0x118   :  { %v305_v50 = vpop.f32.mrf.mxu0 }
 0x119   :  { %vm344_vm9 = vcmp.ge.f32.partialorder %v304_v49, 0.0  ;;  %v376_v52 = vmul.f32 0.2, %v304_v49  ;;  %v306_v53 = vadd.f32 %v305_v50, %v1768_v40  ;;  %v1864_v2 = vsel %vm343_vm10, %v302_v42, %v375_v51  ;;  %1513 = vmatpush3.bf16.msra.mxu0 %v1599_v26 }
 0x11a   :  { %v309_v54 = vpop.f32.mrf.mxu0 }
 0x11b   :  { %vm345_vm11 = vcmp.ge.f32.partialorder %v306_v53, 0.0  ;;  %v377_v56 = vmul.f32 0.2, %v306_v53  ;;  %v310_v57 = vadd.f32 %v309_v54, %v1766_v39  ;;  %v408_v58 = vsel %vm344_vm9, %v304_v49, %v376_v52 }
 0x11c   :  { %v1862_v61 = vpop.f32.mrf.mxu0  ;;  %v420_v63 = vpack.c.bf16 %v408_v58, %v406_v55 }
 0x11d   :  { %v1866_v3 = vsel %vm345_vm11, %v306_v53, %v377_v56  ;;  %v378_v7 = vmul.f32 0.2, %v310_v57  ;;  %vm346_vm12 = vcmp.ge.f32.partialorder %v310_v57, 0.0 }
 0x11e   :  { %v313_v5 = vpop.f32.mrf.mxu0  ;;  %1504 = vmatprep.mubr.bf16.mxu1 %v420_v63  ;;  %v650_v6 = vpack.c.bf16 %v1866_v3, %v1864_v2  ;;  %v1602_v2 = vld [vmem:[%s2029_s7 + $0x10] sm:$0xff]   ;;  %v1603_v3 = vld [vmem:[%s2029_s7 + $0x8] sm:$0xff]  }
 0x11f   :  { %v314_v8 = vadd.f32 %v313_v5, %v1766_v39  ;;  %v410_v10 = vsel %vm346_vm12, %v310_v57, %v378_v7  ;;  %v1593_v39 = vld [vmem:[%s2027_s5 + $0x48] sm:$0xff]  }
 0x120   :  { %1408 = vmatprep.subr.bf16.mxu1 %v1593_v39 }
 0x121   :  { %vm348_vm13 = vcmp.ge.f32.partialorder %v314_v8, 0.0  ;;  %v380_v9 = vmul.f32 0.2, %v314_v8  ;;  %1409 = vmatpush3.bf16.msra.mxu1 %v1594_v15 }
 0x122   :  { %1410 = vmatprep.subr.bf16.mxu1 %v1595_v18 }
 0x123   :  { %v412_v11 = vsel %vm348_vm13, %v314_v8, %v380_v9 }
 0x124   :  { %v421_v12 = vpack.c.bf16 %v412_v11, %v410_v10 }
 0x125   :  { %1411 = vmatpush3.bf16.msra.mxu1 %v1596_v19 }
 0x126   :  { %1505 = vmatmul.mubr.bf16.gmra.mxu1 %v421_v12 }
 0x1b6   :  { %v1494_v27 = vpop.f32.mrf.mxu1 }
 0x1b7   :  { %v536_v32 = vadd.f32 %v1494_v27, %v1901_v28 }
 0x1b8   :  { %v527_v29 = vpop.f32.mrf.mxu1 }
 0x1b9   :  { %v528_v30 = vadd.f32 %v1901_v28, %v527_v29  ;;  %v608_v42 = vmul.f32 0.2, %v536_v32  ;;  %vm592_vm1 = vcmp.ge.f32.partialorder %v536_v32, 0.0 }
 0x1ba   :  { %v1495_v31 = vpop.f32.mrf.mxu1 }
 0x1bb   :  { %v539_v33 = vadd.f32 %v1495_v31, %v1901_v28  ;;  %v606_v35 = vmul.f32 0.2, %v528_v30  ;;  %vm590_vm14 = vcmp.ge.f32.partialorder %v528_v30, 0.0  ;;  %v624_v52 = vsel %vm592_vm1, %v536_v32, %v608_v42 }
 0x1bc   :  { %v530_v34 = vpop.f32.mrf.mxu1 }
 0x1bd   :  { %v609_v36 = vmul.f32 0.2, %v539_v33  ;;  %v531_v37 = vadd.f32 %v1901_v28, %v530_v34  ;;  %vm593_vm15 = vcmp.ge.f32.partialorder %v539_v33, 0.0  ;;  %v622_v47 = vsel %vm590_vm14, %v528_v30, %v606_v35 }
 0x1bf   :  { %vm591_vm0 = vcmp.ge.f32.partialorder %v531_v37, 0.0  ;;  %v607_v46 = vmul.f32 0.2, %v531_v37  ;;  %v625_v50 = vsel %vm593_vm15, %v539_v33, %v609_v36 }
 0x1c0   :  { %v641_v53 = vpack.c.bf16 %v625_v50, %v624_v52  ;;  %v312_v52 = vadd.f32 %v1862_v61, %v1768_v40  ;;  %v1601_v61 = vld [vmem:[%s2029_s7 + $0x18] sm:$0xff]  }
 0x1c1   :  { %v623_v49 = vsel %vm591_vm0, %v531_v37, %v607_v46  ;;  %v315_v37 = vpop.f32.mrf.mxu0 }
 0x1c2   :  { %v639_v51 = vpack.c.bf16 %v623_v49, %v622_v47  ;;  %v379_v45 = vmul.f32 0.2, %v312_v52  ;;  %vm347_vm15 = vcmp.ge.f32.partialorder %v312_v52, 0.0 }
 0x1c4   :  { %821 = vmatprep.mubr.bf16.mxu1 %v639_v51 }
 0x1c5   :  { %822 = vmatmul.mubr.bf16.vlgmr.msra.gmra.mxu1 %v638_v62 }
 0x1c6   :  { %v1498_v54 = vpop.f32.mrf.mxu1  ;;  %829 = vmatprep.mubr.bf16.mxu1 %v641_v53 }
 0x1c7   :  { %v552_v58 = vadd.f32 %v1498_v54, %v1901_v28 }
 0x1c8   :  { %v543_v55 = vpop.f32.mrf.mxu1 }
 0x1c9   :  { %v544_v56 = vadd.f32 %v1901_v28, %v543_v55  ;;  %v612_v59 = vmul.f32 0.2, %v552_v58  ;;  %vm596_vm5 = vcmp.ge.f32.partialorder %v552_v58, 0.0  ;;  %v411_v55 = vsel %vm347_vm15, %v312_v52, %v379_v45 }
 0x1ca   :  { %v1499_v57 = vpop.f32.mrf.mxu1 }
 0x1cb   :  { %v555_v63 = vadd.f32 %v1499_v57, %v1901_v28  ;;  %v610_v7 = vmul.f32 0.2, %v544_v56  ;;  %vm594_vm2 = vcmp.ge.f32.partialorder %v544_v56, 0.0  ;;  %v628_v13 = vsel %vm596_vm5, %v552_v58, %v612_v59  ;;  %v1961_v58 = vld [vmem:[%s2031_s6] ss:$0 sm:$0xff] }
 0x1cc   :  { %v546_v5 = vpop.f32.mrf.mxu1 }
 0x1cd   :  { %v613_v8 = vmul.f32 0.2, %v555_v63  ;;  %v547_v9 = vadd.f32 %v1901_v28, %v546_v5  ;;  %830 = vmatmul.mubr.bf16.gmra.mxu1 %v640_v20  ;;  %vm597_vm3 = vcmp.ge.f32.partialorder %v555_v63, 0.0  ;;  %v626_v62 = vsel %vm594_vm2, %v544_v56, %v610_v7 }
 0x1cf   :  { %vm595_vm4 = vcmp.ge.f32.partialorder %v547_v9, 0.0  ;;  %v611_v60 = vmul.f32 0.2, %v547_v9  ;;  %v629_v11 = vsel %vm597_vm3, %v555_v63, %v613_v8 }
 0x1d0   :  { %v645_v14 = vpack.c.bf16 %v629_v11, %v628_v13 }
 0x1d1   :  { %v627_v10 = vsel %vm595_vm4, %v547_v9, %v611_v60 }
 0x1d2   :  { %v643_v12 = vpack.c.bf16 %v627_v10, %v626_v62 }
 0x1d4   :  { %837 = vmatprep.mubr.bf16.mxu1 %v643_v12 }
 0x1d5   :  { %838 = vmatmul.mubr.bf16.gmra.mxu1 %v642_v44 }
 0x1d6   :  { %v1502_v39 = vpop.f32.mrf.mxu1  ;;  %845 = vmatprep.mubr.bf16.mxu1 %v645_v14 }
 0x1d7   :  { %v568_v15 = vadd.f32 %v1502_v39, %v1901_v28 }
 0x1d8   :  { %v559_v16 = vpop.f32.mrf.mxu1 }
 0x1d9   :  { %v560_v17 = vadd.f32 %v1901_v28, %v559_v16  ;;  %v616_v38 = vmul.f32 0.2, %v568_v15  ;;  %vm600_vm9 = vcmp.ge.f32.partialorder %v568_v15, 0.0 }
 0x1da   :  { %v1503_v20 = vpop.f32.mrf.mxu1 }
 0x1db   :  { %v571_v18 = vadd.f32 %v1503_v20, %v1901_v28  ;;  %v614_v23 = vmul.f32 0.2, %v560_v17  ;;  %vm598_vm6 = vcmp.ge.f32.partialorder %v560_v17, 0.0  ;;  %v632_v31 = vsel %vm600_vm9, %v568_v15, %v616_v38 }
 0x1dc   :  { %v562_v19 = vpop.f32.mrf.mxu1 }
 0x1dd   :  { %v617_v24 = vmul.f32 0.2, %v571_v18  ;;  %v563_v26 = vadd.f32 %v1901_v28, %v562_v19  ;;  %846 = vmatmul.mubr.bf16.gmra.mxu1 %v644_v4  ;;  %vm601_vm7 = vcmp.ge.f32.partialorder %v571_v18, 0.0  ;;  %v630_v44 = vsel %vm598_vm6, %v560_v17, %v614_v23 }
 0x1df   :  { %vm599_vm8 = vcmp.ge.f32.partialorder %v563_v26, 0.0  ;;  %v615_v41 = vmul.f32 0.2, %v563_v26  ;;  %v633_v29 = vsel %vm601_vm7, %v571_v18, %v617_v24 }
 0x1e0   :  { %v649_v32 = vpack.c.bf16 %v633_v29, %v632_v31 }
 0x1e1   :  { %v631_v27 = vsel %vm599_vm8, %v563_v26, %v615_v41 }
 0x1e2   :  { %v647_v30 = vpack.c.bf16 %v631_v27, %v630_v44 }
 0x1e4   :  { %853 = vmatprep.mubr.bf16.mxu1 %v647_v30 }
 0x1e5   :  { %854 = vmatmul.mubr.bf16.gmra.mxu1 %v646_v25  ;;  %v316_v25 = vadd.f32 %v315_v37, %v1768_v40  ;;  %v1600_v40 = vld [vmem:[%s2029_s7 + $0x20] sm:$0xff]  }
 0x1e6   :  { %v1506_v33 = vpop.f32.mrf.mxu1  ;;  %861 = vmatprep.mubr.bf16.mxu1 %v649_v32  ;;  %1514 = vmatprep.subr.bf16.mxu0 %v1600_v40 }
 0x1e7   :  { %v584_v34 = vadd.f32 %v1506_v33, %v1901_v28  ;;  %v381_v54 = vmul.f32 0.2, %v316_v25  ;;  %vm349_vm14 = vcmp.ge.f32.partialorder %v316_v25, 0.0  ;;  %1515 = vmatpush3.bf16.msra.mxu0 %v1600_v40 }
 0x1e8   :  { %v575_v0 = vpop.f32.mrf.mxu1  ;;  %1516 = vmatprep.subr.bf16.mxu0 %v1601_v61 }
 0x1e9   :  { %v576_v1 = vadd.f32 %v1901_v28, %v575_v0  ;;  %v620_v21 = vmul.f32 0.2, %v584_v34  ;;  %vm604_vm13 = vcmp.ge.f32.partialorder %v584_v34, 0.0 }
 0x1ea   :  { %v1507_v4 = vpop.f32.mrf.mxu1 }
 0x1eb   :  { %v587_v35 = vadd.f32 %v1507_v4, %v1901_v28  ;;  %v618_v42 = vmul.f32 0.2, %v576_v1  ;;  %vm602_vm10 = vcmp.ge.f32.partialorder %v576_v1, 0.0  ;;  %1517 = vmatpush3.bf16.msra.mxu0 %v1601_v61 }
 0x1ec   :  { %v578_v36 = vpop.f32.mrf.mxu1  ;;  %1518 = vmatprep.subr.bf16.mxu0 %v1602_v2 }
 0x1ed   :  { %v621_v46 = vmul.f32 0.2, %v587_v35  ;;  %v579_v47 = vadd.f32 %v1901_v28, %v578_v36  ;;  %862 = vmatmul.mubr.bf16.gmra.mxu1 %v648_v48  ;;  %vm605_vm11 = vcmp.ge.f32.partialorder %v587_v35, 0.0  ;;  %v634_v49 = vsel %vm602_vm10, %v576_v1, %v618_v42 }
 0x1ee   :  { %v636_v28 = vsel %vm604_vm13, %v584_v34, %v620_v21  ;;  %v413_v48 = vsel %vm349_vm14, %v316_v25, %v381_v54 }
 0x1ef   :  { %vm603_vm12 = vcmp.ge.f32.partialorder %v579_v47, 0.0  ;;  %v619_v22 = vmul.f32 0.2, %v579_v47  ;;  %v637_v51 = vsel %vm605_vm11, %v587_v35, %v621_v46  ;;  %v652_v56 = vpack.c.bf16 %v413_v48, %v411_v55  ;;  %1519 = vmatpush3.bf16.msra.mxu0 %v1602_v2 }
 0x1f0   :  { %v653_v43 = vpack.c.bf16 %v637_v51, %v636_v28  ;;  %1520 = vmatprep.subr.bf16.mxu0 %v1603_v3 }
 0x1f1   :  { %v635_v50 = vsel %vm603_vm12, %v579_v47, %v619_v22 }
 0x1f2   :  { %v651_v53 = vpack.c.bf16 %v635_v50, %v634_v49 }
 0x1f3   :  { %1521 = vmatpush3.bf16.msra.mxu0 %v1603_v3 }
 0x1f4   :  { %869 = vmatprep.mubr.bf16.mxu1 %v651_v53 }
 0x1f5   :  { %870 = vmatmul.mubr.bf16.gmra.mxu1 %v650_v6  ;;  %v1604_v6 = vld [vmem:[%s2029_s7] sm:$0xff]  }
 0x1f6   :  { %877 = vmatprep.mubr.bf16.mxu1 %v653_v43  ;;  %1522 = vmatprep.subr.bf16.mxu0 %v1604_v6 }
 0x1f7   :  { %1523 = vmatpush3.bf16.msra.mxu0 %v1604_v6 }
 0x1fd   :  { %878 = vmatmul.mubr.bf16.gmra.mxu1 %v652_v56 }
 0x285   :  { %v1412_v57 = vpop.f32.mrf.mxu1 }
 0x287   :  { %v1413_v63 = vpop.f32.mrf.mxu1 }
 0x288   :  { %v1414_v5 = vadd.f32 %v1413_v63, %v1412_v57 }
 0x289   :  { %v1415_v7 = vpop.f32.mrf.mxu1 }
 0x28a   :  { %v824_v8 = vadd.f32 %v1414_v5, %v1961_v58 }
 0x28b   :  { %v1416_v9 = vpop.f32.mrf.mxu1 }
 0x28c   :  { %v1417_v59 = vadd.f32 %v1416_v9, %v1415_v7  ;;  %v902_v62 = vmul.f32 0.2, %v824_v8  ;;  %vm886_vm0 = vcmp.ge.f32.partialorder %v824_v8, 0.0 }
 0x28d   :  { %v1418_v60 = vpop.f32.mrf.mxu1 }
 0x28e   :  { %v827_v10 = vadd.f32 %v1417_v59, %v1961_v58  ;;  %v918_v16 = vsel %vm886_vm0, %v824_v8, %v902_v62 }
 0x28f   :  { %v1419_v11 = vpop.f32.mrf.mxu1 }
 0x290   :  { %vm887_vm1 = vcmp.ge.f32.partialorder %v827_v10, 0.0  ;;  %v903_v12 = vmul.f32 0.2, %v827_v10  ;;  %v1420_v13 = vadd.f32 %v1419_v11, %v1418_v60 }
 0x291   :  { %v1421_v14 = vpop.f32.mrf.mxu1 }
 0x292   :  { %v832_v39 = vadd.f32 %v1420_v13, %v1961_v58  ;;  %v919_v17 = vsel %vm887_vm1, %v827_v10, %v903_v12 }
 0x293   :  { %v1422_v20 = vpop.f32.mrf.mxu1  ;;  %v934_v15 = vpack.c.bf16 %v919_v17, %v918_v16 }
 0x294   :  { %v1423_v18 = vadd.f32 %v1422_v20, %v1421_v14  ;;  %v904_v23 = vmul.f32 0.2, %v832_v39  ;;  %vm888_vm2 = vcmp.ge.f32.partialorder %v832_v39, 0.0 }
 0x295   :  { %v1424_v19 = vpop.f32.mrf.mxu1  ;;  %1524 = vmatprep.mubr.bf16.mxu0 %v934_v15 }
 0x296   :  { %v835_v24 = vadd.f32 %v1423_v18, %v1961_v58  ;;  %v920_v27 = vsel %vm888_vm2, %v832_v39, %v904_v23 }
 0x297   :  { %v1425_v26 = vpop.f32.mrf.mxu1 }
 0x298   :  { %vm889_vm3 = vcmp.ge.f32.partialorder %v835_v24, 0.0  ;;  %v905_v38 = vmul.f32 0.2, %v835_v24  ;;  %v1426_v41 = vadd.f32 %v1425_v26, %v1424_v19 }
 0x299   :  { %v1427_v44 = vpop.f32.mrf.mxu1 }
 0x29a   :  { %v921_v29 = vsel %vm889_vm3, %v835_v24, %v905_v38  ;;  %v840_v30 = vadd.f32 %v1426_v41, %v1961_v58 }
 0x29b   :  { %v935_v31 = vpack.c.bf16 %v921_v29, %v920_v27  ;;  %v1428_v32 = vpop.f32.mrf.mxu1 }
 0x29c   :  { %v1429_v33 = vadd.f32 %v1428_v32, %v1427_v44  ;;  %v906_v1 = vmul.f32 0.2, %v840_v30  ;;  %vm890_vm4 = vcmp.ge.f32.partialorder %v840_v30, 0.0 }
 0x29d   :  { %v1430_v0 = vpop.f32.mrf.mxu1  ;;  %1525 = vmatmul.mubr.bf16.vlgmr.msra.gmra.mxu0 %v935_v31 }
 0x29e   :  { %v843_v4 = vadd.f32 %v1429_v33, %v1961_v58  ;;  %v922_v46 = vsel %vm890_vm4, %v840_v30, %v906_v1 }
 0x29f   :  { %v1431_v34 = vpop.f32.mrf.mxu1 }
 0x2a0   :  { %vm891_vm5 = vcmp.ge.f32.partialorder %v843_v4, 0.0  ;;  %v907_v35 = vmul.f32 0.2, %v843_v4  ;;  %v1432_v36 = vadd.f32 %v1431_v34, %v1430_v0 }
 0x2a1   :  { %v1433_v37 = vpop.f32.mrf.mxu1 }
 0x2a2   :  { %v848_v42 = vadd.f32 %v1432_v36, %v1961_v58  ;;  %v923_v47 = vsel %vm891_vm5, %v843_v4, %v907_v35 }
 0x2a3   :  { %v1434_v21 = vpop.f32.mrf.mxu1  ;;  %v936_v22 = vpack.c.bf16 %v923_v47, %v922_v46  ;;  %v1982_v46 = vld [vmem:[%s2032_s8] ss:$0 sm:$0xff] }
 0x2a4   :  { %v1435_v25 = vadd.f32 %v1434_v21, %v1433_v37  ;;  %v908_v50 = vmul.f32 0.2, %v848_v42  ;;  %vm892_vm6 = vcmp.ge.f32.partialorder %v848_v42, 0.0 }
 0x2a5   :  { %v1436_v49 = vpop.f32.mrf.mxu1  ;;  %1528 = vmatprep.mubr.bf16.mxu0 %v936_v22 }
 0x2a6   :  { %v851_v51 = vadd.f32 %v1435_v25, %v1961_v58  ;;  %v924_v45 = vsel %vm892_vm6, %v848_v42, %v908_v50 }
 0x2a7   :  { %v1437_v52 = vpop.f32.mrf.mxu1 }
 0x2a8   :  { %vm893_vm7 = vcmp.ge.f32.partialorder %v851_v51, 0.0  ;;  %v909_v53 = vmul.f32 0.2, %v851_v51  ;;  %v1438_v28 = vadd.f32 %v1437_v52, %v1436_v49 }
 0x2a9   :  { %v1439_v54 = vpop.f32.mrf.mxu1 }
 0x2aa   :  { %v856_v43 = vadd.f32 %v1438_v28, %v1961_v58  ;;  %v925_v48 = vsel %vm893_vm7, %v851_v51, %v909_v53 }
 0x2ab   :  { %v1440_v55 = vpop.f32.mrf.mxu1  ;;  %v937_v56 = vpack.c.bf16 %v925_v48, %v924_v45 }
 0x2ac   :  { %v1441_v40 = vadd.f32 %v1440_v55, %v1439_v54  ;;  %v910_v2 = vmul.f32 0.2, %v856_v43  ;;  %vm894_vm8 = vcmp.ge.f32.partialorder %v856_v43, 0.0 }
 0x2ad   :  { %v1442_v61 = vpop.f32.mrf.mxu1  ;;  %1529 = vmatmul.mubr.bf16.gmra.mxu0 %v937_v56 }
 0x2ae   :  { %v859_v3 = vadd.f32 %v1441_v40, %v1961_v58  ;;  %v926_v8 = vsel %vm894_vm8, %v856_v43, %v910_v2 }
 0x2af   :  { %v1443_v6 = vpop.f32.mrf.mxu1 }
 0x2b0   :  { %vm895_vm9 = vcmp.ge.f32.partialorder %v859_v3, 0.0  ;;  %v911_v57 = vmul.f32 0.2, %v859_v3  ;;  %v1444_v63 = vadd.f32 %v1443_v6, %v1442_v61 }
 0x2b1   :  { %v1445_v5 = vpop.f32.mrf.mxu1 }
 0x2b2   :  { %v864_v7 = vadd.f32 %v1444_v63, %v1961_v58  ;;  %v927_v9 = vsel %vm895_vm9, %v859_v3, %v911_v57 }
 0x2b3   :  { %v1446_v59 = vpop.f32.mrf.mxu1  ;;  %v938_v60 = vpack.c.bf16 %v927_v9, %v926_v8 }
 0x2b4   :  { %v1447_v62 = vadd.f32 %v1446_v59, %v1445_v5  ;;  %v912_v11 = vmul.f32 0.2, %v864_v7  ;;  %vm896_vm10 = vcmp.ge.f32.partialorder %v864_v7, 0.0 }
 0x2b5   :  { %v1448_v10 = vpop.f32.mrf.mxu1  ;;  %1532 = vmatprep.mubr.bf16.mxu0 %v938_v60 }
 0x2b6   :  { %v867_v12 = vadd.f32 %v1447_v62, %v1961_v58  ;;  %v928_v20 = vsel %vm896_vm10, %v864_v7, %v912_v11 }
 0x2b7   :  { %v1449_v13 = vpop.f32.mrf.mxu1 }
 0x2b8   :  { %vm897_vm11 = vcmp.ge.f32.partialorder %v867_v12, 0.0  ;;  %v913_v14 = vmul.f32 0.2, %v867_v12  ;;  %v1450_v39 = vadd.f32 %v1449_v13, %v1448_v10 }
 0x2b9   :  { %v1451_v16 = vpop.f32.mrf.mxu1 }
 0x2ba   :  { %v872_v17 = vadd.f32 %v1450_v39, %v1961_v58  ;;  %v929_v15 = vsel %vm897_vm11, %v867_v12, %v913_v14 }
 0x2bb   :  { %v1452_v18 = vpop.f32.mrf.mxu1  ;;  %v939_v19 = vpack.c.bf16 %v929_v15, %v928_v20 }
 0x2bc   :  { %v1453_v23 = vadd.f32 %v1452_v18, %v1451_v16  ;;  %v914_v26 = vmul.f32 0.2, %v872_v17  ;;  %vm898_vm12 = vcmp.ge.f32.partialorder %v872_v17, 0.0 }
 0x2bd   :  { %v1454_v24 = vpop.f32.mrf.mxu1  ;;  %1533 = vmatmul.mubr.bf16.gmra.mxu0 %v939_v19 }
 0x2be   :  { %v875_v38 = vadd.f32 %v1453_v23, %v1961_v58  ;;  %v930_v31 = vsel %vm898_vm12, %v872_v17, %v914_v26 }
 0x2bf   :  { %v1455_v41 = vpop.f32.mrf.mxu1 }
 0x2c0   :  { %vm899_vm13 = vcmp.ge.f32.partialorder %v875_v38, 0.0  ;;  %v915_v44 = vmul.f32 0.2, %v875_v38  ;;  %v1456_v27 = vadd.f32 %v1455_v41, %v1454_v24 }
 0x2c1   :  { %v1457_v29 = vpop.f32.mrf.mxu1 }
 0x2c2   :  { %v880_v30 = vadd.f32 %v1456_v27, %v1961_v58  ;;  %v931_v32 = vsel %vm899_vm13, %v875_v38, %v915_v44 }
 0x2c3   :  { %v1458_v33 = vpop.f32.mrf.mxu1  ;;  %v940_v0 = vpack.c.bf16 %v931_v32, %v930_v31 }
 0x2c4   :  { %v1459_v1 = vadd.f32 %v1458_v33, %v1457_v29  ;;  %v916_v4 = vmul.f32 0.2, %v880_v30  ;;  %vm900_vm14 = vcmp.ge.f32.partialorder %v880_v30, 0.0 }
 0x2c5   :  { %1536 = vmatprep.mubr.bf16.mxu0 %v940_v0 }
 0x2c6   :  { %v883_v34 = vadd.f32 %v1459_v1, %v1961_v58  ;;  %v932_v36 = vsel %vm900_vm14, %v880_v30, %v916_v4 }
 0x2c8   :  { %vm901_vm15 = vcmp.ge.f32.partialorder %v883_v34, 0.0  ;;  %v917_v35 = vmul.f32 0.2, %v883_v34 }
 0x2ca   :  { %v933_v37 = vsel %vm901_vm15, %v883_v34, %v917_v35 }
 0x2cb   :  { %v941_v42 = vpack.c.bf16 %v933_v37, %v932_v36 }
 0x2cd   :  { %1537 = vmatmul.mubr.bf16.gmra.mxu0 %v941_v42 }
 0x35d   :  { %v1526_v47 = vpop.f32.mrf.mxu0 }
 0x35e   :  { %v1056_v21 = vadd.f32 %v1526_v47, %v1982_v46 }
 0x35f   :  { %v1047_v22 = vpop.f32.mrf.mxu0 }
 0x360   :  { %v1048_v25 = vadd.f32 %v1982_v46, %v1047_v22  ;;  %v1128_v58 = vmul.f32 0.2, %v1056_v21  ;;  %vm1112_vm0 = vcmp.ge.f32.partialorder %v1056_v21, 0.0 }
 0x361   :  { %v1527_v49 = vpop.f32.mrf.mxu0 }
 0x362   :  { %v1059_v50 = vadd.f32 %v1527_v49, %v1982_v46  ;;  %v1126_v52 = vmul.f32 0.2, %v1048_v25  ;;  %vm1110_vm2 = vcmp.ge.f32.partialorder %v1048_v25, 0.0  ;;  %v1144_v54 = vsel %vm1112_vm0, %v1056_v21, %v1128_v58 }
 0x363   :  { %v1050_v51 = vpop.f32.mrf.mxu0 }
 0x364   :  { %vm1113_vm1 = vcmp.ge.f32.partialorder %v1059_v50, 0.0  ;;  %v1129_v53 = vmul.f32 0.2, %v1059_v50  ;;  %v1051_v28 = vadd.f32 %v1982_v46, %v1050_v51  ;;  %v1142_v55 = vsel %vm1110_vm2, %v1048_v25, %v1126_v52 }
 0x366   :  { %v1145_v43 = vsel %vm1113_vm1, %v1059_v50, %v1129_v53  ;;  %vm1111_vm3 = vcmp.ge.f32.partialorder %v1051_v28, 0.0  ;;  %v1127_v45 = vmul.f32 0.2, %v1051_v28 }
 0x367   :  { %v1341_v48 = vpack.c.bf16 %v1145_v43, %v1144_v54 }
 0x368   :  { %v1143_v56 = vsel %vm1111_vm3, %v1051_v28, %v1127_v45 }
 0x369   :  { %1373 = vst [vmem:[%s2033_s9 + $0x8] sm:$0xff] %v1341_v48   ;;  %v1336_v40 = vpack.c.bf16 %v1143_v56, %v1142_v55 }
 0x36b   :  { %1337 = vst [vmem:[%s2033_s9] sm:$0xff] %v1336_v40  }
 0x36d   :  { %v1530_v61 = vpop.f32.mrf.mxu0 }
 0x36e   :  { %v1072_v2 = vadd.f32 %v1530_v61, %v1982_v46 }
 0x36f   :  { %v1063_v3 = vpop.f32.mrf.mxu0 }
 0x370   :  { %v1064_v6 = vadd.f32 %v1982_v46, %v1063_v3  ;;  %v1132_v63 = vmul.f32 0.2, %v1072_v2  ;;  %vm1116_vm4 = vcmp.ge.f32.partialorder %v1072_v2, 0.0 }
 0x371   :  { %v1531_v57 = vpop.f32.mrf.mxu0 }
 0x372   :  { %v1075_v5 = vadd.f32 %v1531_v57, %v1982_v46  ;;  %v1130_v8 = vmul.f32 0.2, %v1064_v6  ;;  %vm1114_vm6 = vcmp.ge.f32.partialorder %v1064_v6, 0.0  ;;  %v1148_v60 = vsel %vm1116_vm4, %v1072_v2, %v1132_v63 }
 0x373   :  { %v1066_v7 = vpop.f32.mrf.mxu0 }
 0x374   :  { %vm1117_vm5 = vcmp.ge.f32.partialorder %v1075_v5, 0.0  ;;  %v1133_v9 = vmul.f32 0.2, %v1075_v5  ;;  %v1067_v59 = vadd.f32 %v1982_v46, %v1066_v7  ;;  %v1146_v12 = vsel %vm1114_vm6, %v1064_v6, %v1130_v8 }
 0x376   :  { %v1149_v62 = vsel %vm1117_vm5, %v1075_v5, %v1133_v9  ;;  %vm1115_vm7 = vcmp.ge.f32.partialorder %v1067_v59, 0.0  ;;  %v1131_v10 = vmul.f32 0.2, %v1067_v59 }
 0x377   :  { %v1351_v11 = vpack.c.bf16 %v1149_v62, %v1148_v60 }
 0x378   :  { %v1147_v13 = vsel %vm1115_vm7, %v1067_v59, %v1131_v10 }
 0x379   :  { %1375 = vst [vmem:[%s2033_s9 + $0x18] sm:$0xff] %v1351_v11   ;;  %v1346_v14 = vpack.c.bf16 %v1147_v13, %v1146_v12 }
 0x37b   :  { %1374 = vst [vmem:[%s2033_s9 + $0x10] sm:$0xff] %v1346_v14  }
 0x37d   :  { %v1534_v39 = vpop.f32.mrf.mxu0 }
 0x37e   :  { %v1088_v16 = vadd.f32 %v1534_v39, %v1982_v46 }
 0x37f   :  { %v1079_v17 = vpop.f32.mrf.mxu0 }
 0x380   :  { %v1080_v20 = vadd.f32 %v1982_v46, %v1079_v17  ;;  %v1136_v18 = vmul.f32 0.2, %v1088_v16  ;;  %vm1120_vm8 = vcmp.ge.f32.partialorder %v1088_v16, 0.0 }
 0x381   :  { %v1535_v15 = vpop.f32.mrf.mxu0 }
 0x382   :  { %v1091_v19 = vadd.f32 %v1535_v15, %v1982_v46  ;;  %v1134_v24 = vmul.f32 0.2, %v1080_v20  ;;  %vm1118_vm10 = vcmp.ge.f32.partialorder %v1080_v20, 0.0  ;;  %v1152_v41 = vsel %vm1120_vm8, %v1088_v16, %v1136_v18 }
 0x383   :  { %v1082_v23 = vpop.f32.mrf.mxu0 }
 0x384   :  { %vm1121_vm9 = vcmp.ge.f32.partialorder %v1091_v19, 0.0  ;;  %v1137_v26 = vmul.f32 0.2, %v1091_v19  ;;  %v1083_v38 = vadd.f32 %v1982_v46, %v1082_v23  ;;  %v1150_v30 = vsel %vm1118_vm10, %v1080_v20, %v1134_v24 }
 0x386   :  { %v1153_v44 = vsel %vm1121_vm9, %v1091_v19, %v1137_v26  ;;  %vm1119_vm11 = vcmp.ge.f32.partialorder %v1083_v38, 0.0  ;;  %v1135_v27 = vmul.f32 0.2, %v1083_v38 }
 0x387   :  { %v1361_v29 = vpack.c.bf16 %v1153_v44, %v1152_v41 }
 0x388   :  { %v1151_v31 = vsel %vm1119_vm11, %v1083_v38, %v1135_v27 }
 0x389   :  { %1377 = vst [vmem:[%s2033_s9 + $0x28] sm:$0xff] %v1361_v29   ;;  %v1356_v32 = vpack.c.bf16 %v1151_v31, %v1150_v30 }
 0x38b   :  { %1376 = vst [vmem:[%s2033_s9 + $0x20] sm:$0xff] %v1356_v32  }
 0x38d   :  { %v1538_v33 = vpop.f32.mrf.mxu0 }
 0x38e   :  { %v1104_v0 = vadd.f32 %v1538_v33, %v1982_v46 }
 0x38f   :  { %v1095_v1 = vpop.f32.mrf.mxu0 }
 0x390   :  { %v1096_v4 = vadd.f32 %v1982_v46, %v1095_v1  ;;  %v1140_v35 = vmul.f32 0.2, %v1104_v0  ;;  %vm1124_vm12 = vcmp.ge.f32.partialorder %v1104_v0, 0.0 }
 0x391   :  { %v1539_v34 = vpop.f32.mrf.mxu0 }
 0x392   :  { %v1107_v36 = vadd.f32 %v1539_v34, %v1982_v46  ;;  %v1138_v42 = vmul.f32 0.2, %v1096_v4  ;;  %vm1122_vm14 = vcmp.ge.f32.partialorder %v1096_v4, 0.0  ;;  %v1156_v22 = vsel %vm1124_vm12, %v1104_v0, %v1140_v35 }
 0x393   :  { %v1098_v37 = vpop.f32.mrf.mxu0 }
 0x394   :  { %vm1125_vm13 = vcmp.ge.f32.partialorder %v1107_v36, 0.0  ;;  %v1141_v47 = vmul.f32 0.2, %v1107_v36  ;;  %v1099_v21 = vadd.f32 %v1982_v46, %v1098_v37  ;;  %v1154_v50 = vsel %vm1122_vm14, %v1096_v4, %v1138_v42 }
 0x396   :  { %v1157_v25 = vsel %vm1125_vm13, %v1107_v36, %v1141_v47  ;;  %vm1123_vm15 = vcmp.ge.f32.partialorder %v1099_v21, 0.0  ;;  %v1139_v49 = vmul.f32 0.2, %v1099_v21 }
 0x397   :  { %v1371_v58 = vpack.c.bf16 %v1157_v25, %v1156_v22 }
 0x398   :  { %v1155_v51 = vsel %vm1123_vm15, %v1099_v21, %v1139_v49 }
 0x399   :  { %1379 = vst [vmem:[%s2033_s9 + $0x38] sm:$0xff] %v1371_v58   ;;  %v1366_v52 = vpack.c.bf16 %v1155_v51, %v1154_v50 }
 0x39b   :  { %1378 = vst [vmem:[%s2033_s9 + $0x30] sm:$0xff] %v1366_v52  }

// kernel: deform_block_gnn_forward.3
= control target key start
LH: loop header
LB: loop body
LE: loop exit
PB: predicated region body
PF: predicated region fallthrough
CT: control target
= control target key end

     0   :  { %s3195_s21 = smov 0   ;;  %s3972_s0 = inlined_call_operand.vmem [shape: bf16[128,128], index: 0, kind: input, shape index: {}]   ;;  %s3973_s1 = inlined_call_operand.vmem [shape: bf16[128,128], index: 1, kind: input, shape index: {}]   ;;  %s3974_s2 = inlined_call_operand.vmem [shape: bf16[5,2,128,128], index: 2, kind: input, shape index: {}]   ;;  %s3975_s3 = inlined_call_operand.vmem [shape: f32[5,1,256], index: 3, kind: input, shape index: {}]   ;;  %s3976_s4 = inlined_call_operand.vmem [shape: f32[5,1,256], index: 4, kind: input, shape index: {}]   ;;  %s3977_s5 = inlined_call_operand.vmem [shape: f32[5,1,256], index: 5, kind: input, shape index: {}]   ;;  %s3978_s6 = inlined_call_operand.vmem [shape: f32[128,256], index: 6, kind: output, shape index: {}]  }
   0x1 LB: > { %s3201_s22 = sadd.s32 4294967295, %s3156_s21   ;;  %p2573_p0 = scmp.ge.s32.totalorder %s3156_s21, 1  ;;  %s3156_s21 = sphi %s3195_s21, %s16_s21  }
   0x2   : > { %p210_p1 = scmp.lt.s32.totalorder %s3156_s21, 6 }
   0x4   : > { %p211_p2 = pnand %p2573_p0, %p210_p1 }
   0x5   : > { %p245_p3 = scmp.lt.s32.totalorder (!%p211_p2), %s3201_s22, 4  ;;  %p2579_p4 = scmp.ne.s32.totalorder (!%p211_p2), %s3201_s22, 0 }
   0x6   : > { %214 = sbr.rel (%p211_p2) target bundleno = 2063 (0x80f), region = 40 }
   0xb   : > { %s246_s23 = scalar_select %p245_p3, %s3201_s22, 4 }
   0xc   : > { %266 = sbr.rel (%p2579_p4) target bundleno = 35 (0x23), region = 44 }
   0xd   : > { %s2682_s24 = sshll.u32 %s246_s23, 7  ;;  %s2576_s25 = sshll.u32 %s246_s23, 1 }
   0xe   : > { %s3212_s28 = scalar_lea.vmem %s3974_s2, %s2682_s24  ;;  %s3217_s7 = scalar_lea.vmem %s3975_s3, %s2576_s25 }
   0xf   : > { %s3222_s10 = scalar_lea.vmem %s3976_s4, %s2576_s25  ;;  %s3227_s13 = scalar_lea.vmem %s3977_s5, %s2576_s25 }
  0x11   : > { %v300_v0 = vld [vmem:[%s3973_s1] sm:$0xff]  ;;  %v302_v1 = vld [vmem:[%s3973_s1 + $0x8] sm:$0xff]  ;;  %v304_v2 = vld [vmem:[%s3973_s1 + $0x10] sm:$0xff] }
  0x12   : > { %301 = vst [vmem:[#allocation2] sm:$0xff] %v300_v0  ;;  %303 = vst [vmem:[#allocation2 + $0x8] sm:$0xff] %v302_v1  ;;  %v306_v3 = vld [vmem:[%s3973_s1 + $0x18] sm:$0xff]  ;;  %v308_v4 = vld [vmem:[%s3973_s1 + $0x20] sm:$0xff] }
  0x13   : > { %305 = vst [vmem:[#allocation2 + $0x10] sm:$0xff] %v304_v2  ;;  %v310_v5 = vld [vmem:[%s3973_s1 + $0x28] sm:$0xff]  ;;  %307 = vst [vmem:[#allocation2 + $0x18] sm:$0xff] %v306_v3  ;;  %v312_v6 = vld [vmem:[%s3973_s1 + $0x30] sm:$0xff] }
  0x14   : > { %309 = vst [vmem:[#allocation2 + $0x20] sm:$0xff] %v308_v4  ;;  %311 = vst [vmem:[#allocation2 + $0x28] sm:$0xff] %v310_v5  ;;  %v314_v7 = vld [vmem:[%s3973_s1 + $0x38] sm:$0xff] }
  0x15   : > { %313 = vst [vmem:[#allocation2 + $0x30] sm:$0xff] %v312_v6  ;;  %315 = vst [vmem:[#allocation2 + $0x38] sm:$0xff] %v314_v7 }
  0x16   : > { %323 = vsyncadd [#allocation4], 1024 }
  0x17   : > { %3152 = dma.done.wait [#allocation4], 1024 }
  0x18   : > { %3153 = vsyncadd [#allocation4], 4294966272  ;;  %v2684_v8 = vld [vmem:[%s3972_s0] sm:$0xff]   ;;  %v2715_v9 = vld [vmem:[%s3972_s0 + $0x8] sm:$0xff]  }
  0x19   : > { %v2716_v10 = vld [vmem:[%s3972_s0 + $0x10] sm:$0xff]   ;;  %v2685_v11 = vunpack.c.l.bf16 %v2684_v8  ;;  %v2686_v12 = vunpack.c.h.bf16 %v2684_v8  ;;  %v2689_v13 = vunpack.c.l.bf16 %v2715_v9  ;;  %v2690_v14 = vunpack.c.h.bf16 %v2715_v9  ;;  %v2717_v15 = vld [vmem:[%s3972_s0 + $0x18] sm:$0xff]   ;;  %v2718_v16 = vld [vmem:[%s3972_s0 + $0x20] sm:$0xff]  }
  0x1a   : > { %v2719_v17 = vld [vmem:[%s3972_s0 + $0x28] sm:$0xff]   ;;  %v2693_v18 = vunpack.c.l.bf16 %v2716_v10  ;;  %v2694_v19 = vunpack.c.h.bf16 %v2716_v10  ;;  %v2697_v20 = vunpack.c.l.bf16 %v2717_v15  ;;  %v2698_v21 = vunpack.c.h.bf16 %v2717_v15  ;;  %v2720_v22 = vld [vmem:[%s3972_s0 + $0x30] sm:$0xff]   ;;  %v2721_v23 = vld [vmem:[%s3972_s0 + $0x38] sm:$0xff]  }
  0x1b   : > { %360 = vst [vmem:[#allocation3 + $0x68] sm:$0xff] %v2685_v11  ;;  %361 = vst [vmem:[#allocation3] sm:$0xff] %v2686_v12  ;;  %v2701_v24 = vunpack.c.l.bf16 %v2718_v16  ;;  %v2702_v25 = vunpack.c.h.bf16 %v2718_v16  ;;  %v2705_v26 = vunpack.c.l.bf16 %v2719_v17  ;;  %v2706_v27 = vunpack.c.h.bf16 %v2719_v17 }
  0x1c   : > { %362 = vst [vmem:[#allocation3 + $0xb8] sm:$0xff] %v2689_v13  ;;  %363 = vst [vmem:[#allocation3 + $0x30] sm:$0xff] %v2690_v14  ;;  %v2709_v28 = vunpack.c.l.bf16 %v2720_v22  ;;  %v2710_v29 = vunpack.c.h.bf16 %v2720_v22  ;;  %v2713_v30 = vunpack.c.l.bf16 %v2721_v23  ;;  %v2714_v31 = vunpack.c.h.bf16 %v2721_v23 }
  0x1d   : > { %364 = vst [vmem:[#allocation3 + $0xa0] sm:$0xff] %v2693_v18  ;;  %365 = vst [vmem:[#allocation3 + $0xd0] sm:$0xff] %v2694_v19 }
  0x1e   : > { %366 = vst [vmem:[#allocation3 + $0x60] sm:$0xff] %v2697_v20  ;;  %367 = vst [vmem:[#allocation3 + $0x90] sm:$0xff] %v2698_v21 }
  0x1f   : > { %368 = vst [vmem:[#allocation3 + $0x8] sm:$0xff] %v2701_v24  ;;  %369 = vst [vmem:[#allocation3 + $0x18] sm:$0xff] %v2702_v25 }
  0x20   : > { %370 = vst [vmem:[#allocation3 + $0xd8] sm:$0xff] %v2705_v26  ;;  %371 = vst [vmem:[#allocation3 + $0x78] sm:$0xff] %v2706_v27 }
  0x21   : > { %372 = vst [vmem:[#allocation3 + $0xc0] sm:$0xff] %v2709_v28  ;;  %373 = vst [vmem:[#allocation3 + $0xe8] sm:$0xff] %v2710_v29 }
  0x22   : > { %374 = vst [vmem:[#allocation3 + $0x10] sm:$0xff] %v2713_v30  ;;  %375 = vst [vmem:[#allocation3 + $0xf0] sm:$0xff] %v2714_v31 }
  0x23 PF: > { %p2580_p5 = scmp.ge.s32.totalorder %s3201_s22, 2 }
  0x24   : > { %p2597_p6 = scmp.ne.s32.totalorder (!%p2580_p5), %s3201_s22, 1 }
  0x25   : > { %379 = sbr.rel (%p2580_p5) target bundleno = 571 (0x23b), region = 82 }
  0x2a   : > { %v3020_v32 = vld [vmem:[%s3212_s28 + $0x38] sm:$0xff]   ;;  %v3021_v33 = vld [vmem:[%s3212_s28 + $0x30] sm:$0xff]   ;;  %v3022_v34 = vld [vmem:[%s3212_s28 + $0x28] sm:$0xff]  }
  0x2b   : > { %2818 = vmatprep.subr.bf16.mxu0 %v3020_v32  ;;  %v3023_v35 = vld [vmem:[%s3212_s28 + $0x20] sm:$0xff]   ;;  %v396_v36 = vld [vmem:[#allocation3 + $0x68] sm:$0xff]  ;;  %v3024_v39 = vld [vmem:[%s3212_s28 + $0x18] sm:$0xff]  }
  0x2c   : > { %2819 = vmatpush3.bf16.msra.mxu0 %v3020_v32  ;;  %v397_v37 = vld [vmem:[#allocation3] sm:$0xff]  ;;  %v3025_v40 = vld [vmem:[%s3212_s28 + $0x10] sm:$0xff]   ;;  %v3026_v41 = vld [vmem:[%s3212_s28 + $0x8] sm:$0xff]   ;;  %v591_v32 = vlaneseq }
  0x2d   : > { %2820 = vmatprep.subr.bf16.mxu0 %v3021_v33  ;;  %v412_v38 = vpack.c.bf16 %v397_v37, %v396_v36  ;;  %v3027_v42 = vld [vmem:[%s3212_s28] sm:$0xff]   ;;  %v398_v43 = vld [vmem:[#allocation3 + $0xb8] sm:$0xff]  ;;  %v399_v44 = vld [vmem:[#allocation3 + $0x30] sm:$0xff] }
  0x2e   : > { %v400_v45 = vld [vmem:[#allocation3 + $0xa0] sm:$0xff]  ;;  %v401_v46 = vld [vmem:[#allocation3 + $0xd0] sm:$0xff]  ;;  %v413_v47 = vpack.c.bf16 %v399_v44, %v398_v43  ;;  %v404_v51 = vld [vmem:[#allocation3 + $0x8] sm:$0xff] }
  0x2f   : > { %2834 = vmatprep.mubr.bf16.mxu0 %v412_v38  ;;  %v414_v48 = vpack.c.bf16 %v401_v46, %v400_v45  ;;  %v402_v49 = vld [vmem:[#allocation3 + $0x60] sm:$0xff]  ;;  %v403_v50 = vld [vmem:[#allocation3 + $0x90] sm:$0xff]  ;;  %v405_v52 = vld [vmem:[#allocation3 + $0x18] sm:$0xff] }
  0x30   : > { %2821 = vmatpush3.bf16.msra.mxu0 %v3021_v33  ;;  %v415_v53 = vpack.c.bf16 %v403_v50, %v402_v49  ;;  %v416_v54 = vpack.c.bf16 %v405_v52, %v404_v51  ;;  %v406_v55 = vld [vmem:[#allocation3 + $0xd8] sm:$0xff]  ;;  %v408_v57 = vld [vmem:[#allocation3 + $0xc0] sm:$0xff]  ;;  %v409_v58 = vld [vmem:[#allocation3 + $0xe8] sm:$0xff]  ;;  %v592_v33 = vshrl.u32 %v591_v32, 7 }
  0x31   : > { %2822 = vmatprep.subr.bf16.mxu0 %v3022_v34  ;;  %v407_v56 = vld [vmem:[#allocation3 + $0x78] sm:$0xff]  ;;  %v418_v60 = vpack.c.bf16 %v409_v58, %v408_v57  ;;  %v410_v61 = vld [vmem:[#allocation3 + $0x10] sm:$0xff]  ;;  %v3028_v0 = vld [vmem:[#allocation2] sm:$0xff]  }
  0x32   : > { %v417_v59 = vpack.c.bf16 %v407_v56, %v406_v55  ;;  %v411_v62 = vld [vmem:[#allocation3 + $0xf0] sm:$0xff]  ;;  %2866 = vmatprep.mubr.bf16.mxu1 %v3028_v0  ;;  %v3029_v25 = vld [vmem:[#allocation2 + $0x8] sm:$0xff]   ;;  %v3031_v27 = vld [vmem:[#allocation2 + $0x18] sm:$0xff]  }
  0x33   : > { %v419_v63 = vpack.c.bf16 %v411_v62, %v410_v61  ;;  %v3030_v26 = vld [vmem:[#allocation2 + $0x10] sm:$0xff]   ;;  %v3032_v28 = vld [vmem:[#allocation2 + $0x20] sm:$0xff]   ;;  %v3033_v29 = vld [vmem:[#allocation2 + $0x28] sm:$0xff]  }
  0x34   : > { %2823 = vmatpush3.bf16.msra.mxu0 %v3022_v34  ;;  %v3034_v30 = vld [vmem:[#allocation2 + $0x30] sm:$0xff]   ;;  %v3035_v31 = vld [vmem:[#allocation2 + $0x38] sm:$0xff]   ;;  %v593_v34 = vsub.s32 0, %v592_v33  ;;  %v789_v37 = vld [vmem:[%s3222_s10] sm:$0x3] }
  0x35   : > { %2824 = vmatprep.subr.bf16.mxu0 %v3023_v35 }
  0x38   : > { %2825 = vmatpush3.bf16.msra.mxu0 %v3023_v35  ;;  %v589_v35 = vld [vmem:[%s3217_s7] sm:$0x3] }
  0x39   : > { %2826 = vmatprep.subr.bf16.mxu0 %v3024_v39  ;;  %v3290_v36 = vrot.slane %v589_v35, %v593_v34 }
  0x3c   : > { %2827 = vmatpush3.bf16.msra.mxu0 %v3024_v39 }
  0x3d   : > { %2828 = vmatprep.subr.bf16.mxu0 %v3025_v40 }
  0x40   : > { %2829 = vmatpush3.bf16.msra.mxu0 %v3025_v40  ;;  %v812_v40 = vld [vmem:[%s3227_s13] sm:$0x3] }
  0x41   : > { %2830 = vmatprep.subr.bf16.mxu0 %v3026_v41  ;;  %v3298_v45 = vrot.slane %v812_v40, %v593_v34 }
  0x44   : > { %2831 = vmatpush3.bf16.msra.mxu0 %v3026_v41  ;;  %v3295_v41 = vrot.slane %v789_v37, %v593_v34 }
  0x45   : > { %2832 = vmatprep.subr.bf16.mxu0 %v3027_v42 }
  0x48   : > { %2833 = vmatpush3.bf16.msra.mxu0 %v3027_v42 }
  0x4b   : > { %2835 = vmatmul.mubr.bf16.vlgmr.msra.gmra.mxu0 %v413_v47 }
  0x4c   : > { %2838 = vmatprep.mubr.bf16.mxu0 %v414_v48 }
  0x53   : > { %2839 = vmatmul.mubr.bf16.gmra.mxu0 %v415_v53 }
  0x54   : > { %2842 = vmatprep.mubr.bf16.mxu0 %v416_v54 }
  0x5b   : > { %2843 = vmatmul.mubr.bf16.gmra.mxu0 %v417_v59 }
  0x5c   : > { %2846 = vmatprep.mubr.bf16.mxu0 %v418_v60 }
  0x63   : > { %2847 = vmatmul.mubr.bf16.gmra.mxu0 %v419_v63 }
 0x10b   : > { %v2836_v1 = vpop.f32.mrf.mxu0 }
 0x10d   : > { %v518_v2 = vpop.f32.mrf.mxu0 }
 0x10f   : > { %v2837_v3 = vpop.f32.mrf.mxu0 }
 0x110   : > { %v582_v23 = vpack.c.bf16 %v2837_v3, %v2836_v1 }
 0x111   : > { %v521_v4 = vpop.f32.mrf.mxu0 }
 0x112   : > { %v581_v24 = vpack.c.bf16 %v521_v4, %v518_v2 }
 0x113   : > { %v2840_v5 = vpop.f32.mrf.mxu0 }
 0x115   : > { %v534_v6 = vpop.f32.mrf.mxu0 }
 0x117   : > { %v2841_v7 = vpop.f32.mrf.mxu0 }
 0x118   : > { %v584_v21 = vpack.c.bf16 %v2841_v7, %v2840_v5 }
 0x119   : > { %v537_v8 = vpop.f32.mrf.mxu0 }
 0x11a   : > { %v583_v22 = vpack.c.bf16 %v537_v8, %v534_v6 }
 0x11b   : > { %v2844_v9 = vpop.f32.mrf.mxu0 }
 0x11d   : > { %v550_v10 = vpop.f32.mrf.mxu0 }
 0x11f   : > { %v2845_v11 = vpop.f32.mrf.mxu0 }
 0x120   : > { %v586_v19 = vpack.c.bf16 %v2845_v11, %v2844_v9 }
 0x121   : > { %v553_v12 = vpop.f32.mrf.mxu0 }
 0x122   : > { %v585_v20 = vpack.c.bf16 %v553_v12, %v550_v10 }
 0x123   : > { %v2848_v13 = vpop.f32.mrf.mxu0 }
 0x125   : > { %v566_v14 = vpop.f32.mrf.mxu0 }
 0x127   : > { %v2849_v15 = vpop.f32.mrf.mxu0 }
 0x128   : > { %v588_v16 = vpack.c.bf16 %v2849_v15, %v2848_v13 }
 0x129   : > { %v569_v17 = vpop.f32.mrf.mxu0 }
 0x12a   : > { %v587_v18 = vpack.c.bf16 %v569_v17, %v566_v14  ;;  %2850 = vmatprep.subr.bf16.mxu1 %v588_v16 }
 0x12b   : > { %2851 = vmatpush3.bf16.msra.mxu1 %v588_v16 }
 0x12c   : > { %2852 = vmatprep.subr.bf16.mxu1 %v587_v18 }
 0x12f   : > { %2853 = vmatpush3.bf16.msra.mxu1 %v587_v18 }
 0x130   : > { %2854 = vmatprep.subr.bf16.mxu1 %v586_v19 }
 0x133   : > { %2855 = vmatpush3.bf16.msra.mxu1 %v586_v19 }
 0x134   : > { %2856 = vmatprep.subr.bf16.mxu1 %v585_v20 }
 0x137   : > { %2857 = vmatpush3.bf16.msra.mxu1 %v585_v20 }
 0x138   : > { %2858 = vmatprep.subr.bf16.mxu1 %v584_v21 }
 0x13b   : > { %2859 = vmatpush3.bf16.msra.mxu1 %v584_v21 }
 0x13c   : > { %2860 = vmatprep.subr.bf16.mxu1 %v583_v22 }
 0x13f   : > { %2861 = vmatpush3.bf16.msra.mxu1 %v583_v22 }
 0x140   : > { %2862 = vmatprep.subr.bf16.mxu1 %v582_v23 }
 0x143   : > { %2863 = vmatpush3.bf16.msra.mxu1 %v582_v23 }
 0x144   : > { %2864 = vmatprep.subr.bf16.mxu1 %v581_v24 }
 0x147   : > { %2865 = vmatpush3.bf16.msra.mxu1 %v581_v24 }
 0x14a   : > { %2867 = vmatmul.mubr.bf16.vlgmr.msra.gmra.mxu1 %v3029_v25 }
 0x14b   : > { %2870 = vmatprep.mubr.bf16.mxu1 %v3030_v26 }
 0x152   : > { %2871 = vmatmul.mubr.bf16.gmra.mxu1 %v3031_v27 }
 0x153   : > { %2874 = vmatprep.mubr.bf16.mxu1 %v3032_v28 }
 0x15a   : > { %2875 = vmatmul.mubr.bf16.gmra.mxu1 %v3033_v29 }
 0x15b   : > { %2878 = vmatprep.mubr.bf16.mxu1 %v3034_v30 }
 0x162   : > { %2879 = vmatmul.mubr.bf16.gmra.mxu1 %v3035_v31 }
 0x20a   : > { %v2868_v38 = vpop.f32.mrf.mxu1 }
 0x20b   : > { %v687_v39 = vadd.f32 %v2868_v38, %v3290_v36 }
 0x20c   : > { %v678_v42 = vpop.f32.mrf.mxu1 }
 0x20d   : > { %vm743_vm0 = vcmp.ge.f32.partialorder %v687_v39, 0.0  ;;  %v759_v43 = vmul.f32 0.2, %v687_v39  ;;  %v679_v44 = vadd.f32 %v678_v42, %v3290_v36 }
 0x20e   : > { %v2869_v46 = vpop.f32.mrf.mxu1 }
 0x20f   : > { %v775_v47 = vsel %vm743_vm0, %v687_v39, %v759_v43  ;;  %vm741_vm1 = vcmp.ge.f32.partialorder %v679_v44, 0.0  ;;  %v757_v48 = vmul.f32 0.2, %v679_v44  ;;  %v690_v49 = vadd.f32 %v2869_v46, %v3290_v36 }
 0x210   : > { %v798_v50 = vmul.f32 %v3295_v41, %v775_v47  ;;  %v681_v51 = vpop.f32.mrf.mxu1 }
 0x211   : > { %v773_v52 = vsel %vm741_vm1, %v679_v44, %v757_v48  ;;  %vm744_vm2 = vcmp.ge.f32.partialorder %v690_v49, 0.0  ;;  %v760_v53 = vmul.f32 0.2, %v690_v49  ;;  %v682_v54 = vadd.f32 %v681_v51, %v3290_v36 }
 0x212   : > { %v3304_v55 = vadd.f32 %v3298_v45, %v798_v50  ;;  %v796_v56 = vmul.f32 %v3295_v41, %v773_v52  ;;  %v2872_v57 = vpop.f32.mrf.mxu1 }
 0x213   : > { %v776_v58 = vsel %vm744_vm2, %v690_v49, %v760_v53  ;;  %vm742_vm3 = vcmp.ge.f32.partialorder %v682_v54, 0.0  ;;  %v758_v59 = vmul.f32 0.2, %v682_v54  ;;  %v703_v60 = vadd.f32 %v2872_v57, %v3290_v36 }
 0x214   : > { %837 = vst [vmem:[#allocation3 + $0xb8] sm:$0xff] %v3304_v55  ;;  %v3310_v61 = vadd.f32 %v3298_v45, %v796_v56  ;;  %v799_v62 = vmul.f32 %v3295_v41, %v776_v58  ;;  %v694_v63 = vpop.f32.mrf.mxu1 }
 0x215   : > { %v774_v0 = vsel %vm742_vm3, %v682_v54, %v758_v59  ;;  %vm747_vm4 = vcmp.ge.f32.partialorder %v703_v60, 0.0  ;;  %v763_v1 = vmul.f32 0.2, %v703_v60  ;;  %v695_v2 = vadd.f32 %v694_v63, %v3290_v36 }
 0x216   : > { %835 = vst [vmem:[#allocation3 + $0x68] sm:$0xff] %v3310_v61  ;;  %v3316_v3 = vadd.f32 %v3298_v45, %v799_v62  ;;  %v797_v4 = vmul.f32 %v3295_v41, %v774_v0  ;;  %v2873_v5 = vpop.f32.mrf.mxu1 }
 0x217   : > { %v779_v6 = vsel %vm747_vm4, %v703_v60, %v763_v1  ;;  %vm745_vm5 = vcmp.ge.f32.partialorder %v695_v2, 0.0  ;;  %v761_v7 = vmul.f32 0.2, %v695_v2  ;;  %v706_v8 = vadd.f32 %v2873_v5, %v3290_v36 }
 0x218   : > { %838 = vst [vmem:[#allocation3 + $0x30] sm:$0xff] %v3316_v3  ;;  %v3322_v9 = vadd.f32 %v3298_v45, %v797_v4  ;;  %v802_v10 = vmul.f32 %v3295_v41, %v779_v6  ;;  %v697_v11 = vpop.f32.mrf.mxu1 }
 0x219   : > { %v777_v12 = vsel %vm745_vm5, %v695_v2, %v761_v7  ;;  %vm748_vm6 = vcmp.ge.f32.partialorder %v706_v8, 0.0  ;;  %v764_v13 = vmul.f32 0.2, %v706_v8  ;;  %v698_v14 = vadd.f32 %v697_v11, %v3290_v36 }
 0x21a   : > { %836 = vst [vmem:[#allocation3] sm:$0xff] %v3322_v9  ;;  %v3328_v15 = vadd.f32 %v3298_v45, %v802_v10  ;;  %v800_v16 = vmul.f32 %v3295_v41, %v777_v12  ;;  %v2876_v17 = vpop.f32.mrf.mxu1 }
 0x21b   : > { %v780_v18 = vsel %vm748_vm6, %v706_v8, %v764_v13  ;;  %vm746_vm7 = vcmp.ge.f32.partialorder %v698_v14, 0.0  ;;  %v762_v19 = vmul.f32 0.2, %v698_v14  ;;  %v719_v20 = vadd.f32 %v2876_v17, %v3290_v36 }
 0x21c   : > { %841 = vst [vmem:[#allocation3 + $0x60] sm:$0xff] %v3328_v15  ;;  %v3334_v21 = vadd.f32 %v3298_v45, %v800_v16  ;;  %v803_v22 = vmul.f32 %v3295_v41, %v780_v18  ;;  %v710_v23 = vpop.f32.mrf.mxu1 }
 0x21d   : > { %v778_v24 = vsel %vm746_vm7, %v698_v14, %v762_v19  ;;  %vm751_vm8 = vcmp.ge.f32.partialorder %v719_v20, 0.0  ;;  %v767_v25 = vmul.f32 0.2, %v719_v20  ;;  %v711_v26 = vadd.f32 %v710_v23, %v3290_v36 }
 0x21e   : > { %839 = vst [vmem:[#allocation3 + $0xa0] sm:$0xff] %v3334_v21  ;;  %v3340_v27 = vadd.f32 %v3298_v45, %v803_v22  ;;  %v801_v28 = vmul.f32 %v3295_v41, %v778_v24  ;;  %v2877_v29 = vpop.f32.mrf.mxu1 }
 0x21f   : > { %v783_v30 = vsel %vm751_vm8, %v719_v20, %v767_v25  ;;  %vm749_vm9 = vcmp.ge.f32.partialorder %v711_v26, 0.0  ;;  %v765_v31 = vmul.f32 0.2, %v711_v26  ;;  %v722_v32 = vadd.f32 %v2877_v29, %v3290_v36 }
 0x220   : > { %842 = vst [vmem:[#allocation3 + $0x90] sm:$0xff] %v3340_v27  ;;  %v824_v33 = vadd.f32 %v3298_v45, %v801_v28  ;;  %v806_v34 = vmul.f32 %v3295_v41, %v783_v30  ;;  %v713_v35 = vpop.f32.mrf.mxu1 }
 0x221   : > { %v781_v37 = vsel %vm749_vm9, %v711_v26, %v765_v31  ;;  %vm752_vm10 = vcmp.ge.f32.partialorder %v722_v32, 0.0  ;;  %v768_v38 = vmul.f32 0.2, %v722_v32  ;;  %v714_v39 = vadd.f32 %v713_v35, %v3290_v36 }
 0x222   : > { %840 = vst [vmem:[#allocation3 + $0xd0] sm:$0xff] %v824_v33  ;;  %v829_v40 = vadd.f32 %v3298_v45, %v806_v34  ;;  %v804_v42 = vmul.f32 %v3295_v41, %v781_v37  ;;  %v2880_v43 = vpop.f32.mrf.mxu1 }
 0x223   : > { %v784_v44 = vsel %vm752_vm10, %v722_v32, %v768_v38  ;;  %vm750_vm11 = vcmp.ge.f32.partialorder %v714_v39, 0.0  ;;  %v766_v46 = vmul.f32 0.2, %v714_v39  ;;  %v735_v47 = vadd.f32 %v2880_v43, %v3290_v36 }
 0x224   : > { %845 = vst [vmem:[#allocation3 + $0xd8] sm:$0xff] %v829_v40  ;;  %v827_v48 = vadd.f32 %v3298_v45, %v804_v42  ;;  %v807_v49 = vmul.f32 %v3295_v41, %v784_v44  ;;  %v726_v50 = vpop.f32.mrf.mxu1 }
 0x225   : > { %v782_v51 = vsel %vm750_vm11, %v714_v39, %v766_v46  ;;  %vm755_vm12 = vcmp.ge.f32.partialorder %v735_v47, 0.0  ;;  %v771_v52 = vmul.f32 0.2, %v735_v47  ;;  %v727_v53 = vadd.f32 %v726_v50, %v3290_v36 }
 0x226   : > { %843 = vst [vmem:[#allocation3 + $0x8] sm:$0xff] %v827_v48  ;;  %v830_v54 = vadd.f32 %v3298_v45, %v807_v49  ;;  %v805_v56 = vmul.f32 %v3295_v41, %v782_v51  ;;  %v2881_v57 = vpop.f32.mrf.mxu1 }
 0x227   : > { %v787_v58 = vsel %vm755_vm12, %v735_v47, %v771_v52  ;;  %vm753_vm13 = vcmp.ge.f32.partialorder %v727_v53, 0.0  ;;  %v769_v59 = vmul.f32 0.2, %v727_v53  ;;  %v738_v60 = vadd.f32 %v2881_v57, %v3290_v36 }
 0x228   : > { %846 = vst [vmem:[#allocation3 + $0x78] sm:$0xff] %v830_v54  ;;  %v828_v62 = vadd.f32 %v3298_v45, %v805_v56  ;;  %v810_v63 = vmul.f32 %v3295_v41, %v787_v58  ;;  %v729_v0 = vpop.f32.mrf.mxu1 }
 0x229   : > { %v785_v1 = vsel %vm753_vm13, %v727_v53, %v769_v59  ;;  %vm756_vm14 = vcmp.ge.f32.partialorder %v738_v60, 0.0  ;;  %v772_v2 = vmul.f32 0.2, %v738_v60  ;;  %v730_v4 = vadd.f32 %v729_v0, %v3290_v36 }
 0x22a   : > { %844 = vst [vmem:[#allocation3 + $0x18] sm:$0xff] %v828_v62  ;;  %v833_v5 = vadd.f32 %v3298_v45, %v810_v63  ;;  %v808_v6 = vmul.f32 %v3295_v41, %v785_v1 }
 0x22b   : > { %v788_v7 = vsel %vm756_vm14, %v738_v60, %v772_v2  ;;  %vm754_vm15 = vcmp.ge.f32.partialorder %v730_v4, 0.0  ;;  %v770_v8 = vmul.f32 0.2, %v730_v4 }
 0x22c   : > { %849 = vst [vmem:[#allocation3 + $0x10] sm:$0xff] %v833_v5  ;;  %v831_v10 = vadd.f32 %v3298_v45, %v808_v6  ;;  %v811_v11 = vmul.f32 %v3295_v41, %v788_v7 }
 0x22d   : > { %v786_v12 = vsel %vm754_vm15, %v730_v4, %v770_v8 }
 0x22e   : > { %847 = vst [vmem:[#allocation3 + $0xc0] sm:$0xff] %v831_v10  ;;  %v834_v13 = vadd.f32 %v3298_v45, %v811_v11  ;;  %v809_v14 = vmul.f32 %v3295_v41, %v786_v12  ;;  %854 = sbr.rel (%p2597_p6) target bundleno = 571 (0x23b), region = 86 }
 0x230   : > { %850 = vst [vmem:[#allocation3 + $0xf0] sm:$0xff] %v834_v13  ;;  %v832_v36 = vadd.f32 %v3298_v45, %v809_v14 }
 0x232   : > { %848 = vst [vmem:[#allocation3 + $0xe8] sm:$0xff] %v832_v36 }
 0x233   : > { %855 = vst [vmem:[#allocation3 + $0x70] sm:$0xff] %v3310_v61  ;;  %856 = vst [vmem:[#allocation3 + $0xb0] sm:$0xff] %v3322_v9 }
 0x234   : > { %857 = vst [vmem:[#allocation3 + $0x80] sm:$0xff] %v3304_v55  ;;  %858 = vst [vmem:[#allocation3 + $0x98] sm:$0xff] %v3316_v3 }
 0x235   : > { %859 = vst [vmem:[#allocation3 + $0xc8] sm:$0xff] %v3334_v21  ;;  %860 = vst [vmem:[#allocation3 + $0x28] sm:$0xff] %v824_v33 }
 0x236   : > { %861 = vst [vmem:[#allocation3 + $0xe0] sm:$0xff] %v3328_v15  ;;  %862 = vst [vmem:[#allocation3 + $0x88] sm:$0xff] %v3340_v27 }
 0x237   : > { %863 = vst [vmem:[#allocation3 + $0x58] sm:$0xff] %v827_v48  ;;  %864 = vst [vmem:[#allocation3 + $0xa8] sm:$0xff] %v828_v62 }
 0x238   : > { %865 = vst [vmem:[#allocation3 + $0x20] sm:$0xff] %v829_v40  ;;  %866 = vst [vmem:[#allocation3 + $0x50] sm:$0xff] %v830_v54 }
 0x239   : > { %867 = vst [vmem:[#allocation3 + $0x48] sm:$0xff] %v831_v10  ;;  %868 = vst [vmem:[#allocation3 + $0xf8] sm:$0xff] %v832_v36 }
 0x23a   : > { %869 = vst [vmem:[#allocation3 + $0x40] sm:$0xff] %v833_v5  ;;  %870 = vst [vmem:[#allocation3 + $0x38] sm:$0xff] %v834_v13 }
 0x23b PF: > { %p873_p7 = pnand %p2580_p5, %p245_p3 }
 0x23d   : > { %876 = sbr.rel (%p873_p7) target bundleno = 1165 (0x48d), region = 90 }
 0x242   : > { %v3036_v41 = vld [vmem:[%s3212_s28 + $0x38] sm:$0xff]   ;;  %v3037_v45 = vld [vmem:[%s3212_s28 + $0x30] sm:$0xff]   ;;  %v3038_v55 = vld [vmem:[%s3212_s28 + $0x28] sm:$0xff]  }
 0x243   : > { %2882 = vmatprep.subr.bf16.mxu1 %v3036_v41  ;;  %v3039_v61 = vld [vmem:[%s3212_s28 + $0x20] sm:$0xff]   ;;  %v3383_v3 = vld [vmem:[#allocation3 + $0x68] sm:$0xff]  ;;  %v3040_v16 = vld [vmem:[%s3212_s28 + $0x18] sm:$0xff]  }
 0x244   : > { %2883 = vmatpush3.bf16.msra.mxu1 %v3036_v41  ;;  %v3385_v9 = vld [vmem:[#allocation3] sm:$0xff]  ;;  %v3041_v17 = vld [vmem:[%s3212_s28 + $0x10] sm:$0xff]   ;;  %v3042_v18 = vld [vmem:[%s3212_s28 + $0x8] sm:$0xff]   ;;  %v3979_v41 = vmov 0  }
 0x245   : > { %2884 = vmatprep.subr.bf16.mxu1 %v3037_v45  ;;  %v925_v15 = vpack.c.bf16 %v3385_v9, %v3383_v3  ;;  %v3043_v19 = vld [vmem:[%s3212_s28] sm:$0xff]   ;;  %v3393_v20 = vld [vmem:[#allocation3 + $0xb8] sm:$0xff]  ;;  %v3395_v21 = vld [vmem:[#allocation3 + $0x30] sm:$0xff]  ;;  %1372 = vmatprep.mubr.bf16.mxu0 %v3979_v41 }
 0x246   : > { %v3044_v22 = vld [vmem:[%s3212_s28 + $0x78] sm:$0xff]   ;;  %v3398_v23 = vld [vmem:[#allocation3 + $0xa0] sm:$0xff]  ;;  %v3400_v24 = vld [vmem:[#allocation3 + $0xd0] sm:$0xff]  ;;  %v926_v25 = vpack.c.bf16 %v3395_v21, %v3393_v20 }
 0x247   : > { %2898 = vmatprep.mubr.bf16.mxu1 %v925_v15  ;;  %v927_v26 = vpack.c.bf16 %v3400_v24, %v3398_v23  ;;  %v3045_v27 = vld [vmem:[%s3212_s28 + $0x70] sm:$0xff]   ;;  %v3407_v28 = vld [vmem:[#allocation3 + $0x60] sm:$0xff]  ;;  %v3046_v30 = vld [vmem:[%s3212_s28 + $0x68] sm:$0xff]  }
 0x248   : > { %2885 = vmatpush3.bf16.msra.mxu1 %v3037_v45  ;;  %v3409_v29 = vld [vmem:[#allocation3 + $0x90] sm:$0xff]  ;;  %v3412_v31 = vld [vmem:[#allocation3 + $0x8] sm:$0xff]  ;;  %v3414_v32 = vld [vmem:[#allocation3 + $0x18] sm:$0xff] }
 0x249   : > { %2886 = vmatprep.subr.bf16.mxu1 %v3038_v55  ;;  %v928_v33 = vpack.c.bf16 %v3409_v29, %v3407_v28  ;;  %v929_v34 = vpack.c.bf16 %v3414_v32, %v3412_v31  ;;  %v3047_v35 = vld [vmem:[%s3212_s28 + $0x60] sm:$0xff]   ;;  %v3421_v37 = vld [vmem:[#allocation3 + $0xd8] sm:$0xff]  ;;  %v3428_v42 = vld [vmem:[#allocation3 + $0xe8] sm:$0xff] }
 0x24a   : > { %v3423_v38 = vld [vmem:[#allocation3 + $0x78] sm:$0xff]  ;;  %v3426_v40 = vld [vmem:[#allocation3 + $0xc0] sm:$0xff]  ;;  %3987 = vst [vmem:[#allocation7_spill] sm:$0xff] %v3428_v42  ;;  %v3049_v46 = vld [vmem:[%s3212_s28 + $0x50] sm:$0xff]  }
 0x24b   : > { %v3048_v39 = vld [vmem:[%s3212_s28 + $0x58] sm:$0xff]   ;;  %v930_v43 = vpack.c.bf16 %v3423_v38, %v3421_v37  ;;  %v931_v44 = vpack.c.bf16 %v3428_v42, %v3426_v40  ;;  %v3435_v47 = vld [vmem:[#allocation3 + $0x10] sm:$0xff]  ;;  %v3050_v49 = vld [vmem:[%s3212_s28 + $0x48] sm:$0xff]  }
 0x24c   : > { %2887 = vmatpush3.bf16.msra.mxu1 %v3038_v55  ;;  %3988 = vst [vmem:[#allocation8_spill] sm:$0xff] %v3435_v47  ;;  %v3437_v48 = vld [vmem:[#allocation3 + $0xf0] sm:$0xff]  ;;  %v3051_v54 = vld [vmem:[%s3212_s28 + $0x40] sm:$0xff]   ;;  %v3451_v57 = vld [vmem:[#allocation3 + $0x98] sm:$0xff] }
 0x24d   : > { %2888 = vmatprep.subr.bf16.mxu1 %v3039_v61  ;;  %3989 = vst [vmem:[#allocation9_spill] sm:$0xff] %v3437_v48  ;;  %v3440_v50 = vld [vmem:[#allocation3 + $0x70] sm:$0xff]  ;;  %v932_v52 = vpack.c.bf16 %v3437_v48, %v3435_v47  ;;  %v3449_v56 = vld [vmem:[#allocation3 + $0x80] sm:$0xff]  ;;  %v3453_v58 = vld [vmem:[#allocation3 + $0xc8] sm:$0xff] }
 0x24e   : > { %v3442_v51 = vld [vmem:[#allocation3 + $0xb0] sm:$0xff]  ;;  %v3455_v59 = vld [vmem:[#allocation3 + $0x28] sm:$0xff]  ;;  %v1095_v60 = vpack.c.bf16 %v3451_v57, %v3449_v56  ;;  %v3461_v63 = vld [vmem:[#allocation3 + $0xe0] sm:$0xff] }
 0x24f   : > { %v1094_v53 = vpack.c.bf16 %v3442_v51, %v3440_v50  ;;  %v1096_v62 = vpack.c.bf16 %v3455_v59, %v3453_v58  ;;  %v3463_v0 = vld [vmem:[#allocation3 + $0x88] sm:$0xff]  ;;  %v3465_v1 = vld [vmem:[#allocation3 + $0x58] sm:$0xff]  ;;  %v3473_v6 = vld [vmem:[#allocation3 + $0x20] sm:$0xff] }
 0x250   : > { %2889 = vmatpush3.bf16.msra.mxu1 %v3039_v61  ;;  %v3467_v2 = vld [vmem:[#allocation3 + $0xa8] sm:$0xff]  ;;  %v1097_v4 = vpack.c.bf16 %v3463_v0, %v3461_v63  ;;  %v3475_v7 = vld [vmem:[#allocation3 + $0x50] sm:$0xff]  ;;  %v3479_v10 = vld [vmem:[#allocation3 + $0xf8] sm:$0xff] }
 0x251   : > { %2890 = vmatprep.subr.bf16.mxu1 %v3040_v16  ;;  %v1098_v5 = vpack.c.bf16 %v3467_v2, %v3465_v1  ;;  %v3477_v8 = vld [vmem:[#allocation3 + $0x48] sm:$0xff]  ;;  %3990 = vst [vmem:[#allocation10_spill] sm:$0xff] %v3479_v10  ;;  %v1099_v11 = vpack.c.bf16 %v3475_v7, %v3473_v6  ;;  %v3485_v13 = vld [vmem:[#allocation3 + $0x40] sm:$0xff]  ;;  %v3487_v14 = vld [vmem:[#allocation3 + $0x38] sm:$0xff] }
 0x252   : > { %v1100_v12 = vpack.c.bf16 %v3479_v10, %v3477_v8  ;;  %3991 = vst [vmem:[#allocation11_spill] sm:$0xff] %v3485_v13  ;;  %3992 = vst [vmem:[#allocation12_spill] sm:$0xff] %v3487_v14  ;;  %v1101_v36 = vpack.c.bf16 %v3487_v14, %v3485_v13 }
 0x254   : > { %2891 = vmatpush3.bf16.msra.mxu1 %v3040_v16 }
 0x255   : > { %2892 = vmatprep.subr.bf16.mxu1 %v3041_v17 }
 0x258   : > { %2893 = vmatpush3.bf16.msra.mxu1 %v3041_v17 }
 0x259   : > { %2894 = vmatprep.subr.bf16.mxu1 %v3042_v18 }
 0x25c   : > { %2895 = vmatpush3.bf16.msra.mxu1 %v3042_v18 }
 0x25d   : > { %2896 = vmatprep.subr.bf16.mxu1 %v3043_v19 }
 0x260   : > { %2897 = vmatpush3.bf16.msra.mxu1 %v3043_v19 }
 0x261   : > { %2914 = vmatprep.subr.bf16.mxu1 %v3044_v22 }
 0x263   : > { %2899 = vmatmul.mubr.bf16.vlgmr.msra.gmra.mxu1 %v926_v25 }
 0x264   : > { %2915 = vmatpush3.bf16.msra.mxu1 %v3044_v22  ;;  %2902 = vmatprep.mubr.bf16.mxu1 %v927_v26 }
 0x265   : > { %2916 = vmatprep.subr.bf16.mxu1 %v3045_v27 }
 0x268   : > { %2917 = vmatpush3.bf16.msra.mxu1 %v3045_v27 }
 0x269   : > { %2918 = vmatprep.subr.bf16.mxu1 %v3046_v30 }
 0x26b   : > { %2903 = vmatmul.mubr.bf16.gmra.mxu1 %v928_v33 }
 0x26c   : > { %2919 = vmatpush3.bf16.msra.mxu1 %v3046_v30  ;;  %2906 = vmatprep.mubr.bf16.mxu1 %v929_v34 }
 0x26d   : > { %2920 = vmatprep.subr.bf16.mxu1 %v3047_v35 }
 0x270   : > { %2921 = vmatpush3.bf16.msra.mxu1 %v3047_v35 }
 0x271   : > { %2922 = vmatprep.subr.bf16.mxu1 %v3048_v39 }
 0x273   : > { %2907 = vmatmul.mubr.bf16.gmra.mxu1 %v930_v43 }
 0x274   : > { %2923 = vmatpush3.bf16.msra.mxu1 %v3048_v39  ;;  %2910 = vmatprep.mubr.bf16.mxu1 %v931_v44 }
 0x275   : > { %2924 = vmatprep.subr.bf16.mxu1 %v3049_v46 }
 0x278   : > { %2925 = vmatpush3.bf16.msra.mxu1 %v3049_v46 }
 0x279   : > { %2926 = vmatprep.subr.bf16.mxu1 %v3050_v49 }
 0x27b   : > { %2911 = vmatmul.mubr.bf16.gmra.mxu1 %v932_v52 }
 0x27c   : > { %2927 = vmatpush3.bf16.msra.mxu1 %v3050_v49  ;;  %2930 = vmatprep.mubr.bf16.mxu1 %v1094_v53 }
 0x27d   : > { %2928 = vmatprep.subr.bf16.mxu1 %v3051_v54 }
 0x280   : > { %2929 = vmatpush3.bf16.msra.mxu1 %v3051_v54 }
 0x283   : > { %2931 = vmatmul.mubr.bf16.vlgmr.msra.gmra.mxu1 %v1095_v60 }
 0x284   : > { %2934 = vmatprep.mubr.bf16.mxu1 %v1096_v62 }
 0x28b   : > { %2935 = vmatmul.mubr.bf16.gmra.mxu1 %v1097_v4 }
 0x28c   : > { %2938 = vmatprep.mubr.bf16.mxu1 %v1098_v5 }
 0x293   : > { %2939 = vmatmul.mubr.bf16.gmra.mxu1 %v1099_v11 }
 0x294   : > { %2942 = vmatprep.mubr.bf16.mxu1 %v1100_v12 }
 0x29b   : > { %2943 = vmatmul.mubr.bf16.gmra.mxu1 %v1101_v36 }
 0x323   : > { %v2900_v45 = vpop.f32.mrf.mxu1 }
 0x325   : > { %v3492_v55 = vpop.f32.mrf.mxu1 }
 0x327   : > { %v2901_v61 = vpop.f32.mrf.mxu1 }
 0x328   : > { %v1266_v15 = vpack.c.bf16 %v2901_v61, %v2900_v45 }
 0x329   : > { %v1034_v16 = vpop.f32.mrf.mxu1 }
 0x32a   : > { %v1264_v17 = vpack.c.bf16 %v1034_v16, %v3492_v55 }
 0x32b   : > { %v2904_v18 = vpop.f32.mrf.mxu1 }
 0x32d   : > { %v1047_v19 = vpop.f32.mrf.mxu1 }
 0x32f   : > { %v2905_v22 = vpop.f32.mrf.mxu1 }
 0x330   : > { %v1270_v25 = vpack.c.bf16 %v2905_v22, %v2904_v18 }
 0x331   : > { %v1050_v26 = vpop.f32.mrf.mxu1 }
 0x332   : > { %v1268_v27 = vpack.c.bf16 %v1050_v26, %v1047_v19 }
 0x333   : > { %v2908_v30 = vpop.f32.mrf.mxu1 }
 0x335   : > { %v1063_v33 = vpop.f32.mrf.mxu1 }
 0x337   : > { %v2909_v34 = vpop.f32.mrf.mxu1 }
 0x338   : > { %v1274_v48 = vpack.c.bf16 %v2909_v34, %v2908_v30  ;;  %v1280_v30 = vld [vmem:[%s3217_s7] sm:$0x3] }
 0x339   : > { %v1066_v35 = vpop.f32.mrf.mxu1 }
 0x33a   : > { %v1272_v47 = vpack.c.bf16 %v1066_v35, %v1063_v33  ;;  %v1549_v35 = vld [vmem:[%s3222_s10] sm:$0x3] }
 0x33b   : > { %v2912_v39 = vpop.f32.mrf.mxu1 }
 0x33d   : > { %v1079_v43 = vpop.f32.mrf.mxu1 }
 0x33f   : > { %v2913_v44 = vpop.f32.mrf.mxu1 }
 0x340   : > { %v1278_v19 = vpack.c.bf16 %v2913_v44, %v2912_v39 }
 0x341   : > { %v1082_v46 = vpop.f32.mrf.mxu1 }
 0x342   : > { %v1276_v41 = vpack.c.bf16 %v1082_v46, %v1079_v43  ;;  %v3052_v43 = vld [vmem:[#allocation2] sm:$0xff]  }
 0x343   : > { %v2932_v49 = vpop.f32.mrf.mxu1 }
 0x345   : > { %v1201_v52 = vpop.f32.mrf.mxu1 }
 0x347   : > { %v2933_v53 = vpop.f32.mrf.mxu1 }
 0x348   : > { %v1267_v39 = vpack.c.bf16 %v2933_v53, %v2932_v49  ;;  %v1593_v53 = vld [vmem:[%s3227_s13] sm:$0x3] }
 0x349   : > { %v1204_v54 = vpop.f32.mrf.mxu1 }
 0x34a   : > { %v1265_v44 = vpack.c.bf16 %v1204_v54, %v1201_v52 }
 0x34b   : > { %v2936_v60 = vpop.f32.mrf.mxu1 }
 0x34d   : > { %v1217_v62 = vpop.f32.mrf.mxu1 }
 0x34f   : > { %v2937_v4 = vpop.f32.mrf.mxu1 }
 0x350   : > { %v1271_v10 = vpack.c.bf16 %v2937_v4, %v2936_v60 }
 0x351   : > { %v1220_v5 = vpop.f32.mrf.mxu1 }
 0x352   : > { %v1269_v42 = vpack.c.bf16 %v1220_v5, %v1217_v62 }
 0x353   : > { %v2940_v11 = vpop.f32.mrf.mxu1 }
 0x355   : > { %v1233_v12 = vpop.f32.mrf.mxu1 }
 0x357   : > { %v2941_v36 = vpop.f32.mrf.mxu1 }
 0x358   : > { %v1275_v14 = vpack.c.bf16 %v2941_v36, %v2940_v11 }
 0x359   : > { %v1236_v45 = vpop.f32.mrf.mxu1 }
 0x35a   : > { %v1273_v13 = vpack.c.bf16 %v1236_v45, %v1233_v12 }
 0x35b   : > { %v2944_v55 = vpop.f32.mrf.mxu1 }
 0x35d   : > { %v1249_v61 = vpop.f32.mrf.mxu1 }
 0x35f   : > { %v2945_v16 = vpop.f32.mrf.mxu1 }
 0x360   : > { %v1279_v18 = vpack.c.bf16 %v2945_v16, %v2944_v55 }
 0x361   : > { %v1252_v22 = vpop.f32.mrf.mxu1 }
 0x362   : > { %v1277_v26 = vpack.c.bf16 %v1252_v22, %v1249_v61  ;;  %1340 = vmatprep.subr.bf16.mxu0 %v1279_v18 }
 0x363   : > { %1341 = vmatpush1.bf16.msra.mxu0 %v1278_v19 }
 0x364   : > { %1342 = vmatprep.subr.bf16.mxu0 %v1277_v26 }
 0x367   : > { %1343 = vmatpush1.bf16.msra.mxu0 %v1276_v41  ;;  %v3058_v41 = vld [vmem:[#allocation2 + $0x30] sm:$0xff]  }
 0x368   : > { %1344 = vmatprep.subr.bf16.mxu0 %v1275_v14  ;;  %v3993_v14 = vmov 0  }
 0x36b   : > { %1345 = vmatpush1.bf16.msra.mxu0 %v1274_v48  ;;  %v3053_v48 = vld [vmem:[#allocation2 + $0x8] sm:$0xff]  }
 0x36c   : > { %1346 = vmatprep.subr.bf16.mxu0 %v1273_v13  ;;  %v3057_v13 = vld [vmem:[#allocation2 + $0x28] sm:$0xff]  }
 0x36f   : > { %1347 = vmatpush1.bf16.msra.mxu0 %v1272_v47  ;;  %v3054_v47 = vld [vmem:[#allocation2 + $0x10] sm:$0xff]  }
 0x370   : > { %1348 = vmatprep.subr.bf16.mxu0 %v1271_v10  ;;  %v3056_v10 = vld [vmem:[#allocation2 + $0x20] sm:$0xff]  }
 0x373   : > { %1349 = vmatpush1.bf16.msra.mxu0 %v1270_v25 }
 0x374   : > { %1350 = vmatprep.subr.bf16.mxu0 %v1269_v42  ;;  %v3055_v42 = vld [vmem:[#allocation2 + $0x18] sm:$0xff]  }
 0x377   : > { %1351 = vmatpush1.bf16.msra.mxu0 %v1268_v27 }
 0x378   : > { %1352 = vmatprep.subr.bf16.mxu0 %v1267_v39 }
 0x37b   : > { %1353 = vmatpush1.bf16.msra.mxu0 %v1266_v15  ;;  %v3059_v15 = vld [vmem:[#allocation2 + $0x38] sm:$0xff]  }
 0x37c   : > { %1354 = vmatprep.subr.bf16.mxu0 %v1265_v44 }
 0x37f   : > { %1355 = vmatpush1.bf16.msra.mxu0 %v1264_v17  ;;  %v1282_v17 = vlaneseq }
 0x381   : > { %v1283_v25 = vshrl.u32 %v1282_v17, 7 }
 0x382   : > { %1373 = vmatmul.mubr.bf16.vlgmr.msra.gmra.mxu0 %v3052_v43 }
 0x383   : > { %1382 = vmatprep.mubr.bf16.mxu0 %v3993_v14  ;;  %v1284_v27 = vsub.s32 0, %v1283_v25  ;;  %v1288_v33 = vsub.s32 1, %v1283_v25 }
 0x385   : > { %v3503_v34 = vrot.slane %v1280_v30, %v1284_v27  ;;  %v3506_v46 = vrot.slane %v1280_v30, %v1288_v33  ;;  %v3510_v54 = vrot.slane %v1549_v35, %v1284_v27  ;;  %v3513_v5 = vrot.slane %v1593_v53, %v1284_v27 }
 0x386   : > { %v3515_v11 = vrot.slane %v1549_v35, %v1288_v33  ;;  %v3519_v16 = vrot.slane %v1593_v53, %v1288_v33 }
 0x38a   : > { %1383 = vmatmul.mubr.bf16.gmra.mxu0 %v3053_v48 }
 0x38b   : > { %1392 = vmatprep.mubr.bf16.mxu0 %v3993_v14 }
 0x392   : > { %1393 = vmatmul.mubr.bf16.gmra.mxu0 %v3054_v47 }
 0x393   : > { %1402 = vmatprep.mubr.bf16.mxu0 %v3993_v14 }
 0x39a   : > { %1403 = vmatmul.mubr.bf16.gmra.mxu0 %v3055_v42 }
 0x39b   : > { %1412 = vmatprep.mubr.bf16.mxu0 %v3993_v14 }
 0x3a2   : > { %1413 = vmatmul.mubr.bf16.gmra.mxu0 %v3056_v10 }
 0x3a3   : > { %1422 = vmatprep.mubr.bf16.mxu0 %v3993_v14 }
 0x3aa   : > { %1423 = vmatmul.mubr.bf16.gmra.mxu0 %v3057_v13 }
 0x3ab   : > { %1432 = vmatprep.mubr.bf16.mxu0 %v3993_v14 }
 0x3b2   : > { %1433 = vmatmul.mubr.bf16.gmra.mxu0 %v3058_v41 }
 0x3b3   : > { %1442 = vmatprep.mubr.bf16.mxu0 %v3993_v14 }
 0x3ba   : > { %1443 = vmatmul.mubr.bf16.gmra.mxu0 %v3059_v15 }
 0x442   : > { %v1374_v49 = vpop.f32.mrf.mxu0 }
 0x443   : > { %v1375_v52 = vadd.f32 %v1374_v49, %v3503_v34 }
 0x444   : > { %v1376_v60 = vpop.f32.mrf.mxu0 }
 0x445   : > { %vm1453_vm0 = vcmp.ge.f32.partialorder %v1375_v52, 0.0  ;;  %v1485_v62 = vmul.f32 0.2, %v1375_v52  ;;  %v1377_v4 = vadd.f32 %v1376_v60, %v3506_v46 }
 0x446   : > { %v1378_v12 = vpop.f32.mrf.mxu0 }
 0x447   : > { %v1517_v36 = vsel %vm1453_vm0, %v1375_v52, %v1485_v62  ;;  %vm1454_vm1 = vcmp.ge.f32.partialorder %v1377_v4, 0.0  ;;  %v1486_v45 = vmul.f32 0.2, %v1377_v4  ;;  %v1379_v55 = vadd.f32 %v1378_v12, %v3503_v34 }
 0x448   : > { %v1561_v61 = vmul.f32 %v3510_v54, %v1517_v36  ;;  %v1380_v18 = vpop.f32.mrf.mxu0 }
 0x449   : > { %v1518_v19 = vsel %vm1454_vm1, %v1377_v4, %v1486_v45  ;;  %vm1455_vm2 = vcmp.ge.f32.partialorder %v1379_v55, 0.0  ;;  %v1487_v22 = vmul.f32 0.2, %v1379_v55  ;;  %v1381_v26 = vadd.f32 %v1380_v18, %v3506_v46 }
 0x44a   : > { %v1605_v39 = vadd.f32 %v3513_v5, %v1561_v61  ;;  %v1562_v44 = vmul.f32 %v3515_v11, %v1518_v19  ;;  %v1384_v43 = vpop.f32.mrf.mxu0 }
 0x44b   : > { %v1519_v14 = vsel %vm1455_vm2, %v1379_v55, %v1487_v22  ;;  %vm1456_vm3 = vcmp.ge.f32.partialorder %v1381_v26, 0.0  ;;  %v1488_v48 = vmul.f32 0.2, %v1381_v26  ;;  %v1385_v47 = vadd.f32 %v1384_v43, %v3503_v34 }
 0x44c   : > { %v1637_v42 = vadd.f32 %v1605_v39, %v3383_v3  ;;  %v1606_v10 = vadd.f32 %v3519_v16, %v1562_v44  ;;  %v1563_v13 = vmul.f32 %v3510_v54, %v1519_v14  ;;  %v1386_v41 = vpop.f32.mrf.mxu0 }
 0x44d   : > { %v1520_v15 = vsel %vm1456_vm3, %v1381_v26, %v1488_v48  ;;  %vm1457_vm4 = vcmp.ge.f32.partialorder %v1385_v47, 0.0  ;;  %v1489_v17 = vmul.f32 0.2, %v1385_v47  ;;  %v1387_v25 = vadd.f32 %v1386_v41, %v3506_v46 }
 0x44e   : > { %1669 = vst [vmem:[#allocation3 + $0x68] sm:$0xff] %v1637_v42  ;;  %v1638_v27 = vadd.f32 %v1606_v10, %v3440_v50  ;;  %v1607_v30 = vadd.f32 %v3513_v5, %v1563_v13  ;;  %v1564_v33 = vmul.f32 %v3515_v11, %v1520_v15  ;;  %v1388_v35 = vpop.f32.mrf.mxu0 }
 0x44f   : > { %v1521_v49 = vsel %vm1457_vm4, %v1385_v47, %v1489_v17  ;;  %vm1458_vm5 = vcmp.ge.f32.partialorder %v1387_v25, 0.0  ;;  %v1490_v3 = vmul.f32 0.2, %v1387_v25  ;;  %v1389_v52 = vadd.f32 %v1388_v35, %v3503_v34 }
 0x450   : > { %1670 = vst [vmem:[#allocation3 + $0x70] sm:$0xff] %v1638_v27  ;;  %v1639_v53 = vadd.f32 %v1607_v30, %v3385_v9  ;;  %v1608_v60 = vadd.f32 %v3519_v16, %v1564_v33  ;;  %v1565_v62 = vmul.f32 %v3510_v54, %v1521_v49  ;;  %v1390_v4 = vpop.f32.mrf.mxu0 }
 0x451   : > { %v1522_v12 = vsel %vm1458_vm5, %v1387_v25, %v1490_v3  ;;  %vm1459_vm6 = vcmp.ge.f32.partialorder %v1389_v52, 0.0  ;;  %v1491_v50 = vmul.f32 0.2, %v1389_v52  ;;  %v1391_v36 = vadd.f32 %v1390_v4, %v3506_v46 }
 0x452   : > { %1671 = vst [vmem:[#allocation3] sm:$0xff] %v1639_v53  ;;  %v1640_v45 = vadd.f32 %v1608_v60, %v3442_v51  ;;  %v1609_v55 = vadd.f32 %v3513_v5, %v1565_v62  ;;  %v1566_v61 = vmul.f32 %v3515_v11, %v1522_v12  ;;  %v1394_v18 = vpop.f32.mrf.mxu0 }
 0x453   : > { %v1523_v19 = vsel %vm1459_vm6, %v1389_v52, %v1491_v50  ;;  %vm1460_vm7 = vcmp.ge.f32.partialorder %v1391_v36, 0.0  ;;  %v1492_v9 = vmul.f32 0.2, %v1391_v36  ;;  %v1395_v22 = vadd.f32 %v1394_v18, %v3503_v34 }
 0x454   : > { %1672 = vst [vmem:[#allocation3 + $0xb0] sm:$0xff] %v1640_v45  ;;  %v1641_v26 = vadd.f32 %v1609_v55, %v3393_v20  ;;  %v1610_v39 = vadd.f32 %v3519_v16, %v1566_v61  ;;  %v1567_v44 = vmul.f32 %v3510_v54, %v1523_v19  ;;  %v1396_v43 = vpop.f32.mrf.mxu0 }
 0x455   : > { %v1524_v14 = vsel %vm1460_vm7, %v1391_v36, %v1492_v9  ;;  %vm1461_vm8 = vcmp.ge.f32.partialorder %v1395_v22, 0.0  ;;  %v1493_v51 = vmul.f32 0.2, %v1395_v22  ;;  %v1397_v48 = vadd.f32 %v1396_v43, %v3506_v46 }
 0x456   : > { %1673 = vst [vmem:[#allocation3 + $0xb8] sm:$0xff] %v1641_v26  ;;  %v1642_v47 = vadd.f32 %v1610_v39, %v3449_v56  ;;  %v1611_v42 = vadd.f32 %v3513_v5, %v1567_v44  ;;  %v1568_v10 = vmul.f32 %v3515_v11, %v1524_v14  ;;  %v1398_v13 = vpop.f32.mrf.mxu0 }
 0x457   : > { %v1525_v41 = vsel %vm1461_vm8, %v1395_v22, %v1493_v51  ;;  %vm1462_vm9 = vcmp.ge.f32.partialorder %v1397_v48, 0.0  ;;  %v1494_v20 = vmul.f32 0.2, %v1397_v48  ;;  %v1399_v15 = vadd.f32 %v1398_v13, %v3503_v34 }
 0x458   : > { %1674 = vst [vmem:[#allocation3 + $0x80] sm:$0xff] %v1642_v47  ;;  %v1643_v17 = vadd.f32 %v1611_v42, %v3395_v21  ;;  %v1612_v25 = vadd.f32 %v3519_v16, %v1568_v10  ;;  %v1569_v27 = vmul.f32 %v3510_v54, %v1525_v41  ;;  %v1400_v30 = vpop.f32.mrf.mxu0 }
 0x459   : > { %v1526_v33 = vsel %vm1462_vm9, %v1397_v48, %v1494_v20  ;;  %vm1463_vm10 = vcmp.ge.f32.partialorder %v1399_v15, 0.0  ;;  %v1495_v56 = vmul.f32 0.2, %v1399_v15  ;;  %v1401_v35 = vadd.f32 %v1400_v30, %v3506_v46 }
 0x45a   : > { %1675 = vst [vmem:[#allocation3 + $0x30] sm:$0xff] %v1643_v17  ;;  %v1644_v49 = vadd.f32 %v1612_v25, %v3451_v57  ;;  %v1613_v3 = vadd.f32 %v3513_v5, %v1569_v27  ;;  %v1570_v52 = vmul.f32 %v3515_v11, %v1526_v33  ;;  %v1404_v53 = vpop.f32.mrf.mxu0 }
 0x45b   : > { %v1527_v60 = vsel %vm1463_vm10, %v1399_v15, %v1495_v56  ;;  %vm1464_vm11 = vcmp.ge.f32.partialorder %v1401_v35, 0.0  ;;  %v1496_v21 = vmul.f32 0.2, %v1401_v35  ;;  %v1405_v62 = vadd.f32 %v1404_v53, %v3503_v34 }
 0x45c   : > { %1676 = vst [vmem:[#allocation3 + $0x98] sm:$0xff] %v1644_v49  ;;  %v1645_v4 = vadd.f32 %v1613_v3, %v3398_v23  ;;  %v1614_v12 = vadd.f32 %v3519_v16, %v1570_v52  ;;  %v1571_v50 = vmul.f32 %v3510_v54, %v1527_v60  ;;  %v1406_v36 = vpop.f32.mrf.mxu0 }
 0x45d   : > { %v1528_v45 = vsel %vm1464_vm11, %v1401_v35, %v1496_v21  ;;  %vm1465_vm12 = vcmp.ge.f32.partialorder %v1405_v62, 0.0  ;;  %v1497_v57 = vmul.f32 0.2, %v1405_v62  ;;  %v1407_v55 = vadd.f32 %v1406_v36, %v3506_v46 }
 0x45e   : > { %1677 = vst [vmem:[#allocation3 + $0xa0] sm:$0xff] %v1645_v4  ;;  %v1646_v61 = vadd.f32 %v1614_v12, %v3453_v58  ;;  %v1615_v18 = vadd.f32 %v3513_v5, %v1571_v50  ;;  %v1572_v19 = vmul.f32 %v3515_v11, %v1528_v45  ;;  %v1408_v9 = vpop.f32.mrf.mxu0 }
 0x45f   : > { %v1529_v22 = vsel %vm1465_vm12, %v1405_v62, %v1497_v57  ;;  %vm1466_vm13 = vcmp.ge.f32.partialorder %v1407_v55, 0.0  ;;  %v1498_v23 = vmul.f32 0.2, %v1407_v55  ;;  %v1409_v26 = vadd.f32 %v1408_v9, %v3503_v34 }
 0x460   : > { %1678 = vst [vmem:[#allocation3 + $0xc8] sm:$0xff] %v1646_v61  ;;  %v1647_v39 = vadd.f32 %v1615_v18, %v3400_v24  ;;  %v1616_v44 = vadd.f32 %v3519_v16, %v1572_v19  ;;  %v1573_v43 = vmul.f32 %v3510_v54, %v1529_v22  ;;  %v1410_v14 = vpop.f32.mrf.mxu0 }
 0x461   : > { %v1530_v51 = vsel %vm1466_vm13, %v1407_v55, %v1498_v23  ;;  %vm1467_vm14 = vcmp.ge.f32.partialorder %v1409_v26, 0.0  ;;  %v1499_v58 = vmul.f32 0.2, %v1409_v26  ;;  %v1411_v48 = vadd.f32 %v1410_v14, %v3506_v46 }
 0x462   : > { %1679 = vst [vmem:[#allocation3 + $0xd0] sm:$0xff] %v1647_v39  ;;  %v1648_v47 = vadd.f32 %v1616_v44, %v3455_v59  ;;  %v1617_v42 = vadd.f32 %v3513_v5, %v1573_v43  ;;  %v1574_v10 = vmul.f32 %v3515_v11, %v1530_v51  ;;  %v1414_v13 = vpop.f32.mrf.mxu0 }
 0x463   : > { %v1531_v41 = vsel %vm1467_vm14, %v1409_v26, %v1499_v58  ;;  %vm1468_vm15 = vcmp.ge.f32.partialorder %v1411_v48, 0.0  ;;  %v1500_v24 = vmul.f32 0.2, %v1411_v48  ;;  %v1415_v20 = vadd.f32 %v1414_v13, %v3503_v34 }
 0x464   : > { %1680 = vst [vmem:[#allocation3 + $0x28] sm:$0xff] %v1648_v47  ;;  %v1649_v15 = vadd.f32 %v1617_v42, %v3407_v28  ;;  %v1618_v17 = vadd.f32 %v3519_v16, %v1574_v10  ;;  %v1575_v25 = vmul.f32 %v3510_v54, %v1531_v41  ;;  %v1416_v27 = vpop.f32.mrf.mxu0 }
 0x465   : > { %v1532_v30 = vsel %vm1468_vm15, %v1411_v48, %v1500_v24  ;;  %vm1469_vm0 = vcmp.ge.f32.partialorder %v1415_v20, 0.0  ;;  %v1501_v59 = vmul.f32 0.2, %v1415_v20  ;;  %v1417_v33 = vadd.f32 %v1416_v27, %v3506_v46 }
 0x466   : > { %1681 = vst [vmem:[#allocation3 + $0x60] sm:$0xff] %v1649_v15  ;;  %v1650_v56 = vadd.f32 %v1618_v17, %v3461_v63  ;;  %v1619_v35 = vadd.f32 %v3513_v5, %v1575_v25  ;;  %v1576_v49 = vmul.f32 %v3515_v11, %v1532_v30  ;;  %v1418_v3 = vpop.f32.mrf.mxu0 }
 0x467   : > { %v1533_v52 = vsel %vm1469_vm0, %v1415_v20, %v1501_v59  ;;  %vm1470_vm1 = vcmp.ge.f32.partialorder %v1417_v33, 0.0  ;;  %v1502_v28 = vmul.f32 0.2, %v1417_v33  ;;  %v1419_v53 = vadd.f32 %v1418_v3, %v3503_v34 }
 0x468   : > { %1682 = vst [vmem:[#allocation3 + $0xe0] sm:$0xff] %v1650_v56  ;;  %v1651_v60 = vadd.f32 %v1619_v35, %v3409_v29  ;;  %v1620_v21 = vadd.f32 %v3519_v16, %v1576_v49  ;;  %v1577_v62 = vmul.f32 %v3510_v54, %v1533_v52  ;;  %v1420_v4 = vpop.f32.mrf.mxu0 }
 0x469   : > { %v1534_v12 = vsel %vm1470_vm1, %v1417_v33, %v1502_v28  ;;  %vm1471_vm2 = vcmp.ge.f32.partialorder %v1419_v53, 0.0  ;;  %v1503_v63 = vmul.f32 0.2, %v1419_v53  ;;  %v1421_v50 = vadd.f32 %v1420_v4, %v3506_v46 }
 0x46a   : > { %1683 = vst [vmem:[#allocation3 + $0x90] sm:$0xff] %v1651_v60  ;;  %v1652_v36 = vadd.f32 %v1620_v21, %v3463_v0  ;;  %v1621_v45 = vadd.f32 %v3513_v5, %v1577_v62  ;;  %v1578_v57 = vmul.f32 %v3515_v11, %v1534_v12  ;;  %v1424_v55 = vpop.f32.mrf.mxu0 }
 0x46b   : > { %v1535_v61 = vsel %vm1471_vm2, %v1419_v53, %v1503_v63  ;;  %vm1472_vm3 = vcmp.ge.f32.partialorder %v1421_v50, 0.0  ;;  %v1504_v29 = vmul.f32 0.2, %v1421_v50  ;;  %v1425_v18 = vadd.f32 %v1424_v55, %v3503_v34 }
 0x46c   : > { %1684 = vst [vmem:[#allocation3 + $0x88] sm:$0xff] %v1652_v36  ;;  %v1653_v19 = vadd.f32 %v1621_v45, %v3412_v31  ;;  %v1622_v9 = vadd.f32 %v3519_v16, %v1578_v57  ;;  %v1579_v22 = vmul.f32 %v3510_v54, %v1535_v61  ;;  %v1426_v23 = vpop.f32.mrf.mxu0 }
 0x46d   : > { %v1536_v26 = vsel %vm1472_vm3, %v1421_v50, %v1504_v29  ;;  %vm1473_vm4 = vcmp.ge.f32.partialorder %v1425_v18, 0.0  ;;  %v1505_v0 = vmul.f32 0.2, %v1425_v18  ;;  %v1427_v39 = vadd.f32 %v1426_v23, %v3506_v46 }
 0x46e   : > { %1685 = vst [vmem:[#allocation3 + $0x8] sm:$0xff] %v1653_v19  ;;  %v1654_v44 = vadd.f32 %v1622_v9, %v3465_v1  ;;  %v1623_v43 = vadd.f32 %v3513_v5, %v1579_v22  ;;  %v1580_v14 = vmul.f32 %v3515_v11, %v1536_v26  ;;  %v1428_v51 = vpop.f32.mrf.mxu0 }
 0x46f   : > { %v1537_v58 = vsel %vm1473_vm4, %v1425_v18, %v1505_v0  ;;  %vm1474_vm5 = vcmp.ge.f32.partialorder %v1427_v39, 0.0  ;;  %v1506_v31 = vmul.f32 0.2, %v1427_v39  ;;  %v1429_v48 = vadd.f32 %v1428_v51, %v3503_v34 }
 0x470   : > { %1686 = vst [vmem:[#allocation3 + $0x58] sm:$0xff] %v1654_v44  ;;  %v1655_v47 = vadd.f32 %v1623_v43, %v3414_v32  ;;  %v1624_v42 = vadd.f32 %v3519_v16, %v1580_v14  ;;  %v1581_v10 = vmul.f32 %v3510_v54, %v1537_v58  ;;  %v1430_v13 = vpop.f32.mrf.mxu0 }
 0x471   : > { %v1538_v41 = vsel %vm1474_vm5, %v1427_v39, %v1506_v31  ;;  %vm1475_vm6 = vcmp.ge.f32.partialorder %v1429_v48, 0.0  ;;  %v1507_v1 = vmul.f32 0.2, %v1429_v48  ;;  %v1431_v24 = vadd.f32 %v1430_v13, %v3506_v46 }
 0x472   : > { %1687 = vst [vmem:[#allocation3 + $0x18] sm:$0xff] %v1655_v47  ;;  %v1656_v20 = vadd.f32 %v1624_v42, %v3467_v2  ;;  %v1625_v15 = vadd.f32 %v3513_v5, %v1581_v10  ;;  %v1582_v17 = vmul.f32 %v3515_v11, %v1538_v41  ;;  %v1434_v25 = vpop.f32.mrf.mxu0 }
 0x473   : > { %v1539_v27 = vsel %vm1475_vm6, %v1429_v48, %v1507_v1  ;;  %vm1476_vm7 = vcmp.ge.f32.partialorder %v1431_v24, 0.0  ;;  %v1508_v32 = vmul.f32 0.2, %v1431_v24  ;;  %v1435_v30 = vadd.f32 %v1434_v25, %v3503_v34  ;;  %v3994_v48 = vld [vmem:[#allocation7_spill] sm:$0xff] }
 0x474   : > { %1688 = vst [vmem:[#allocation3 + $0xa8] sm:$0xff] %v1656_v20  ;;  %v1657_v59 = vadd.f32 %v1625_v15, %v3421_v37  ;;  %v1626_v33 = vadd.f32 %v3519_v16, %v1582_v17  ;;  %v1583_v56 = vmul.f32 %v3510_v54, %v1539_v27  ;;  %v1436_v35 = vpop.f32.mrf.mxu0  ;;  %v3996_v27 = vld [vmem:[#allocation8_spill] sm:$0xff] }
 0x475   : > { %v1540_v49 = vsel %vm1476_vm7, %v1431_v24, %v1508_v32  ;;  %vm1477_vm8 = vcmp.ge.f32.partialorder %v1435_v30, 0.0  ;;  %v1509_v2 = vmul.f32 0.2, %v1435_v30  ;;  %v1437_v3 = vadd.f32 %v1436_v35, %v3506_v46  ;;  %v3995_v24 = vld [vmem:[#allocation10_spill] sm:$0xff] }
 0x476   : > { %1689 = vst [vmem:[#allocation3 + $0xd8] sm:$0xff] %v1657_v59  ;;  %v1658_v52 = vadd.f32 %v1626_v33, %v3473_v6  ;;  %v1627_v28 = vadd.f32 %v3513_v5, %v1583_v56  ;;  %v1584_v53 = vmul.f32 %v3515_v11, %v1540_v49  ;;  %v1438_v60 = vpop.f32.mrf.mxu0 }
 0x477   : > { %v1541_v21 = vsel %vm1477_vm8, %v1435_v30, %v1509_v2  ;;  %vm1478_vm9 = vcmp.ge.f32.partialorder %v1437_v3, 0.0  ;;  %v1510_v37 = vmul.f32 0.2, %v1437_v3  ;;  %v1439_v62 = vadd.f32 %v1438_v60, %v3503_v34  ;;  %v3998_v2 = vld [vmem:[#allocation9_spill] sm:$0xff] }
 0x478   : > { %1690 = vst [vmem:[#allocation3 + $0x20] sm:$0xff] %v1658_v52  ;;  %v1659_v4 = vadd.f32 %v1627_v28, %v3423_v38  ;;  %v1628_v12 = vadd.f32 %v3519_v16, %v1584_v53  ;;  %v1585_v63 = vmul.f32 %v3510_v54, %v1541_v21  ;;  %v1440_v50 = vpop.f32.mrf.mxu0  ;;  %v3999_v28 = vld [vmem:[#allocation12_spill] sm:$0xff] }
 0x479   : > { %v1542_v36 = vsel %vm1478_vm9, %v1437_v3, %v1510_v37  ;;  %vm1479_vm10 = vcmp.ge.f32.partialorder %v1439_v62, 0.0  ;;  %v1511_v6 = vmul.f32 0.2, %v1439_v62  ;;  %v1441_v45 = vadd.f32 %v1440_v50, %v3506_v46 }
 0x47a   : > { %1691 = vst [vmem:[#allocation3 + $0x78] sm:$0xff] %v1659_v4  ;;  %v1660_v57 = vadd.f32 %v1628_v12, %v3475_v7  ;;  %v1629_v55 = vadd.f32 %v3513_v5, %v1585_v63  ;;  %v1586_v61 = vmul.f32 %v3515_v11, %v1542_v36  ;;  %v1444_v29 = vpop.f32.mrf.mxu0 }
 0x47b   : > { %v1543_v18 = vsel %vm1479_vm10, %v1439_v62, %v1511_v6  ;;  %vm1480_vm11 = vcmp.ge.f32.partialorder %v1441_v45, 0.0  ;;  %v1512_v38 = vmul.f32 0.2, %v1441_v45  ;;  %v1445_v19 = vadd.f32 %v1444_v29, %v3503_v34 }
 0x47c   : > { %1692 = vst [vmem:[#allocation3 + $0x50] sm:$0xff] %v1660_v57  ;;  %v1661_v9 = vadd.f32 %v1629_v55, %v3426_v40  ;;  %v1630_v22 = vadd.f32 %v3519_v16, %v1586_v61  ;;  %v1587_v23 = vmul.f32 %v3510_v54, %v1543_v18  ;;  %v1446_v26 = vpop.f32.mrf.mxu0 }
 0x47d   : > { %v1544_v0 = vsel %vm1480_vm11, %v1441_v45, %v1512_v38  ;;  %vm1481_vm12 = vcmp.ge.f32.partialorder %v1445_v19, 0.0  ;;  %v1513_v7 = vmul.f32 0.2, %v1445_v19  ;;  %v1447_v39 = vadd.f32 %v1446_v26, %v3506_v46 }
 0x47e   : > { %1693 = vst [vmem:[#allocation3 + $0xc0] sm:$0xff] %v1661_v9  ;;  %v1662_v44 = vadd.f32 %v1630_v22, %v3477_v8  ;;  %v1631_v43 = vadd.f32 %v3513_v5, %v1587_v23  ;;  %v1588_v14 = vmul.f32 %v3515_v11, %v1544_v0  ;;  %v1448_v51 = vpop.f32.mrf.mxu0 }
 0x47f   : > { %v1545_v58 = vsel %vm1481_vm12, %v1445_v19, %v1513_v7  ;;  %vm1482_vm13 = vcmp.ge.f32.partialorder %v1447_v39, 0.0  ;;  %v1514_v40 = vmul.f32 0.2, %v1447_v39  ;;  %v1449_v31 = vadd.f32 %v1448_v51, %v3503_v34 }
 0x480   : > { %1694 = vst [vmem:[#allocation3 + $0x48] sm:$0xff] %v1662_v44  ;;  %v1663_v47 = vadd.f32 %v1631_v43, %v3994_v48  ;;  %v1632_v42 = vadd.f32 %v3519_v16, %v1588_v14  ;;  %v1589_v10 = vmul.f32 %v3510_v54, %v1545_v58  ;;  %v1450_v13 = vpop.f32.mrf.mxu0 }
 0x481   : > { %v1546_v41 = vsel %vm1482_vm13, %v1447_v39, %v1514_v40  ;;  %vm1483_vm14 = vcmp.ge.f32.partialorder %v1449_v31, 0.0  ;;  %v1515_v8 = vmul.f32 0.2, %v1449_v31  ;;  %v1451_v1 = vadd.f32 %v1450_v13, %v3506_v46  ;;  %v3997_v46 = vld [vmem:[#allocation11_spill] sm:$0xff] }
 0x482   : > { %1695 = vst [vmem:[#allocation3 + $0xe8] sm:$0xff] %v1663_v47  ;;  %v1664_v20 = vadd.f32 %v1632_v42, %v3995_v24  ;;  %v1633_v15 = vadd.f32 %v3513_v5, %v1589_v10  ;;  %v1590_v34 = vmul.f32 %v3515_v11, %v1546_v41 }
 0x483   : > { %v1547_v17 = vsel %vm1483_vm14, %v1449_v31, %v1515_v8  ;;  %vm1484_vm15 = vcmp.ge.f32.partialorder %v1451_v1, 0.0  ;;  %v1516_v25 = vmul.f32 0.2, %v1451_v1 }
 0x484   : > { %1696 = vst [vmem:[#allocation3 + $0xf8] sm:$0xff] %v1664_v20  ;;  %v1665_v32 = vadd.f32 %v1633_v15, %v3996_v27  ;;  %v1634_v30 = vadd.f32 %v3519_v16, %v1590_v34  ;;  %v1591_v59 = vmul.f32 %v3510_v54, %v1547_v17 }
 0x485   : > { %v1548_v33 = vsel %vm1484_vm15, %v1451_v1, %v1516_v25 }
 0x486   : > { %1697 = vst [vmem:[#allocation3 + $0x10] sm:$0xff] %v1665_v32  ;;  %v1666_v56 = vadd.f32 %v1634_v30, %v3997_v46  ;;  %v1635_v35 = vadd.f32 %v3513_v5, %v1591_v59  ;;  %v1592_v49 = vmul.f32 %v3515_v11, %v1548_v33 }
 0x488   : > { %1698 = vst [vmem:[#allocation3 + $0x40] sm:$0xff] %v1666_v56  ;;  %v1667_v3 = vadd.f32 %v1635_v35, %v3998_v2  ;;  %v1636_v52 = vadd.f32 %v3519_v16, %v1592_v49 }
 0x48a   : > { %1699 = vst [vmem:[#allocation3 + $0xf0] sm:$0xff] %v1667_v3  ;;  %v1668_v53 = vadd.f32 %v1636_v52, %v3999_v28 }
 0x48c   : > { %1700 = vst [vmem:[#allocation3 + $0x38] sm:$0xff] %v1668_v53 }
 0x48d PF: > { %p2638_p8 = scmp.ne.s32.totalorder %s3201_s22, 4 }
 0x48f   : > { %1704 = sbr.rel (%p2638_p8) target bundleno = 2063 (0x80f), region = 94 }
 0x494   : > { %v3060_v54 = vld [vmem:[%s3212_s28 + $0x38] sm:$0xff]   ;;  %v3061_v5 = vld [vmem:[%s3212_s28 + $0x30] sm:$0xff]   ;;  %v3062_v11 = vld [vmem:[%s3212_s28 + $0x28] sm:$0xff]  }
 0x495   : > { %2946 = vmatprep.subr.bf16.mxu1 %v3060_v54  ;;  %v3063_v16 = vld [vmem:[%s3212_s28 + $0x20] sm:$0xff]   ;;  %v1721_v60 = vld [vmem:[#allocation3 + $0x68] sm:$0xff]  ;;  %v3064_v62 = vld [vmem:[%s3212_s28 + $0x18] sm:$0xff]  }
 0x496   : > { %2947 = vmatpush3.bf16.msra.mxu1 %v3060_v54  ;;  %v1723_v21 = vld [vmem:[#allocation3] sm:$0xff]  ;;  %v3065_v4 = vld [vmem:[%s3212_s28 + $0x10] sm:$0xff]   ;;  %v3066_v12 = vld [vmem:[%s3212_s28 + $0x8] sm:$0xff]   ;;  %v3159_v54 = vmov 0  }
 0x497   : > { %2948 = vmatprep.subr.bf16.mxu1 %v3061_v5  ;;  %v1753_v37 = vpack.c.bf16 %v1723_v21, %v1721_v60  ;;  %v3067_v63 = vld [vmem:[%s3212_s28] sm:$0xff]   ;;  %v1725_v50 = vld [vmem:[#allocation3 + $0xb8] sm:$0xff]  ;;  %v1727_v36 = vld [vmem:[#allocation3 + $0x30] sm:$0xff]  ;;  %2200 = vmatprep.mubr.bf16.mxu0 %v3159_v54 }
 0x498   : > { %v3068_v6 = vld [vmem:[%s3212_s28 + $0x78] sm:$0xff]   ;;  %v1729_v45 = vld [vmem:[#allocation3 + $0xa0] sm:$0xff]  ;;  %v1731_v57 = vld [vmem:[#allocation3 + $0xd0] sm:$0xff]  ;;  %v1754_v55 = vpack.c.bf16 %v1727_v36, %v1725_v50 }
 0x499   : > { %2962 = vmatprep.mubr.bf16.mxu1 %v1753_v37  ;;  %v1755_v61 = vpack.c.bf16 %v1731_v57, %v1729_v45  ;;  %v3069_v29 = vld [vmem:[%s3212_s28 + $0x70] sm:$0xff]   ;;  %v1733_v18 = vld [vmem:[#allocation3 + $0x60] sm:$0xff]  ;;  %v3070_v19 = vld [vmem:[%s3212_s28 + $0x68] sm:$0xff]  }
 0x49a   : > { %2949 = vmatpush3.bf16.msra.mxu1 %v3061_v5  ;;  %v1735_v38 = vld [vmem:[#allocation3 + $0x90] sm:$0xff]  ;;  %v1737_v9 = vld [vmem:[#allocation3 + $0x8] sm:$0xff]  ;;  %v1739_v22 = vld [vmem:[#allocation3 + $0x18] sm:$0xff] }
 0x49b   : > { %2950 = vmatprep.subr.bf16.mxu1 %v3062_v11  ;;  %v1756_v23 = vpack.c.bf16 %v1735_v38, %v1733_v18  ;;  %v1757_v26 = vpack.c.bf16 %v1739_v22, %v1737_v9  ;;  %v3071_v0 = vld [vmem:[%s3212_s28 + $0x60] sm:$0xff]   ;;  %v1741_v7 = vld [vmem:[#allocation3 + $0xd8] sm:$0xff]  ;;  %v1747_v14 = vld [vmem:[#allocation3 + $0xe8] sm:$0xff] }
 0x49c   : > { %v1743_v39 = vld [vmem:[#allocation3 + $0x78] sm:$0xff]  ;;  %v1745_v43 = vld [vmem:[#allocation3 + $0xc0] sm:$0xff]  ;;  %v3073_v40 = vld [vmem:[%s3212_s28 + $0x50] sm:$0xff]  }
 0x49d   : > { %v3072_v44 = vld [vmem:[%s3212_s28 + $0x58] sm:$0xff]   ;;  %v1758_v51 = vpack.c.bf16 %v1743_v39, %v1741_v7  ;;  %v1759_v58 = vpack.c.bf16 %v1747_v14, %v1745_v43  ;;  %v1749_v31 = vld [vmem:[#allocation3 + $0x10] sm:$0xff]  ;;  %v3074_v47 = vld [vmem:[%s3212_s28 + $0x48] sm:$0xff]  }
 0x49e   : > { %2951 = vmatpush3.bf16.msra.mxu1 %v3062_v11  ;;  %v1751_v48 = vld [vmem:[#allocation3 + $0xf0] sm:$0xff]  ;;  %v3075_v8 = vld [vmem:[%s3212_s28 + $0x40] sm:$0xff]   ;;  %v1728_v24 = vld [vmem:[#allocation3 + $0x98] sm:$0xff] }
 0x49f   : > { %2952 = vmatprep.subr.bf16.mxu1 %v3063_v16  ;;  %v1722_v42 = vld [vmem:[#allocation3 + $0x70] sm:$0xff]  ;;  %v1760_v13 = vpack.c.bf16 %v1751_v48, %v1749_v31  ;;  %v1726_v1 = vld [vmem:[#allocation3 + $0x80] sm:$0xff]  ;;  %v1730_v20 = vld [vmem:[#allocation3 + $0xc8] sm:$0xff] }
 0x4a0   : > { %v1724_v10 = vld [vmem:[#allocation3 + $0xb0] sm:$0xff]  ;;  %v1732_v15 = vld [vmem:[#allocation3 + $0x28] sm:$0xff]  ;;  %v1923_v34 = vpack.c.bf16 %v1728_v24, %v1726_v1  ;;  %v1734_v25 = vld [vmem:[#allocation3 + $0xe0] sm:$0xff] }
 0x4a1   : > { %v1922_v41 = vpack.c.bf16 %v1724_v10, %v1722_v42  ;;  %v1924_v17 = vpack.c.bf16 %v1732_v15, %v1730_v20  ;;  %v1736_v27 = vld [vmem:[#allocation3 + $0x88] sm:$0xff]  ;;  %v1738_v32 = vld [vmem:[#allocation3 + $0x58] sm:$0xff]  ;;  %v1742_v46 = vld [vmem:[#allocation3 + $0x20] sm:$0xff] }
 0x4a2   : > { %2953 = vmatpush3.bf16.msra.mxu1 %v3063_v16  ;;  %v1740_v30 = vld [vmem:[#allocation3 + $0xa8] sm:$0xff]  ;;  %v1925_v59 = vpack.c.bf16 %v1736_v27, %v1734_v25  ;;  %v1744_v56 = vld [vmem:[#allocation3 + $0x50] sm:$0xff]  ;;  %v1748_v49 = vld [vmem:[#allocation3 + $0xf8] sm:$0xff] }
 0x4a3   : > { %2954 = vmatprep.subr.bf16.mxu1 %v3064_v62  ;;  %v1926_v33 = vpack.c.bf16 %v1740_v30, %v1738_v32  ;;  %v1746_v35 = vld [vmem:[#allocation3 + $0x48] sm:$0xff]  ;;  %v1927_v2 = vpack.c.bf16 %v1744_v56, %v1742_v46  ;;  %v1750_v52 = vld [vmem:[#allocation3 + $0x40] sm:$0xff]  ;;  %v1752_v28 = vld [vmem:[#allocation3 + $0x38] sm:$0xff] }
 0x4a4   : > { %v1928_v3 = vpack.c.bf16 %v1748_v49, %v1746_v35  ;;  %v1929_v53 = vpack.c.bf16 %v1752_v28, %v1750_v52  ;;  %v3076_v25 = vld [vmem:[#allocation2] sm:$0xff]   ;;  %v3077_v27 = vld [vmem:[#allocation2 + $0x8] sm:$0xff]   ;;  %v3078_v32 = vld [vmem:[#allocation2 + $0x10] sm:$0xff]   ;;  %v2110_v35 = vlaneseq }
 0x4a5   : > { %v3079_v30 = vld [vmem:[#allocation2 + $0x18] sm:$0xff]   ;;  %v3082_v46 = vld [vmem:[#allocation2 + $0x30] sm:$0xff]  }
 0x4a6   : > { %2955 = vmatpush3.bf16.msra.mxu1 %v3064_v62  ;;  %v3083_v56 = vld [vmem:[#allocation2 + $0x38] sm:$0xff]   ;;  %v2111_v49 = vshrl.u32 %v2110_v35, 7 }
 0x4a7   : > { %2956 = vmatprep.subr.bf16.mxu1 %v3065_v4 }
 0x4a8   : > { %v2116_v52 = vsub.s32 1, %v2111_v49 }
 0x4aa   : > { %2957 = vmatpush3.bf16.msra.mxu1 %v3065_v4 }
 0x4ab   : > { %2958 = vmatprep.subr.bf16.mxu1 %v3066_v12 }
 0x4ae   : > { %2959 = vmatpush3.bf16.msra.mxu1 %v3066_v12 }
 0x4af   : > { %2960 = vmatprep.subr.bf16.mxu1 %v3067_v63 }
 0x4b2   : > { %2961 = vmatpush3.bf16.msra.mxu1 %v3067_v63 }
 0x4b3   : > { %2978 = vmatprep.subr.bf16.mxu1 %v3068_v6 }
 0x4b5   : > { %2963 = vmatmul.mubr.bf16.vlgmr.msra.gmra.mxu1 %v1754_v55 }
 0x4b6   : > { %2979 = vmatpush3.bf16.msra.mxu1 %v3068_v6  ;;  %2966 = vmatprep.mubr.bf16.mxu1 %v1755_v61 }
 0x4b7   : > { %2980 = vmatprep.subr.bf16.mxu1 %v3069_v29 }
 0x4ba   : > { %2981 = vmatpush3.bf16.msra.mxu1 %v3069_v29 }
 0x4bb   : > { %2982 = vmatprep.subr.bf16.mxu1 %v3070_v19 }
 0x4bd   : > { %2967 = vmatmul.mubr.bf16.gmra.mxu1 %v1756_v23 }
 0x4be   : > { %2983 = vmatpush3.bf16.msra.mxu1 %v3070_v19  ;;  %2970 = vmatprep.mubr.bf16.mxu1 %v1757_v26 }
 0x4bf   : > { %2984 = vmatprep.subr.bf16.mxu1 %v3071_v0 }
 0x4c2   : > { %2985 = vmatpush3.bf16.msra.mxu1 %v3071_v0 }
 0x4c3   : > { %2986 = vmatprep.subr.bf16.mxu1 %v3072_v44 }
 0x4c5   : > { %2971 = vmatmul.mubr.bf16.gmra.mxu1 %v1758_v51 }
 0x4c6   : > { %2987 = vmatpush3.bf16.msra.mxu1 %v3072_v44  ;;  %2974 = vmatprep.mubr.bf16.mxu1 %v1759_v58 }
 0x4c7   : > { %2988 = vmatprep.subr.bf16.mxu1 %v3073_v40 }
 0x4ca   : > { %2989 = vmatpush3.bf16.msra.mxu1 %v3073_v40 }
 0x4cb   : > { %2990 = vmatprep.subr.bf16.mxu1 %v3074_v47 }
 0x4cd   : > { %2975 = vmatmul.mubr.bf16.gmra.mxu1 %v1760_v13 }
 0x4ce   : > { %2991 = vmatpush3.bf16.msra.mxu1 %v3074_v47  ;;  %2994 = vmatprep.mubr.bf16.mxu1 %v1922_v41 }
 0x4cf   : > { %2992 = vmatprep.subr.bf16.mxu1 %v3075_v8 }
 0x4d2   : > { %2993 = vmatpush3.bf16.msra.mxu1 %v3075_v8 }
 0x4d5   : > { %2995 = vmatmul.mubr.bf16.vlgmr.msra.gmra.mxu1 %v1923_v34 }
 0x4d6   : > { %2998 = vmatprep.mubr.bf16.mxu1 %v1924_v17 }
 0x4dd   : > { %2999 = vmatmul.mubr.bf16.gmra.mxu1 %v1925_v59  ;;  %v3080_v59 = vld [vmem:[#allocation2 + $0x20] sm:$0xff]  }
 0x4de   : > { %3002 = vmatprep.mubr.bf16.mxu1 %v1926_v33  ;;  %v3081_v33 = vld [vmem:[#allocation2 + $0x28] sm:$0xff]  }
 0x4e5   : > { %3003 = vmatmul.mubr.bf16.gmra.mxu1 %v1927_v2  ;;  %v2112_v2 = vsub.s32 0, %v2111_v49 }
 0x4e6   : > { %3006 = vmatprep.mubr.bf16.mxu1 %v1928_v3  ;;  %v2108_v3 = vld [vmem:[%s3217_s7] sm:$0x3] }
 0x4e7   : > { %v3674_v28 = vrot.slane %v2108_v3, %v2112_v2 }
 0x4ed   : > { %3007 = vmatmul.mubr.bf16.gmra.mxu1 %v1929_v53  ;;  %v3676_v53 = vand.u32 127, %v2110_v35 }
 0x4ef   : > { %vm2283_vm0 = vcmp.lt.s32.totalorder %v3676_v53, 10 }
 0x575   : > { %v2964_v5 = vpop.f32.mrf.mxu1 }
 0x577   : > { %v3663_v11 = vpop.f32.mrf.mxu1 }
 0x579   : > { %v2965_v16 = vpop.f32.mrf.mxu1 }
 0x57a   : > { %v2094_v60 = vpack.c.bf16 %v2965_v16, %v2964_v5  ;;  %v3678_v5 = vrot.slane %v2108_v3, %v2116_v52 }
 0x57b   : > { %v1862_v21 = vpop.f32.mrf.mxu1 }
 0x57c   : > { %v2092_v37 = vpack.c.bf16 %v1862_v21, %v3663_v11 }
 0x57d   : > { %v2968_v62 = vpop.f32.mrf.mxu1 }
 0x57f   : > { %v1875_v4 = vpop.f32.mrf.mxu1 }
 0x581   : > { %v2969_v12 = vpop.f32.mrf.mxu1 }
 0x582   : > { %v2098_v63 = vpack.c.bf16 %v2969_v12, %v2968_v62 }
 0x583   : > { %v1878_v50 = vpop.f32.mrf.mxu1 }
 0x584   : > { %v2096_v36 = vpack.c.bf16 %v1878_v50, %v1875_v4 }
 0x585   : > { %v2972_v6 = vpop.f32.mrf.mxu1 }
 0x587   : > { %v1891_v45 = vpop.f32.mrf.mxu1 }
 0x589   : > { %v2973_v57 = vpop.f32.mrf.mxu1 }
 0x58a   : > { %v2102_v8 = vpack.c.bf16 %v2973_v57, %v2972_v6 }
 0x58b   : > { %v1894_v55 = vpop.f32.mrf.mxu1 }
 0x58c   : > { %v2100_v24 = vpack.c.bf16 %v1894_v55, %v1891_v45 }
 0x58d   : > { %v2976_v61 = vpop.f32.mrf.mxu1 }
 0x58f   : > { %v1907_v29 = vpop.f32.mrf.mxu1 }
 0x591   : > { %v2977_v18 = vpop.f32.mrf.mxu1 }
 0x592   : > { %v2106_v47 = vpack.c.bf16 %v2977_v18, %v2976_v61 }
 0x593   : > { %v1910_v38 = vpop.f32.mrf.mxu1 }
 0x594   : > { %v2104_v13 = vpack.c.bf16 %v1910_v38, %v1907_v29 }
 0x595   : > { %v2996_v19 = vpop.f32.mrf.mxu1 }
 0x597   : > { %v2029_v9 = vpop.f32.mrf.mxu1 }
 0x599   : > { %v2997_v22 = vpop.f32.mrf.mxu1 }
 0x59a   : > { %v2095_v34 = vpack.c.bf16 %v2997_v22, %v2996_v19 }
 0x59b   : > { %v2032_v23 = vpop.f32.mrf.mxu1 }
 0x59c   : > { %v2093_v17 = vpack.c.bf16 %v2032_v23, %v2029_v9 }
 0x59d   : > { %v3000_v26 = vpop.f32.mrf.mxu1 }
 0x59f   : > { %v2045_v0 = vpop.f32.mrf.mxu1 }
 0x5a1   : > { %v3001_v7 = vpop.f32.mrf.mxu1 }
 0x5a2   : > { %v2099_v20 = vpack.c.bf16 %v3001_v7, %v3000_v26 }
 0x5a3   : > { %v2048_v39 = vpop.f32.mrf.mxu1 }
 0x5a4   : > { %v2097_v15 = vpack.c.bf16 %v2048_v39, %v2045_v0 }
 0x5a5   : > { %v3004_v44 = vpop.f32.mrf.mxu1 }
 0x5a7   : > { %v2061_v43 = vpop.f32.mrf.mxu1 }
 0x5a9   : > { %v3005_v14 = vpop.f32.mrf.mxu1 }
 0x5aa   : > { %v2103_v41 = vpack.c.bf16 %v3005_v14, %v3004_v44 }
 0x5ab   : > { %v2064_v51 = vpop.f32.mrf.mxu1 }
 0x5ac   : > { %v2101_v1 = vpack.c.bf16 %v2064_v51, %v2061_v43 }
 0x5ad   : > { %v3008_v58 = vpop.f32.mrf.mxu1 }
 0x5af   : > { %v2077_v40 = vpop.f32.mrf.mxu1 }
 0x5b1   : > { %v3009_v31 = vpop.f32.mrf.mxu1 }
 0x5b2   : > { %v2107_v48 = vpack.c.bf16 %v3009_v31, %v3008_v58 }
 0x5b3   : > { %v2080_v42 = vpop.f32.mrf.mxu1 }
 0x5b4   : > { %v2105_v10 = vpack.c.bf16 %v2080_v42, %v2077_v40  ;;  %2168 = vmatprep.subr.bf16.mxu0 %v2107_v48 }
 0x5b5   : > { %2169 = vmatpush1.bf16.msra.mxu0 %v2106_v47 }
 0x5b6   : > { %2170 = vmatprep.subr.bf16.mxu0 %v2105_v10 }
 0x5b9   : > { %2171 = vmatpush1.bf16.msra.mxu0 %v2104_v13 }
 0x5ba   : > { %2172 = vmatprep.subr.bf16.mxu0 %v2103_v41 }
 0x5bd   : > { %2173 = vmatpush1.bf16.msra.mxu0 %v2102_v8 }
 0x5be   : > { %2174 = vmatprep.subr.bf16.mxu0 %v2101_v1 }
 0x5c1   : > { %2175 = vmatpush1.bf16.msra.mxu0 %v2100_v24 }
 0x5c2   : > { %2176 = vmatprep.subr.bf16.mxu0 %v2099_v20 }
 0x5c5   : > { %2177 = vmatpush1.bf16.msra.mxu0 %v2098_v63 }
 0x5c6   : > { %2178 = vmatprep.subr.bf16.mxu0 %v2097_v15 }
 0x5c9   : > { %2179 = vmatpush1.bf16.msra.mxu0 %v2096_v36 }
 0x5ca   : > { %2180 = vmatprep.subr.bf16.mxu0 %v2095_v34 }
 0x5cd   : > { %2181 = vmatpush1.bf16.msra.mxu0 %v2094_v60 }
 0x5ce   : > { %2182 = vmatprep.subr.bf16.mxu0 %v2093_v17 }
 0x5d1   : > { %2183 = vmatpush1.bf16.msra.mxu0 %v2092_v37 }
 0x5d4   : > { %2201 = vmatmul.mubr.bf16.vlgmr.msra.gmra.mxu0 %v3076_v25 }
 0x5d5   : > { %2210 = vmatprep.mubr.bf16.mxu0 %v3159_v54 }
 0x5dc   : > { %2211 = vmatmul.mubr.bf16.gmra.mxu0 %v3077_v27 }
 0x5dd   : > { %2220 = vmatprep.mubr.bf16.mxu0 %v3159_v54 }
 0x5e4   : > { %2221 = vmatmul.mubr.bf16.gmra.mxu0 %v3078_v32 }
 0x5e5   : > { %2230 = vmatprep.mubr.bf16.mxu0 %v3159_v54 }
 0x5ec   : > { %2231 = vmatmul.mubr.bf16.gmra.mxu0 %v3079_v30 }
 0x5ed   : > { %2240 = vmatprep.mubr.bf16.mxu0 %v3159_v54 }
 0x5f4   : > { %2241 = vmatmul.mubr.bf16.gmra.mxu0 %v3080_v59 }
 0x5f5   : > { %2250 = vmatprep.mubr.bf16.mxu0 %v3159_v54 }
 0x5fc   : > { %2251 = vmatmul.mubr.bf16.gmra.mxu0 %v3081_v33 }
 0x5fd   : > { %2260 = vmatprep.mubr.bf16.mxu0 %v3159_v54 }
 0x604   : > { %2261 = vmatmul.mubr.bf16.gmra.mxu0 %v3082_v46 }
 0x605   : > { %2270 = vmatprep.mubr.bf16.mxu0 %v3159_v54 }
 0x60c   : > { %2271 = vmatmul.mubr.bf16.gmra.mxu0 %v3083_v56 }
 0x694   : > { %v2202_v11 = vpop.f32.mrf.mxu0 }
 0x695   : > { %v2203_v16 = vadd.f32 %v2202_v11, %v3674_v28 }
 0x696   : > { %v2204_v60 = vpop.f32.mrf.mxu0 }
 0x697   : > { %2460 = vst [vmem:[%s3978_s6] sm:$0xff] %v2203_v16  ;;  %v2205_v54 = vadd.f32 %v2204_v60, %v3678_v5 }
 0x698   : > { %v2206_v21 = vpop.f32.mrf.mxu0 }
 0x699   : > { %v2207_v37 = vadd.f32 %v2206_v21, %v3674_v28  ;;  %v3689_v62 = vsel %vm2283_vm0, %v2205_v54, -1e+30 }
 0x69a   : > { %v2208_v4 = vpop.f32.mrf.mxu0  ;;  %2300 = vmax.xlane.f32.xlu0 %v3689_v62 }
 0x69b   : > { %2462 = vst [vmem:[%s3978_s6 + $0x10] sm:$0xff] %v2207_v37  ;;  %v2209_v12 = vadd.f32 %v2208_v4, %v3678_v5 }
 0x69c   : > { %v2212_v63 = vpop.f32.mrf.mxu0 }
 0x69d   : > { %v2213_v50 = vadd.f32 %v2212_v63, %v3674_v28  ;;  %v3699_v36 = vsel %vm2283_vm0, %v2209_v12, -1e+30 }
 0x69e   : > { %v2214_v6 = vpop.f32.mrf.mxu0  ;;  %2302 = vmax.xlane.f32.xlu0 %v3699_v36 }
 0x69f   : > { %2464 = vst [vmem:[%s3978_s6 + $0x20] sm:$0xff] %v2213_v50  ;;  %v2215_v45 = vadd.f32 %v2214_v6, %v3678_v5 }
 0x6a0   : > { %v2216_v57 = vpop.f32.mrf.mxu0 }
 0x6a1   : > { %v2217_v55 = vadd.f32 %v2216_v57, %v3674_v28  ;;  %v3709_v61 = vsel %vm2283_vm0, %v2215_v45, -1e+30 }
 0x6a2   : > { %v2218_v29 = vpop.f32.mrf.mxu0  ;;  %2304 = vmax.xlane.f32.xlu1 %v3709_v61 }
 0x6a3   : > { %2466 = vst [vmem:[%s3978_s6 + $0x30] sm:$0xff] %v2217_v55  ;;  %v2219_v18 = vadd.f32 %v2218_v29, %v3678_v5 }
 0x6a4   : > { %v2222_v38 = vpop.f32.mrf.mxu0 }
 0x6a5   : > { %v2223_v19 = vadd.f32 %v2222_v38, %v3674_v28  ;;  %v3719_v9 = vsel %vm2283_vm0, %v2219_v18, -1e+30 }
 0x6a6   : > { %v2224_v22 = vpop.f32.mrf.mxu0  ;;  %2306 = vmax.xlane.f32.xlu1 %v3719_v9 }
 0x6a7   : > { %2468 = vst [vmem:[%s3978_s6 + $0x40] sm:$0xff] %v2223_v19  ;;  %v2225_v23 = vadd.f32 %v2224_v22, %v3678_v5 }
 0x6a8   : > { %v2226_v26 = vpop.f32.mrf.mxu0 }
 0x6a9   : > { %v2227_v0 = vadd.f32 %v2226_v26, %v3674_v28  ;;  %v3729_v7 = vsel %vm2283_vm0, %v2225_v23, -1e+30 }
 0x6aa   : > { %v2228_v39 = vpop.f32.mrf.mxu0  ;;  %2308 = vmax.xlane.f32.xlu0 %v3729_v7 }
 0x6ab   : > { %2470 = vst [vmem:[%s3978_s6 + $0x50] sm:$0xff] %v2227_v0  ;;  %v2229_v44 = vadd.f32 %v2228_v39, %v3678_v5 }
 0x6ac   : > { %v2232_v43 = vpop.f32.mrf.mxu0 }
 0x6ad   : > { %v2233_v14 = vadd.f32 %v2232_v43, %v3674_v28  ;;  %v3739_v51 = vsel %vm2283_vm0, %v2229_v44, -1e+30 }
 0x6ae   : > { %v2234_v58 = vpop.f32.mrf.mxu0  ;;  %2310 = vmax.xlane.f32.xlu1 %v3739_v51 }
 0x6af   : > { %2472 = vst [vmem:[%s3978_s6 + $0x60] sm:$0xff] %v2233_v14  ;;  %v2235_v40 = vadd.f32 %v2234_v58, %v3678_v5 }
 0x6b0   : > { %v2236_v31 = vpop.f32.mrf.mxu0 }
 0x6b1   : > { %v2237_v48 = vadd.f32 %v2236_v31, %v3674_v28  ;;  %v3749_v47 = vsel %vm2283_vm0, %v2235_v40, -1e+30 }
 0x6b2   : > { %v2238_v42 = vpop.f32.mrf.mxu0  ;;  %2312 = vmax.xlane.f32.xlu0 %v3749_v47 }
 0x6b3   : > { %2474 = vst [vmem:[%s3978_s6 + $0x70] sm:$0xff] %v2237_v48  ;;  %v2239_v10 = vadd.f32 %v2238_v42, %v3678_v5 }
 0x6b4   : > { %v2242_v13 = vpop.f32.mrf.mxu0 }
 0x6b5   : > { %v2243_v41 = vadd.f32 %v2242_v13, %v3674_v28  ;;  %v3759_v8 = vsel %vm2283_vm0, %v2239_v10, -1e+30 }
 0x6b6   : > { %v2244_v1 = vpop.f32.mrf.mxu0  ;;  %2314 = vmax.xlane.f32.xlu1 %v3759_v8 }
 0x6b7   : > { %2476 = vst [vmem:[%s3978_s6 + $0x80] sm:$0xff] %v2243_v41  ;;  %v2245_v24 = vadd.f32 %v2244_v1, %v3678_v5 }
 0x6b8   : > { %v2246_v20 = vpop.f32.mrf.mxu0 }
 0x6b9   : > { %v2247_v15 = vadd.f32 %v2246_v20, %v3674_v28  ;;  %v3769_v34 = vsel %vm2283_vm0, %v2245_v24, -1e+30 }
 0x6ba   : > { %v2248_v17 = vpop.f32.mrf.mxu0  ;;  %2316 = vmax.xlane.f32.xlu0 %v3769_v34 }
 0x6bb   : > { %2478 = vst [vmem:[%s3978_s6 + $0x90] sm:$0xff] %v2247_v15  ;;  %v2249_v25 = vadd.f32 %v2248_v17, %v3678_v5 }
 0x6bc   : > { %v2252_v27 = vpop.f32.mrf.mxu0 }
 0x6bd   : > { %v2253_v32 = vadd.f32 %v2252_v27, %v3674_v28  ;;  %v3779_v30 = vsel %vm2283_vm0, %v2249_v25, -1e+30 }
 0x6be   : > { %v2254_v59 = vpop.f32.mrf.mxu0  ;;  %2318 = vmax.xlane.f32.xlu1 %v3779_v30 }
 0x6bf   : > { %2480 = vst [vmem:[%s3978_s6 + $0xa0] sm:$0xff] %v2253_v32  ;;  %v2255_v33 = vadd.f32 %v2254_v59, %v3678_v5 }
 0x6c0   : > { %v2256_v46 = vpop.f32.mrf.mxu0 }
 0x6c1   : > { %v2257_v56 = vadd.f32 %v2256_v46, %v3674_v28  ;;  %v3789_v35 = vsel %vm2283_vm0, %v2255_v33, -1e+30 }
 0x6c2   : > { %v2258_v49 = vpop.f32.mrf.mxu0  ;;  %2320 = vmax.xlane.f32.xlu0 %v3789_v35 }
 0x6c3   : > { %2482 = vst [vmem:[%s3978_s6 + $0xb0] sm:$0xff] %v2257_v56  ;;  %v2259_v2 = vadd.f32 %v2258_v49, %v3678_v5 }
 0x6c4   : > { %v2262_v3 = vpop.f32.mrf.mxu0 }
 0x6c5   : > { %v2263_v52 = vadd.f32 %v2262_v3, %v3674_v28  ;;  %v3799_v11 = vsel %vm2283_vm0, %v2259_v2, -1e+30 }
 0x6c6   : > { %v2264_v16 = vpop.f32.mrf.mxu0  ;;  %2322 = vmax.xlane.f32.xlu1 %v3799_v11 }
 0x6c7   : > { %2484 = vst [vmem:[%s3978_s6 + $0xc0] sm:$0xff] %v2263_v52  ;;  %v2265_v60 = vadd.f32 %v2264_v16, %v3678_v5 }
 0x6c8   : > { %v2266_v54 = vpop.f32.mrf.mxu0 }
 0x6c9   : > { %v2267_v21 = vadd.f32 %v2266_v54, %v3674_v28  ;;  %v3809_v37 = vsel %vm2283_vm0, %v2265_v60, -1e+30 }
 0x6ca   : > { %v2268_v4 = vpop.f32.mrf.mxu0  ;;  %2324 = vmax.xlane.f32.xlu0 %v3809_v37 }
 0x6cb   : > { %2486 = vst [vmem:[%s3978_s6 + $0xd0] sm:$0xff] %v2267_v21  ;;  %v2269_v12 = vadd.f32 %v2268_v4, %v3678_v5 }
 0x6cc   : > { %v2272_v63 = vpop.f32.mrf.mxu0 }
 0x6cd   : > { %v2273_v50 = vadd.f32 %v2272_v63, %v3674_v28  ;;  %v3819_v6 = vsel %vm2283_vm0, %v2269_v12, -1e+30 }
 0x6ce   : > { %v2274_v45 = vpop.f32.mrf.mxu0  ;;  %2326 = vmax.xlane.f32.xlu1 %v3819_v6 }
 0x6cf   : > { %2488 = vst [vmem:[%s3978_s6 + $0xe0] sm:$0xff] %v2273_v50  ;;  %v2275_v57 = vadd.f32 %v2274_v45, %v3678_v5 }
 0x6d0   : > { %v2276_v55 = vpop.f32.mrf.mxu0 }
 0x6d1   : > { %v2277_v29 = vadd.f32 %v2276_v55, %v3674_v28  ;;  %v3829_v18 = vsel %vm2283_vm0, %v2275_v57, -1e+30 }
 0x6d2   : > { %v2278_v38 = vpop.f32.mrf.mxu0  ;;  %2328 = vmax.xlane.f32.xlu0 %v3829_v18 }
 0x6d3   : > { %2490 = vst [vmem:[%s3978_s6 + $0xf0] sm:$0xff] %v2277_v29  ;;  %v2279_v19 = vadd.f32 %v2278_v38, %v3678_v5 }
 0x6d5   : > { %v3838_v22 = vsel %vm2283_vm0, %v2279_v19, -1e+30 }
 0x6d6   : > { %2330 = vmax.xlane.f32.xlu1 %v3838_v22 }
 0x723   : > { %v2301_v28 = vpop.xlane.xlu0 %2300 }
 0x724   : > { %v3842_v23 = vsub.f32 %v3689_v62, %v2301_v28 }
 0x726   : > { %v2348_v26 = vmul.f32 1.442695, %v3842_v23 }
 0x727   : > { %v2303_v0 = vpop.xlane.xlu0 %2302 }
 0x728   : > { %3084 = vpow2.f32 %v2348_v26  ;;  %v3846_v39 = vsub.f32 %v3699_v36, %v2303_v0 }
 0x72a   : > { %v2350_v44 = vmul.f32 1.442695, %v3846_v39 }
 0x72b   : > { %v2305_v5 = vpop.xlane.xlu1 %2304 }
 0x72c   : > { %3086 = vpow2.f32 %v2350_v44  ;;  %v3850_v53 = vsub.f32 %v3709_v61, %v2305_v5 }
 0x72e   : > { %v2352_v43 = vmul.f32 1.442695, %v3850_v53 }
 0x72f   : > { %v2307_v14 = vpop.xlane.xlu1 %2306 }
 0x730   : > { %3088 = vpow2.f32 %v2352_v43  ;;  %v3854_v62 = vsub.f32 %v3719_v9, %v2307_v14 }
 0x732   : > { %v2354_v58 = vmul.f32 1.442695, %v3854_v62 }
 0x733   : > { %v2309_v40 = vpop.xlane.xlu0 %2308 }
 0x734   : > { %3090 = vpow2.f32 %v2354_v58  ;;  %v3858_v36 = vsub.f32 %v3729_v7, %v2309_v40 }
 0x735   : > { %v3085_v31 = vpop.eup %3084 }
 0x736   : > { %v2356_v48 = vmul.f32 1.442695, %v3858_v36  ;;  %2380 = vadd.xlane.f32.xlu0 %v3085_v31 }
 0x737   : > { %v2311_v61 = vpop.xlane.xlu1 %2310 }
 0x738   : > { %3092 = vpow2.f32 %v2356_v48  ;;  %v3862_v42 = vsub.f32 %v3739_v51, %v2311_v61 }
 0x739   : > { %v3087_v10 = vpop.eup %3086 }
 0x73a   : > { %v2358_v9 = vmul.f32 1.442695, %v3862_v42  ;;  %2382 = vadd.xlane.f32.xlu1 %v3087_v10 }
 0x73b   : > { %v2313_v13 = vpop.xlane.xlu0 %2312 }
 0x73c   : > { %3094 = vpow2.f32 %v2358_v9  ;;  %v3866_v41 = vsub.f32 %v3749_v47, %v2313_v13 }
 0x73d   : > { %v3089_v7 = vpop.eup %3088 }
 0x73e   : > { %v2360_v1 = vmul.f32 1.442695, %v3866_v41  ;;  %2384 = vadd.xlane.f32.xlu0 %v3089_v7 }
 0x73f   : > { %v2315_v24 = vpop.xlane.xlu1 %2314 }
 0x740   : > { %3096 = vpow2.f32 %v2360_v1  ;;  %v3870_v20 = vsub.f32 %v3759_v8, %v2315_v24 }
 0x741   : > { %v3091_v51 = vpop.eup %3090 }
 0x742   : > { %v2362_v15 = vmul.f32 1.442695, %v3870_v20  ;;  %2386 = vadd.xlane.f32.xlu1 %v3091_v51 }
 0x743   : > { %v2317_v17 = vpop.xlane.xlu0 %2316 }
 0x744   : > { %3098 = vpow2.f32 %v2362_v15  ;;  %v3874_v25 = vsub.f32 %v3769_v34, %v2317_v17 }
 0x745   : > { %v3093_v47 = vpop.eup %3092 }
 0x746   : > { %v2364_v27 = vmul.f32 1.442695, %v3874_v25  ;;  %2388 = vadd.xlane.f32.xlu0 %v3093_v47 }
 0x747   : > { %v2319_v32 = vpop.xlane.xlu1 %2318 }
 0x748   : > { %3100 = vpow2.f32 %v2364_v27  ;;  %v3878_v59 = vsub.f32 %v3779_v30, %v2319_v32 }
 0x749   : > { %v3095_v8 = vpop.eup %3094 }
 0x74a   : > { %v2366_v33 = vmul.f32 1.442695, %v3878_v59  ;;  %2390 = vadd.xlane.f32.xlu1 %v3095_v8 }
 0x74b   : > { %v2321_v46 = vpop.xlane.xlu0 %2320 }
 0x74c   : > { %3102 = vpow2.f32 %v2366_v33  ;;  %v3882_v56 = vsub.f32 %v3789_v35, %v2321_v46 }
 0x74d   : > { %v3097_v34 = vpop.eup %3096 }
 0x74e   : > { %v2368_v49 = vmul.f32 1.442695, %v3882_v56  ;;  %2392 = vadd.xlane.f32.xlu0 %v3097_v34 }
 0x74f   : > { %v2323_v2 = vpop.xlane.xlu1 %2322 }
 0x750   : > { %3104 = vpow2.f32 %v2368_v49  ;;  %v3886_v3 = vsub.f32 %v3799_v11, %v2323_v2 }
 0x751   : > { %v3099_v30 = vpop.eup %3098 }
 0x752   : > { %v2370_v52 = vmul.f32 1.442695, %v3886_v3  ;;  %2394 = vadd.xlane.f32.xlu1 %v3099_v30 }
 0x753   : > { %v2325_v16 = vpop.xlane.xlu0 %2324 }
 0x754   : > { %3106 = vpow2.f32 %v2370_v52  ;;  %v3890_v60 = vsub.f32 %v3809_v37, %v2325_v16 }
 0x755   : > { %v3101_v35 = vpop.eup %3100 }
 0x756   : > { %v2372_v54 = vmul.f32 1.442695, %v3890_v60  ;;  %2396 = vadd.xlane.f32.xlu0 %v3101_v35 }
 0x757   : > { %v2327_v21 = vpop.xlane.xlu1 %2326 }
 0x758   : > { %3108 = vpow2.f32 %v2372_v54  ;;  %v3894_v4 = vsub.f32 %v3819_v6, %v2327_v21 }
 0x759   : > { %v3103_v11 = vpop.eup %3102 }
 0x75a   : > { %v2374_v12 = vmul.f32 1.442695, %v3894_v4  ;;  %2398 = vadd.xlane.f32.xlu1 %v3103_v11 }
 0x75b   : > { %v2329_v63 = vpop.xlane.xlu0 %2328 }
 0x75c   : > { %3110 = vpow2.f32 %v2374_v12  ;;  %v3898_v50 = vsub.f32 %v3829_v18, %v2329_v63 }
 0x75d   : > { %v3105_v37 = vpop.eup %3104 }
 0x75e   : > { %v2376_v45 = vmul.f32 1.442695, %v3898_v50  ;;  %2400 = vadd.xlane.f32.xlu0 %v3105_v37 }
 0x75f   : > { %v2331_v57 = vpop.xlane.xlu1 %2330 }
 0x760   : > { %3112 = vpow2.f32 %v2376_v45  ;;  %v3902_v55 = vsub.f32 %v3838_v22, %v2331_v57 }
 0x761   : > { %v3107_v6 = vpop.eup %3106 }
 0x762   : > { %v2378_v29 = vmul.f32 1.442695, %v3902_v55  ;;  %2402 = vadd.xlane.f32.xlu1 %v3107_v6 }
 0x764   : > { %3114 = vpow2.f32 %v2378_v29 }
 0x765   : > { %v3109_v38 = vpop.eup %3108 }
 0x766   : > { %2404 = vadd.xlane.f32.xlu0 %v3109_v38 }
 0x769   : > { %v3111_v19 = vpop.eup %3110 }
 0x76a   : > { %2406 = vadd.xlane.f32.xlu1 %v3111_v19 }
 0x76d   : > { %v3113_v18 = vpop.eup %3112 }
 0x76e   : > { %2408 = vadd.xlane.f32.xlu0 %v3113_v18 }
 0x771   : > { %v3115_v28 = vpop.eup %3114 }
 0x772   : > { %2410 = vadd.xlane.f32.xlu1 %v3115_v28 }
 0x7bf   : > { %v2381_v26 = vpop.xlane.xlu0 %2380 }
 0x7c0   : > { %3116 = vlog2.f32 %v2381_v26 }
 0x7c3   : > { %v2383_v0 = vpop.xlane.xlu1 %2382 }
 0x7c4   : > { %3118 = vlog2.f32 %v2383_v0 }
 0x7c7   : > { %v2385_v44 = vpop.xlane.xlu0 %2384 }
 0x7c8   : > { %3120 = vlog2.f32 %v2385_v44 }
 0x7cb   : > { %v2387_v22 = vpop.xlane.xlu1 %2386 }
 0x7cc   : > { %3122 = vlog2.f32 %v2387_v22 }
 0x7cd   : > { %v3117_v5 = vpop.eup %3116 }
 0x7ce   : > { %v2413_v43 = vmul.f32 0.6931472, %v3117_v5 }
 0x7cf   : > { %v2389_v14 = vpop.xlane.xlu0 %2388 }
 0x7d0   : > { %v2444_v58 = vsub.f32 %v3842_v23, %v2413_v43  ;;  %3124 = vlog2.f32 %v2389_v14 }
 0x7d1   : > { %v3119_v40 = vpop.eup %3118 }
 0x7d2   : > { %2461 = vst [vmem:[%s3978_s6 + $0x8] sm:$0xff] %v2444_v58  ;;  %v2415_v31 = vmul.f32 0.6931472, %v3119_v40 }
 0x7d3   : > { %v2391_v48 = vpop.xlane.xlu1 %2390 }
 0x7d4   : > { %v2445_v61 = vsub.f32 %v3846_v39, %v2415_v31  ;;  %3126 = vlog2.f32 %v2391_v48 }
 0x7d5   : > { %v3121_v10 = vpop.eup %3120 }
 0x7d6   : > { %2463 = vst [vmem:[%s3978_s6 + $0x18] sm:$0xff] %v2445_v61  ;;  %v2417_v9 = vmul.f32 0.6931472, %v3121_v10 }
 0x7d7   : > { %v2393_v13 = vpop.xlane.xlu0 %2392 }
 0x7d8   : > { %v2446_v23 = vsub.f32 %v3850_v53, %v2417_v9  ;;  %3128 = vlog2.f32 %v2393_v13 }
 0x7d9   : > { %v3123_v7 = vpop.eup %3122 }
 0x7da   : > { %2465 = vst [vmem:[%s3978_s6 + $0x28] sm:$0xff] %v2446_v23  ;;  %v2419_v1 = vmul.f32 0.6931472, %v3123_v7 }
 0x7db   : > { %v2395_v24 = vpop.xlane.xlu1 %2394 }
 0x7dc   : > { %v2447_v39 = vsub.f32 %v3854_v62, %v2419_v1  ;;  %3130 = vlog2.f32 %v2395_v24 }
 0x7dd   : > { %v3125_v51 = vpop.eup %3124 }
 0x7de   : > { %2467 = vst [vmem:[%s3978_s6 + $0x38] sm:$0xff] %v2447_v39  ;;  %v2421_v15 = vmul.f32 0.6931472, %v3125_v51 }
 0x7df   : > { %v2397_v17 = vpop.xlane.xlu0 %2396 }
 0x7e0   : > { %v2448_v53 = vsub.f32 %v3858_v36, %v2421_v15  ;;  %3132 = vlog2.f32 %v2397_v17 }
 0x7e1   : > { %v3127_v47 = vpop.eup %3126 }
 0x7e2   : > { %2469 = vst [vmem:[%s3978_s6 + $0x48] sm:$0xff] %v2448_v53  ;;  %v2423_v27 = vmul.f32 0.6931472, %v3127_v47 }
 0x7e3   : > { %v2399_v32 = vpop.xlane.xlu1 %2398 }
 0x7e4   : > { %v2449_v62 = vsub.f32 %v3862_v42, %v2423_v27  ;;  %3134 = vlog2.f32 %v2399_v32 }
 0x7e5   : > { %v3129_v8 = vpop.eup %3128 }
 0x7e6   : > { %2471 = vst [vmem:[%s3978_s6 + $0x58] sm:$0xff] %v2449_v62  ;;  %v2425_v33 = vmul.f32 0.6931472, %v3129_v8 }
 0x7e7   : > { %v2401_v46 = vpop.xlane.xlu0 %2400 }
 0x7e8   : > { %v2450_v36 = vsub.f32 %v3866_v41, %v2425_v33  ;;  %3136 = vlog2.f32 %v2401_v46 }
 0x7e9   : > { %v3131_v34 = vpop.eup %3130 }
 0x7ea   : > { %2473 = vst [vmem:[%s3978_s6 + $0x68] sm:$0xff] %v2450_v36  ;;  %v2427_v49 = vmul.f32 0.6931472, %v3131_v34 }
 0x7eb   : > { %v2403_v2 = vpop.xlane.xlu1 %2402 }
 0x7ec   : > { %v2451_v42 = vsub.f32 %v3870_v20, %v2427_v49  ;;  %3138 = vlog2.f32 %v2403_v2 }
 0x7ed   : > { %v3133_v30 = vpop.eup %3132 }
 0x7ee   : > { %2475 = vst [vmem:[%s3978_s6 + $0x78] sm:$0xff] %v2451_v42  ;;  %v2429_v52 = vmul.f32 0.6931472, %v3133_v30 }
 0x7ef   : > { %v2405_v16 = vpop.xlane.xlu0 %2404 }
 0x7f0   : > { %v2452_v41 = vsub.f32 %v3874_v25, %v2429_v52  ;;  %3140 = vlog2.f32 %v2405_v16 }
 0x7f1   : > { %v3135_v35 = vpop.eup %3134 }
 0x7f2   : > { %2477 = vst [vmem:[%s3978_s6 + $0x88] sm:$0xff] %v2452_v41  ;;  %v2431_v54 = vmul.f32 0.6931472, %v3135_v35 }
 0x7f3   : > { %v2407_v21 = vpop.xlane.xlu1 %2406 }
 0x7f4   : > { %v2453_v20 = vsub.f32 %v3878_v59, %v2431_v54  ;;  %3142 = vlog2.f32 %v2407_v21 }
 0x7f5   : > { %v3137_v11 = vpop.eup %3136 }
 0x7f6   : > { %2479 = vst [vmem:[%s3978_s6 + $0x98] sm:$0xff] %v2453_v20  ;;  %v2433_v12 = vmul.f32 0.6931472, %v3137_v11 }
 0x7f7   : > { %v2409_v63 = vpop.xlane.xlu0 %2408 }
 0x7f8   : > { %v2454_v25 = vsub.f32 %v3882_v56, %v2433_v12  ;;  %3144 = vlog2.f32 %v2409_v63 }
 0x7f9   : > { %v3139_v37 = vpop.eup %3138 }
 0x7fa   : > { %2481 = vst [vmem:[%s3978_s6 + $0xa8] sm:$0xff] %v2454_v25  ;;  %v2435_v45 = vmul.f32 0.6931472, %v3139_v37 }
 0x7fb   : > { %v2411_v57 = vpop.xlane.xlu1 %2410 }
 0x7fc   : > { %v2455_v59 = vsub.f32 %v3886_v3, %v2435_v45  ;;  %3146 = vlog2.f32 %v2411_v57 }
 0x7fd   : > { %v3141_v6 = vpop.eup %3140 }
 0x7fe   : > { %2483 = vst [vmem:[%s3978_s6 + $0xb8] sm:$0xff] %v2455_v59  ;;  %v2437_v29 = vmul.f32 0.6931472, %v3141_v6 }
 0x800   : > { %v2456_v38 = vsub.f32 %v3890_v60, %v2437_v29 }
 0x801   : > { %v3143_v56 = vpop.eup %3142 }
 0x802   : > { %2485 = vst [vmem:[%s3978_s6 + $0xc8] sm:$0xff] %v2456_v38  ;;  %v2439_v19 = vmul.f32 0.6931472, %v3143_v56 }
 0x804   : > { %v2457_v18 = vsub.f32 %v3894_v4, %v2439_v19 }
 0x805   : > { %v3145_v28 = vpop.eup %3144 }
 0x806   : > { %2487 = vst [vmem:[%s3978_s6 + $0xd8] sm:$0xff] %v2457_v18  ;;  %v2441_v3 = vmul.f32 0.6931472, %v3145_v28 }
 0x808   : > { %v2458_v26 = vsub.f32 %v3898_v50, %v2441_v3 }
 0x809   : > { %v3147_v0 = vpop.eup %3146 }
 0x80a   : > { %2489 = vst [vmem:[%s3978_s6 + $0xe8] sm:$0xff] %v2458_v26  ;;  %v2443_v60 = vmul.f32 0.6931472, %v3147_v0 }
 0x80c   : > { %v2459_v44 = vsub.f32 %v3902_v55, %v2443_v60 }
 0x80e   : > { %2491 = vst [vmem:[%s3978_s6 + $0xf8] sm:$0xff] %v2459_v44 }
 0x80f PF: > { %s16_s21 = sadd.s32 1, %s3156_s21  }
 0x810   : > { %p13_p9 = scmp.ge.s32.totalorder %s16_s21, 7  }
 0x812   :  { %15 = sbr.rel (!%p13_p9) target bundleno = 1 (0x1), region = 139 }
 0x817   :  { %2503 = vsyncmov [#allocation4] }
 0x81a   :  { %s2504_s25 = vpop.sfrf %2503 }
 0x81b   :  { %p2681_p10 = scmp.ne.s32.totalorder %s2504_s25, 0 }
 0x81d   :  { %2508 = shalt.err (%p2681_p10)  }

</bundles_post_ra>
